<compile_context>
chip_gen: v5e
topology: v5e:2x2
jax: 0.10.0
libtpu: 0.0.40
codegen_flags: <defaults>
</compile_context>

<pallas_src>
import functools

import jax
import jax.numpy as jnp
from jax.experimental import pallas as pl
from jax.experimental.pallas import tpu as pltpu

BN_EPS = 1e-5
CPAD = 8          # conv1 input-channel dim padded 3 -> 8 (aligned sublanes / K)
FEAT_DIM = 1024   # global feature width


# -----------------------------------------------------------------------------
# Shared math helpers (same ops in kernels and the pure-JAX reference:
# bf16 operands, f32 accumulation, f32 bias/ReLU/max).
# -----------------------------------------------------------------------------
def _bf16(v):
    return v.astype(jnp.bfloat16)


def _conv1(x_cl, w1, b1):
    """First 1x1 conv (+ folded BN) + ReLU: (..., CPAD) @ (CPAD, 64)."""
    h = jnp.dot(_bf16(x_cl), w1, preferred_element_type=jnp.float32) + b1
    return jnp.maximum(h, 0.0)


def _tail_convs(h, w2, b2, w3, b3, *, relu_last):
    """conv2(+BN,ReLU) -> conv3(+BN[, ReLU])."""
    h = jnp.dot(_bf16(h), w2, preferred_element_type=jnp.float32) + b2
    h = jnp.maximum(h, 0.0)
    h = jnp.dot(_bf16(h), w3, preferred_element_type=jnp.float32) + b3
    return jnp.maximum(h, 0.0) if relu_last else h


def _fc_head(g, f1, fb1, f2, fb2, f3, fb3):
    """relu(fc1+BN) -> relu(fc2+BN) -> fc3. Dropout(p=0.3) = identity at inference."""
    z = jnp.dot(_bf16(g), f1, preferred_element_type=jnp.float32) + fb1
    z = jnp.maximum(z, 0.0)
    z = jnp.dot(_bf16(z), f2, preferred_element_type=jnp.float32) + fb2
    z = jnp.maximum(z, 0.0)
    return jnp.dot(_bf16(z), f3, preferred_element_type=jnp.float32) + fb3


def _accum_max(h, m_ref, n_blk, *, tn, n_valid, n_total):
    """Running max over points as VPU elementwise maxes into an (8, FEAT_DIM) slab."""
    if n_valid != n_total:  # static: only when the point dim was padded
        pid = jax.lax.broadcasted_iota(jnp.int32, (tn, 1), 0) + n_blk * tn
        h = jnp.where(pid < n_valid, h, -jnp.inf)
    part = jnp.max(h.reshape(tn // 8, 8, FEAT_DIM), axis=0)   # VPU (leading-dim reduce)
    m_ref[...] = jnp.maximum(m_ref[...], part)


# -----------------------------------------------------------------------------
# Kernel 1: STN3d encoder (conv1/2/3 + BN + ReLU, tiled max-pool over points).
#   grid = (B, N_pad // TN); batch parallel, point axis arbitrary (reduction).
#   Output: pooled global feature (B, 1, 1024). FC head runs outside (batched XLA).
# -----------------------------------------------------------------------------
def _stn_kernel(x_ref, w1, b1, w2, b2, w3, b3, g_ref, m_ref,
                *, tn, n_valid, n_total):
    n = pl.program_id(1)

    @pl.when(n == 0)
    def _init():
        m_ref[...] = jnp.full_like(m_ref, -jnp.inf)

    x_cl = jnp.transpose(x_ref[0], (1, 0))                        # (tn, CPAD) f32
    h = _conv1(x_cl, w1[...], b1[...])                            # (tn, 64)
    h = _tail_convs(h, w2[...], b2[...], w3[...], b3[...], relu_last=True)
    _accum_max(h, m_ref, n, tn=tn, n_valid=n_valid, n_total=n_total)

    @pl.when(n == pl.num_programs(1) - 1)
    def _finish():
        g_ref[0] = jnp.max(m_ref[...], axis=0, keepdims=True)     # (1, 1024)


_CONST2D = lambda b, n: (0, 0)


def _stn_call(xp, conv_wts, tn, n_valid):
    B, c8, n_total = xp.shape
    kern = functools.partial(_stn_kernel, tn=tn, n_valid=n_valid, n_total=n_total)
    in_specs = [pl.BlockSpec((1, c8, tn), lambda b, n: (b, 0, n))]
    in_specs += [pl.BlockSpec(w.shape, _CONST2D) for w in conv_wts]
    g = pl.pallas_call(
        kern,
        out_shape=jax.ShapeDtypeStruct((B, 1, FEAT_DIM), jnp.float32),
        grid=(B, n_total // tn),
        in_specs=in_specs,
        out_specs=pl.BlockSpec((1, 1, FEAT_DIM), lambda b, n: (b, 0, 0)),
        scratch_shapes=[pltpu.VMEM((8, FEAT_DIM), jnp.float32)],
        compiler_params=pltpu.CompilerParams(
            dimension_semantics=("parallel", "arbitrary"),
            vmem_limit_bytes=64 * 1024 * 1024),
    )(xp, *conv_wts)
    return g[:, 0, :]                                             # (B, 1024)


# -----------------------------------------------------------------------------
# Kernel 2: PointNetfeat encoder with the 3x3 input transform fused in.
#   Emits: pooled global feature (B, 1, 1024) and trans_in (B, 3, N_pad) directly in
#   channels-first, lane-dense layout. Classifier head runs outside.
# -----------------------------------------------------------------------------
def _feat_kernel(x_ref, t_ref, w1e_ref, b1, w2, b2, w3, b3, g_ref, y_ref, m_ref,
                 *, tn, n_valid, n_total):
    n = pl.program_id(1)

    @pl.when(n == 0)
    def _init():
        m_ref[...] = jnp.full_like(m_ref, -jnp.inf)

    x = x_ref[0]                                                  # (CPAD, tn); rows 3.. are 0
    t = t_ref[0]                                                  # (3, 3) f32

    # trans_in: y[j, :] = sum_i trans[i, j] * x[i, :]   (9 VPU FMAs, f32, no MXU)
    for j in range(3):
        row = (x[0:1, :] * t[0:1, j:j + 1] +
               x[1:2, :] * t[1:2, j:j + 1] +
               x[2:3, :] * t[2:3, j:j + 1])                       # (1, tn)
        y_ref[0, j:j + 1, :] = row

    # conv1 with the transform folded into the per-batch weight (trans @ W1):
    #   h1 = (x @ trans) @ W1 = x @ W1_eff
    x_cl = jnp.transpose(x, (1, 0))                               # (tn, CPAD)
    h = _conv1(x_cl, w1e_ref[0], b1[...])                         # (tn, 64)
    h = _tail_convs(h, w2[...], b2[...], w3[...], b3[...], relu_last=False)
    _accum_max(h, m_ref, n, tn=tn, n_valid=n_valid, n_total=n_total)

    @pl.when(n == pl.num_programs(1) - 1)
    def _finish():
        g_ref[0] = jnp.max(m_ref[...], axis=0, keepdims=True)     # (1, 1024)


def _feat_call(xp, trans, w1_eff, b1, conv23, tn, n_valid):
    B, c8, n_total = xp.shape
    w2, b2, w3, b3 = conv23
    kern = functools.partial(_feat_kernel, tn=tn, n_valid=n_valid, n_total=n_total)
    in_specs = [
        pl.BlockSpec((1, c8, tn), lambda b, n: (b, 0, n)),        # points tile
        pl.BlockSpec((1, 3, 3), lambda b, n: (b, 0, 0)),          # per-batch 3x3 transform
        pl.BlockSpec((1, c8, 64), lambda b, n: (b, 0, 0)),        # per-batch folded conv1 weight
        pl.BlockSpec(b1.shape, _CONST2D),
        pl.BlockSpec(w2.shape, _CONST2D),
        pl.BlockSpec(b2.shape, _CONST2D),
        pl.BlockSpec(w3.shape, _CONST2D),
        pl.BlockSpec(b3.shape, _CONST2D),
    ]
    g, y = pl.pallas_call(
        kern,
        out_shape=(jax.ShapeDtypeStruct((B, 1, FEAT_DIM), jnp.float32),
                   jax.ShapeDtypeStruct((B, 3, n_total), jnp.float32)),
        grid=(B, n_total // tn),
        in_specs=in_specs,
        out_specs=(pl.BlockSpec((1, 1, FEAT_DIM), lambda b, n: (b, 0, 0)),
                   pl.BlockSpec((1, 3, tn), lambda b, n: (b, 0, n))),
        scratch_shapes=[pltpu.VMEM((8, FEAT_DIM), jnp.float32)],
        compiler_params=pltpu.CompilerParams(
            dimension_semantics=("parallel", "arbitrary"),
            vmem_limit_bytes=64 * 1024 * 1024),
    )(xp, trans, w1_eff, b1, w2, b2, w3, b3)
    return g[:, 0, :], y                                          # (B, 1024), (B, 3, N_pad)


# -----------------------------------------------------------------------------
# Parameter construction (deterministic, synthetic) and one-time BN folding.
# -----------------------------------------------------------------------------
def _init_layer(key, cout, cin, scale=0.1):
    kw, kb, kg, kbeta, km, kv = jax.random.split(key, 6)
    return dict(
        w=scale * jax.random.normal(kw, (cout, cin), jnp.float32),
        b=scale * jax.random.normal(kb, (cout,), jnp.float32),
        gamma=1.0 + 0.05 * jax.random.normal(kg, (cout,), jnp.float32),
        beta=0.05 * jax.random.normal(kbeta, (cout,), jnp.float32),
        mean=0.05 * jax.random.normal(km, (cout,), jnp.float32),
        var=1.0 + 0.1 * jnp.abs(jax.random.normal(kv, (cout,), jnp.float32)),
    )


def _init_plain(key, cout, cin, scale=0.1):
    kw, kb = jax.random.split(key, 2)
    return dict(
        w=scale * jax.random.normal(kw, (cout, cin), jnp.float32),
        b=scale * jax.random.normal(kb, (cout,), jnp.float32),
    )


def init_params(key, k=2):
    keys = jax.random.split(key, 12)
    p = {}
    # STN3d
    p["stn_c1"] = _init_layer(keys[0], 64, 3)
    p["stn_c2"] = _init_layer(keys[1], 128, 64)
    p["stn_c3"] = _init_layer(keys[2], 1024, 128)
    p["stn_f1"] = _init_layer(keys[3], 512, 1024)
    p["stn_f2"] = _init_layer(keys[4], 256, 512)
    p["stn_f3"] = _init_plain(keys[5], 9, 256)
    # PointNetfeat
    p["feat_c1"] = _init_layer(keys[6], 64, 3)
    p["feat_c2"] = _init_layer(keys[7], 128, 64)
    p["feat_c3"] = _init_layer(keys[8], 1024, 128)
    # Classifier head
    p["cls_f1"] = _init_layer(keys[9], 512, 1024)
    p["cls_f2"] = _init_layer(keys[10], 256, 512)
    p["cls_f3"] = _init_plain(keys[11], k, 256)
    return p


def prepare_params(p):
    """Fold BN into weights, transpose to (Cin, Cout), cast matmul weights to bf16,
    pad the 3-channel conv1 weights to CPAD rows. Done once, outside the forward."""
    def fold(layer):
        s = layer["gamma"] * jax.lax.rsqrt(layer["var"] + BN_EPS)
        w = (layer["w"] * s[:, None]).T.astype(jnp.float32)             # (Cin, Cout)
        b = ((layer["b"] - layer["mean"]) * s + layer["beta"]).reshape(1, -1)
        return w, b.astype(jnp.float32)

    def plain(layer):
        return (layer["w"].T.astype(jnp.float32),
                layer["b"].reshape(1, -1).astype(jnp.float32))

    def pad8(w):                                                        # (3, C) -> (CPAD, C)
        return jnp.pad(w, ((0, CPAD - w.shape[0]), (0, 0)))

    sw1, sb1 = fold(p["stn_c1"]); sw2, sb2 = fold(p["stn_c2"]); sw3, sb3 = fold(p["stn_c3"])
    sf1, sfb1 = fold(p["stn_f1"]); sf2, sfb2 = fold(p["stn_f2"]); sf3, sfb3 = plain(p["stn_f3"])
    fw1, fb1 = fold(p["feat_c1"]); fw2, fb2 = fold(p["feat_c2"]); fw3, fb3 = fold(p["feat_c3"])
    cf1, cfb1 = fold(p["cls_f1"]); cf2, cfb2 = fold(p["cls_f2"]); cf3, cfb3 = plain(p["cls_f3"])

    bf = _bf16
    return {
        "stn_conv": (bf(pad8(sw1)), sb1, bf(sw2), sb2, bf(sw3), sb3),
        "stn_head": (bf(sf1), sfb1, bf(sf2), sfb2, bf(sf3), sfb3),
        "feat_w1_f32": fw1,                  # (3, 64) f32, folded with trans per batch
        "feat_b1": fb1,                      # (1, 64) f32
        "feat_conv23": (bf(fw2), fb2, bf(fw3), fb3),
        "cls_head": (bf(cf1), cfb1, bf(cf2), cfb2, bf(cf3), cfb3),
    }


def _pick_tile(n):
    for t in (1024, 512, 256):
        if n % t == 0:
            return t
    return 128 if n < 1024 else 512


# -----------------------------------------------------------------------------
# Full forward: x (B, 3, N) -> (logits (B, k), trans_in (B, 3, N), None)
# -----------------------------------------------------------------------------
def pointnet_cls_forward(x_b3n, fw, *, tn=None):
    B, C, N = x_b3n.shape
    assert C == 3
    if tn is None:
        tn = _pick_tile(N)
    n_pad = pl.cdiv(N, tn) * tn
    # Channels-first input padded once: channels 3 -> CPAD, points N -> tile multiple.
    xp = jnp.pad(x_b3n, ((0, 0), (0, CPAD - C), (0, n_pad - N)))

    # STN3d: fused per-point MLP + max-pool kernel; tiny FC head as batched XLA matmuls.
    g_stn = _stn_call(xp, fw["stn_conv"], tn, N)                               # (B, 1024)
    t9 = _fc_head(g_stn, *fw["stn_head"]) + jnp.eye(3, dtype=jnp.float32).reshape(1, 9)
    trans = t9.reshape(B, 3, 3)

    # Fold the input transform into conv1: h1 = (x @ trans) @ W1 = x @ (trans @ W1).
    w1_eff = jnp.einsum("bij,jc->bic", trans, fw["feat_w1_f32"])               # (B, 3, 64)
    w1_eff = _bf16(jnp.pad(w1_eff, ((0, 0), (0, CPAD - 3), (0, 0))))           # (B, CPAD, 64)

    g_feat, y = _feat_call(xp, trans, w1_eff, fw["feat_b1"], fw["feat_conv23"], tn, N)
    logits = _fc_head(g_feat, *fw["cls_head"])                                 # (B, k)
    trans_in = y[:, :, :N]                                                     # (B, 3, N)
    return logits, trans_in, None


# -----------------------------------------------------------------------------
# Pure-JAX reference (same folded weights, same math decomposition) for validation.
# -----------------------------------------------------------------------------
def _ref_forward(x_b3n, fw):
    B, C, N = x_b3n.shape
    x_cl = jnp.transpose(x_b3n, (0, 2, 1)).astype(jnp.float32)                 # (B, N, 3)
    x8 = jnp.pad(x_cl, ((0, 0), (0, 0), (0, CPAD - C)))                        # (B, N, CPAD)

    sw1, sb1, sw2, sb2, sw3, sb3 = fw["stn_conv"]
    h = _conv1(x8, sw1, sb1)
    h = _tail_convs(h, sw2, sb2, sw3, sb3, relu_last=True)
    g_stn = jnp.max(h, axis=1)                                                 # (B, 1024)
    t9 = _fc_head(g_stn, *fw["stn_head"]) + jnp.eye(3, dtype=jnp.float32).reshape(1, 9)
    trans = t9.reshape(B, 3, 3)

    y = jnp.einsum("bnc,bcd->bnd", x_cl, trans)                                # (B, N, 3)
    trans_in = jnp.transpose(y, (0, 2, 1))                                     # (B, 3, N)

    w1_eff = jnp.einsum("bij,jc->bic", trans, fw["feat_w1_f32"])
    w1_eff = _bf16(jnp.pad(w1_eff, ((0, 0), (0, CPAD - 3), (0, 0))))
    h = jnp.einsum("bnc,bce->bne", _bf16(x8), w1_eff,
                   preferred_element_type=jnp.float32) + fw["feat_b1"]
    h = jnp.maximum(h, 0.0)
    fw2, fb2, fw3, fb3 = fw["feat_conv23"]
    h = _tail_convs(h, fw2, fb2, fw3, fb3, relu_last=False)
    g_feat = jnp.max(h, axis=1)                                                # (B, 1024)
    logits = _fc_head(g_feat, *fw["cls_head"])
    return logits, trans_in, None


if __name__ == "__main__":
    B, C, N, K = 2, 3, 500, 2       # N=500: exercises point tiling, padding and masking

    key = jax.random.PRNGKey(0)
    kx, kp = jax.random.split(key)
    x = jax.random.normal(kx, (B, C, N), jnp.float32)
    params = init_params(kp, k=K)
    fw = prepare_params(params)     # fold BN / transpose / cast once, outside the forward

    forward = jax.jit(pointnet_cls_forward)
    logits, trans_in, trans_feat = forward(x, fw)
    logits = jax.block_until_ready(logits)
    trans_in = jax.block_until_ready(trans_in)

    ref_logits, ref_trans_in, _ = _ref_forward(x, fw)
    assert logits.shape == (B, K) and trans_in.shape == (B, C, N)
    assert bool(jnp.all(jnp.isfinite(logits))) and bool(jnp.all(jnp.isfinite(trans_in)))
    assert jnp.allclose(logits, ref_logits, rtol=1e-2, atol=1e-2)
    assert jnp.allclose(trans_in, ref_trans_in, rtol=1e-2, atol=1e-2)
    assert trans_feat is None

    print("KERNEL_OK")
</pallas_src>

<mosaic_0001>
module attributes {stable_mosaic.version = 11 : i64} {
  func.func @_stn_kernel(%arg0: i32, %arg1: i32, %arg2: memref<1x8x128xf32, #tpu.memory_space<vmem>>, %arg3: memref<8x64xbf16, #tpu.memory_space<vmem>>, %arg4: memref<1x64xf32, #tpu.memory_space<vmem>>, %arg5: memref<64x128xbf16, #tpu.memory_space<vmem>>, %arg6: memref<1x128xf32, #tpu.memory_space<vmem>>, %arg7: memref<128x1024xbf16, #tpu.memory_space<vmem>>, %arg8: memref<1x1024xf32, #tpu.memory_space<vmem>>, %arg9: memref<1x1x1024xf32, #tpu.memory_space<vmem>>, %arg10: memref<8x1024xf32, #tpu.memory_space<vmem>>) attributes {dimension_semantics = [#tpu.dimension_semantics<parallel>, #tpu.dimension_semantics<arbitrary>], iteration_bounds = array<i64: 2, 4>, scalar_prefetch = 0 : i64, scratch_operands = 1 : i64, tpu.core_type = #tpu.core_type<tc>, window_params = [{transform_indices = @transform_0, window_bounds = array<i64: 1, 8, 128>}, {pipeline_mode = #tpu.pipeline_mode<synchronous>, transform_indices = @transform_1, window_bounds = array<i64: 8, 64>}, {pipeline_mode = #tpu.pipeline_mode<synchronous>, transform_indices = @transform_2, window_bounds = array<i64: 1, 64>}, {pipeline_mode = #tpu.pipeline_mode<synchronous>, transform_indices = @transform_3, window_bounds = array<i64: 64, 128>}, {pipeline_mode = #tpu.pipeline_mode<synchronous>, transform_indices = @transform_4, window_bounds = array<i64: 1, 128>}, {pipeline_mode = #tpu.pipeline_mode<synchronous>, transform_indices = @transform_5, window_bounds = array<i64: 128, 1024>}, {pipeline_mode = #tpu.pipeline_mode<synchronous>, transform_indices = @transform_6, window_bounds = array<i64: 1, 1024>}, {transform_indices = @transform_7, window_bounds = array<i64: 1, 1, 1024>}]} {
    %c0_i32 = arith.constant 0 : i32
    %0 = arith.cmpi eq, %arg1, %c0_i32 : i32
    %1 = arith.extui %0 : i1 to i32
    %c0_i32_0 = arith.constant 0 : i32
    %2 = arith.cmpi ne, %1, %c0_i32_0 : i32
    scf.if %2 {
      %cst_27 = arith.constant 0xFF800000 : f32
      %48 = vector.broadcast %cst_27 : f32 to vector<8x1024xf32>
      %c0_28 = arith.constant 0 : index
      %c0_29 = arith.constant 0 : index
      %49 = vector.load %arg10[%c0_28, %c0_29] : memref<8x1024xf32, #tpu.memory_space<vmem>>, vector<8x1024xf32>
      tpu.vector_store %arg10[%c0_28, %c0_29], %48 {strides = array<i32>} : memref<8x1024xf32, #tpu.memory_space<vmem>>, vector<8x1024xf32>,
    } else {
    }
    %c0 = arith.constant 0 : index
    %c0_1 = arith.constant 0 : index
    %c0_2 = arith.constant 0 : index
    %3 = vector.load %arg2[%c0, %c0_1, %c0_2] : memref<1x8x128xf32, #tpu.memory_space<vmem>>, vector<1x8x128xf32>
    %4 = vector.shape_cast %3 : vector<1x8x128xf32> to vector<8x128xf32>
    %5 = tpu.transpose %4, [1, 0] : vector<8x128xf32> -> vector<128x8xf32>
    %c0_3 = arith.constant 0 : index
    %c0_4 = arith.constant 0 : index
    %6 = vector.load %arg3[%c0_3, %c0_4] : memref<8x64xbf16, #tpu.memory_space<vmem>>, vector<8x64xbf16>
    %c0_5 = arith.constant 0 : index
    %c0_6 = arith.constant 0 : index
    %7 = vector.load %arg4[%c0_5, %c0_6] : memref<1x64xf32, #tpu.memory_space<vmem>>, vector<1x64xf32>
    %8 = arith.truncf %5 : vector<128x8xf32> to vector<128x8xbf16>
    %cst = arith.constant dense<0.000000e+00> : vector<128x64xf32>
    %9 = tpu.matmul %8, %6, %cst {dimension_numbers = #tpu.dot_dimension_numbers<[1], [0], [0], [1], [0, 0, 1, 1], [], []>} : vector<128x8xbf16>, vector<8x64xbf16>, vector<128x64xf32> -> vector<128x64xf32>
    %10 = vector.broadcast %7 : vector<1x64xf32> to vector<128x64xf32>
    %11 = arith.addf %9, %10 : vector<128x64xf32>
    %cst_7 = arith.constant 0.000000e+00 : f32
    %12 = vector.broadcast %cst_7 : f32 to vector<128x64xf32>
    %13 = arith.maximumf %11, %12 : vector<128x64xf32>
    %c0_8 = arith.constant 0 : index
    %c0_9 = arith.constant 0 : index
    %14 = vector.load %arg5[%c0_8, %c0_9] : memref<64x128xbf16, #tpu.memory_space<vmem>>, vector<64x128xbf16>
    %c0_10 = arith.constant 0 : index
    %c0_11 = arith.constant 0 : index
    %15 = vector.load %arg6[%c0_10, %c0_11] : memref<1x128xf32, #tpu.memory_space<vmem>>, vector<1x128xf32>
    %c0_12 = arith.constant 0 : index
    %c0_13 = arith.constant 0 : index
    %16 = vector.load %arg7[%c0_12, %c0_13] : memref<128x1024xbf16, #tpu.memory_space<vmem>>, vector<128x1024xbf16>
    %c0_14 = arith.constant 0 : index
    %c0_15 = arith.constant 0 : index
    %17 = vector.load %arg8[%c0_14, %c0_15] : memref<1x1024xf32, #tpu.memory_space<vmem>>, vector<1x1024xf32>
    %18 = arith.truncf %13 : vector<128x64xf32> to vector<128x64xbf16>
    %cst_16 = arith.constant dense<0.000000e+00> : vector<128x128xf32>
    %19 = tpu.matmul %18, %14, %cst_16 {dimension_numbers = #tpu.dot_dimension_numbers<[1], [0], [0], [1], [0, 0, 1, 1], [], []>} : vector<128x64xbf16>, vector<64x128xbf16>, vector<128x128xf32> -> vector<128x128xf32>
    %20 = vector.broadcast %15 : vector<1x128xf32> to vector<128x128xf32>
    %21 = arith.addf %19, %20 : vector<128x128xf32>
    %cst_17 = arith.constant 0.000000e+00 : f32
    %22 = vector.broadcast %cst_17 : f32 to vector<128x128xf32>
    %23 = arith.maximumf %21, %22 : vector<128x128xf32>
    %24 = arith.truncf %23 : vector<128x128xf32> to vector<128x128xbf16>
    %cst_18 = arith.constant dense<0.000000e+00> : vector<128x1024xf32>
    %25 = tpu.matmul %24, %16, %cst_18 {dimension_numbers = #tpu.dot_dimension_numbers<[1], [0], [0], [1], [0, 0, 1, 1], [], []>} : vector<128x128xbf16>, vector<128x1024xbf16>, vector<128x1024xf32> -> vector<128x1024xf32>
    %26 = vector.broadcast %17 : vector<1x1024xf32> to vector<128x1024xf32>
    %27 = arith.addf %25, %26 : vector<128x1024xf32>
    %cst_19 = arith.constant 0.000000e+00 : f32
    %28 = vector.broadcast %cst_19 : f32 to vector<128x1024xf32>
    %29 = arith.maximumf %27, %28 : vector<128x1024xf32>
    %30 = tpu.iota {dimensions = array<i32: 0>} : vector<128x1xi32>
    %c128_i32 = arith.constant 128 : i32
    %31 = arith.muli %arg1, %c128_i32 : i32
    %32 = vector.broadcast %31 : i32 to vector<128x1xi32>
    %33 = arith.addi %30, %32 : vector<128x1xi32>
    %c500_i32 = arith.constant 500 : i32
    %34 = vector.broadcast %c500_i32 : i32 to vector<128x1xi32>
    %35 = arith.cmpi slt, %33, %34 : vector<128x1xi32>
    %cst_20 = arith.constant 0xFF800000 : f32
    %36 = vector.shape_cast %35 : vector<128x1xi1> to vector<128x1xi1>
    %37 = vector.broadcast %36 : vector<128x1xi1> to vector<128x1024xi1>
    %38 = vector.broadcast %cst_20 : f32 to vector<128x1024xf32>
    %39 = arith.select %37, %29, %38 : vector<128x1024xi1>, vector<128x1024xf32>
    %40 = vector.shape_cast %39 : vector<128x1024xf32> to vector<16x8x1024xf32>
    %cst_21 = arith.constant dense<0xFF800000> : vector<8x1024xf32>
    %41 = vector.multi_reduction <maximumf>, %40, %cst_21 [0] : vector<16x8x1024xf32> to vector<8x1024xf32>
    %c0_22 = arith.constant 0 : index
    %c0_23 = arith.constant 0 : index
    %42 = vector.load %arg10[%c0_22, %c0_23] : memref<8x1024xf32, #tpu.memory_space<vmem>>, vector<8x1024xf32>
    %43 = arith.maximumf %42, %41 : vector<8x1024xf32>
    %c0_24 = arith.constant 0 : index
    %c0_25 = arith.constant 0 : index
    %44 = vector.load %arg10[%c0_24, %c0_25] : memref<8x1024xf32, #tpu.memory_space<vmem>>, vector<8x1024xf32>
    tpu.vector_store %arg10[%c0_24, %c0_25], %43 {strides = array<i32>} : memref<8x1024xf32, #tpu.memory_space<vmem>>, vector<8x1024xf32>,
    %c3_i32 = arith.constant 3 : i32
    %45 = arith.cmpi eq, %arg1, %c3_i32 : i32
    %46 = arith.extui %45 : i1 to i32
    %c0_i32_26 = arith.constant 0 : i32
    %47 = arith.cmpi ne, %46, %c0_i32_26 : i32
    scf.if %47 {
      %c0_27 = arith.constant 0 : index
      %c0_28 = arith.constant 0 : index
      %48 = vector.load %arg10[%c0_27, %c0_28] : memref<8x1024xf32, #tpu.memory_space<vmem>>, vector<8x1024xf32>
      %cst_29 = arith.constant dense<0xFF800000> : vector<1024xf32>
      %49 = vector.multi_reduction <maximumf>, %48, %cst_29 [0] : vector<8x1024xf32> to vector<1024xf32>
      %50 = vector.shape_cast %49 : vector<1024xf32> to vector<1x1024xf32>
      %c0_30 = arith.constant 0 : index
      %c0_31 = arith.constant 0 : index
      %c0_32 = arith.constant 0 : index
      %51 = vector.load %arg9[%c0_30, %c0_31, %c0_32] : memref<1x1x1024xf32, #tpu.memory_space<vmem>>, vector<1x1x1024xf32>
      %52 = vector.shape_cast %51 : vector<1x1x1024xf32> to vector<1x1024xf32>
      %53 = vector.shape_cast %50 : vector<1x1024xf32> to vector<1x1x1024xf32>
      tpu.vector_store %arg9[%c0_30, %c0_31, %c0_32], %53 {strides = array<i32>} : memref<1x1x1024xf32, #tpu.memory_space<vmem>>, vector<1x1x1024xf32>,
    } else {
    }
    return
  }
  func.func @transform_0(%arg0: i32, %arg1: i32) -> (i32, i32, i32) {
    %c0_i32 = arith.constant 0 : i32
    %c0_i32_0 = arith.constant 0 : i32
    return %arg0, %c0_i32, %arg1 : i32, i32, i32
  }
  func.func @transform_1(%arg0: i32, %arg1: i32) -> (i32, i32) {
    %c0_i32 = arith.constant 0 : i32
    %c0_i32_0 = arith.constant 0 : i32
    %c0_i32_1 = arith.constant 0 : i32
    return %c0_i32, %c0_i32_0 : i32, i32
  }
  func.func @transform_2(%arg0: i32, %arg1: i32) -> (i32, i32) {
    %c0_i32 = arith.constant 0 : i32
    %c0_i32_0 = arith.constant 0 : i32
    %c0_i32_1 = arith.constant 0 : i32
    return %c0_i32, %c0_i32_0 : i32, i32
  }
  func.func @transform_3(%arg0: i32, %arg1: i32) -> (i32, i32) {
    %c0_i32 = arith.constant 0 : i32
    %c0_i32_0 = arith.constant 0 : i32
    %c0_i32_1 = arith.constant 0 : i32
    return %c0_i32, %c0_i32_0 : i32, i32
  }
  func.func @transform_4(%arg0: i32, %arg1: i32) -> (i32, i32) {
    %c0_i32 = arith.constant 0 : i32
    %c0_i32_0 = arith.constant 0 : i32
    %c0_i32_1 = arith.constant 0 : i32
    return %c0_i32, %c0_i32_0 : i32, i32
  }
  func.func @transform_5(%arg0: i32, %arg1: i32) -> (i32, i32) {
    %c0_i32 = arith.constant 0 : i32
    %c0_i32_0 = arith.constant 0 : i32
    %c0_i32_1 = arith.constant 0 : i32
    return %c0_i32, %c0_i32_0 : i32, i32
  }
  func.func @transform_6(%arg0: i32, %arg1: i32) -> (i32, i32) {
    %c0_i32 = arith.constant 0 : i32
    %c0_i32_0 = arith.constant 0 : i32
    %c0_i32_1 = arith.constant 0 : i32
    return %c0_i32, %c0_i32_0 : i32, i32
  }
  func.func @transform_7(%arg0: i32, %arg1: i32) -> (i32, i32, i32) {
    %c0_i32 = arith.constant 0 : i32
    %c0_i32_0 = arith.constant 0 : i32
    %c0_i32_1 = arith.constant 0 : i32
    return %arg0, %c0_i32, %c0_i32_0 : i32, i32, i32
  }
}

module attributes {stable_mosaic.version = 11 : i64} {
  func.func @_feat_kernel(%arg0: i32, %arg1: i32, %arg2: memref<1x8x128xf32, #tpu.memory_space<vmem>>, %arg3: memref<1x3x3xf32, #tpu.memory_space<vmem>>, %arg4: memref<1x8x64xbf16, #tpu.memory_space<vmem>>, %arg5: memref<1x64xf32, #tpu.memory_space<vmem>>, %arg6: memref<64x128xbf16, #tpu.memory_space<vmem>>, %arg7: memref<1x128xf32, #tpu.memory_space<vmem>>, %arg8: memref<128x1024xbf16, #tpu.memory_space<vmem>>, %arg9: memref<1x1024xf32, #tpu.memory_space<vmem>>, %arg10: memref<1x1x1024xf32, #tpu.memory_space<vmem>>, %arg11: memref<1x3x128xf32, #tpu.memory_space<vmem>>, %arg12: memref<8x1024xf32, #tpu.memory_space<vmem>>) attributes {dimension_semantics = [#tpu.dimension_semantics<parallel>, #tpu.dimension_semantics<arbitrary>], iteration_bounds = array<i64: 2, 4>, scalar_prefetch = 0 : i64, scratch_operands = 1 : i64, tpu.core_type = #tpu.core_type<tc>, window_params = [{transform_indices = @transform_0, window_bounds = array<i64: 1, 8, 128>}, {transform_indices = @transform_1, window_bounds = array<i64: 1, 3, 3>}, {transform_indices = @transform_2, window_bounds = array<i64: 1, 8, 64>}, {pipeline_mode = #tpu.pipeline_mode<synchronous>, transform_indices = @transform_3, window_bounds = array<i64: 1, 64>}, {pipeline_mode = #tpu.pipeline_mode<synchronous>, transform_indices = @transform_4, window_bounds = array<i64: 64, 128>}, {pipeline_mode = #tpu.pipeline_mode<synchronous>, transform_indices = @transform_5, window_bounds = array<i64: 1, 128>}, {pipeline_mode = #tpu.pipeline_mode<synchronous>, transform_indices = @transform_6, window_bounds = array<i64: 128, 1024>}, {pipeline_mode = #tpu.pipeline_mode<synchronous>, transform_indices = @transform_7, window_bounds = array<i64: 1, 1024>}, {transform_indices = @transform_8, window_bounds = array<i64: 1, 1, 1024>}, {transform_indices = @transform_9, window_bounds = array<i64: 1, 3, 128>}]} {
    %c0_i32 = arith.constant 0 : i32
    %0 = arith.cmpi eq, %arg1, %c0_i32 : i32
    %1 = arith.extui %0 : i1 to i32
    %c0_i32_0 = arith.constant 0 : i32
    %2 = arith.cmpi ne, %1, %c0_i32_0 : i32
    scf.if %2 {
      %cst_37 = arith.constant 0xFF800000 : f32
      %100 = vector.broadcast %cst_37 : f32 to vector<8x1024xf32>
      %c0_38 = arith.constant 0 : index
      %c0_39 = arith.constant 0 : index
      %101 = vector.load %arg12[%c0_38, %c0_39] : memref<8x1024xf32, #tpu.memory_space<vmem>>, vector<8x1024xf32>
      tpu.vector_store %arg12[%c0_38, %c0_39], %100 {strides = array<i32>} : memref<8x1024xf32, #tpu.memory_space<vmem>>, vector<8x1024xf32>,
    } else {
    }
    %c0 = arith.constant 0 : index
    %c0_1 = arith.constant 0 : index
    %c0_2 = arith.constant 0 : index
    %3 = vector.load %arg2[%c0, %c0_1, %c0_2] : memref<1x8x128xf32, #tpu.memory_space<vmem>>, vector<1x8x128xf32>
    %4 = vector.shape_cast %3 : vector<1x8x128xf32> to vector<8x128xf32>
    %c0_3 = arith.constant 0 : index
    %c0_4 = arith.constant 0 : index
    %c0_5 = arith.constant 0 : index
    %5 = vector.load %arg3[%c0_3, %c0_4, %c0_5] : memref<1x3x3xf32, #tpu.memory_space<vmem>>, vector<1x3x3xf32>
    %6 = vector.shape_cast %5 : vector<1x3x3xf32> to vector<3x3xf32>
    %7 = vector.extract_strided_slice %4 {offsets = [0, 0], sizes = [1, 128], strides = [1, 1]} : vector<8x128xf32> to vector<1x128xf32>
    %8 = vector.extract_strided_slice %6 {offsets = [0, 0], sizes = [1, 1], strides = [1, 1]} : vector<3x3xf32> to vector<1x1xf32>
    %9 = vector.broadcast %8 : vector<1x1xf32> to vector<1x128xf32>
    %10 = arith.mulf %7, %9 : vector<1x128xf32>
    %11 = vector.extract_strided_slice %4 {offsets = [1, 0], sizes = [1, 128], strides = [1, 1]} : vector<8x128xf32> to vector<1x128xf32>
    %12 = vector.extract_strided_slice %6 {offsets = [1, 0], sizes = [1, 1], strides = [1, 1]} : vector<3x3xf32> to vector<1x1xf32>
    %13 = vector.broadcast %12 : vector<1x1xf32> to vector<1x128xf32>
    %14 = arith.mulf %11, %13 : vector<1x128xf32>
    %15 = arith.addf %10, %14 : vector<1x128xf32>
    %16 = vector.extract_strided_slice %4 {offsets = [2, 0], sizes = [1, 128], strides = [1, 1]} : vector<8x128xf32> to vector<1x128xf32>
    %17 = vector.extract_strided_slice %6 {offsets = [2, 0], sizes = [1, 1], strides = [1, 1]} : vector<3x3xf32> to vector<1x1xf32>
    %18 = vector.broadcast %17 : vector<1x1xf32> to vector<1x128xf32>
    %19 = arith.mulf %16, %18 : vector<1x128xf32>
    %20 = arith.addf %15, %19 : vector<1x128xf32>
    %c0_6 = arith.constant 0 : index
    %c0_7 = arith.constant 0 : index
    %c0_8 = arith.constant 0 : index
    %21 = vector.load %arg11[%c0_6, %c0_7, %c0_8] : memref<1x3x128xf32, #tpu.memory_space<vmem>>, vector<1x1x128xf32>
    %22 = vector.shape_cast %21 : vector<1x1x128xf32> to vector<1x128xf32>
    %23 = vector.shape_cast %20 : vector<1x128xf32> to vector<1x1x128xf32>
    tpu.vector_store %arg11[%c0_6, %c0_7, %c0_8], %23 {strides = array<i32>} : memref<1x3x128xf32, #tpu.memory_space<vmem>>, vector<1x1x128xf32>,
    %24 = vector.extract_strided_slice %4 {offsets = [0, 0], sizes = [1, 128], strides = [1, 1]} : vector<8x128xf32> to vector<1x128xf32>
    %25 = vector.extract_strided_slice %6 {offsets = [0, 1], sizes = [1, 1], strides = [1, 1]} : vector<3x3xf32> to vector<1x1xf32>
    %26 = vector.broadcast %25 : vector<1x1xf32> to vector<1x128xf32>
    %27 = arith.mulf %24, %26 : vector<1x128xf32>
    %28 = vector.extract_strided_slice %4 {offsets = [1, 0], sizes = [1, 128], strides = [1, 1]} : vector<8x128xf32> to vector<1x128xf32>
    %29 = vector.extract_strided_slice %6 {offsets = [1, 1], sizes = [1, 1], strides = [1, 1]} : vector<3x3xf32> to vector<1x1xf32>
    %30 = vector.broadcast %29 : vector<1x1xf32> to vector<1x128xf32>
    %31 = arith.mulf %28, %30 : vector<1x128xf32>
    %32 = arith.addf %27, %31 : vector<1x128xf32>
    %33 = vector.extract_strided_slice %4 {offsets = [2, 0], sizes = [1, 128], strides = [1, 1]} : vector<8x128xf32> to vector<1x128xf32>
    %34 = vector.extract_strided_slice %6 {offsets = [2, 1], sizes = [1, 1], strides = [1, 1]} : vector<3x3xf32> to vector<1x1xf32>
    %35 = vector.broadcast %34 : vector<1x1xf32> to vector<1x128xf32>
    %36 = arith.mulf %33, %35 : vector<1x128xf32>
    %37 = arith.addf %32, %36 : vector<1x128xf32>
    %c0_9 = arith.constant 0 : index
    %c1 = arith.constant 1 : index
    %c0_10 = arith.constant 0 : index
    %38 = vector.load %arg11[%c0_9, %c1, %c0_10] : memref<1x3x128xf32, #tpu.memory_space<vmem>>, vector<1x1x128xf32>
    %39 = vector.shape_cast %38 : vector<1x1x128xf32> to vector<1x128xf32>
    %40 = vector.shape_cast %37 : vector<1x128xf32> to vector<1x1x128xf32>
    tpu.vector_store %arg11[%c0_9, %c1, %c0_10], %40 {strides = array<i32>} : memref<1x3x128xf32, #tpu.memory_space<vmem>>, vector<1x1x128xf32>,
    %41 = vector.extract_strided_slice %4 {offsets = [0, 0], sizes = [1, 128], strides = [1, 1]} : vector<8x128xf32> to vector<1x128xf32>
    %42 = vector.extract_strided_slice %6 {offsets = [0, 2], sizes = [1, 1], strides = [1, 1]} : vector<3x3xf32> to vector<1x1xf32>
    %43 = vector.broadcast %42 : vector<1x1xf32> to vector<1x128xf32>
    %44 = arith.mulf %41, %43 : vector<1x128xf32>
    %45 = vector.extract_strided_slice %4 {offsets = [1, 0], sizes = [1, 128], strides = [1, 1]} : vector<8x128xf32> to vector<1x128xf32>
    %46 = vector.extract_strided_slice %6 {offsets = [1, 2], sizes = [1, 1], strides = [1, 1]} : vector<3x3xf32> to vector<1x1xf32>
    %47 = vector.broadcast %46 : vector<1x1xf32> to vector<1x128xf32>
    %48 = arith.mulf %45, %47 : vector<1x128xf32>
    %49 = arith.addf %44, %48 : vector<1x128xf32>
    %50 = vector.extract_strided_slice %4 {offsets = [2, 0], sizes = [1, 128], strides = [1, 1]} : vector<8x128xf32> to vector<1x128xf32>
    %51 = vector.extract_strided_slice %6 {offsets = [2, 2], sizes = [1, 1], strides = [1, 1]} : vector<3x3xf32> to vector<1x1xf32>
    %52 = vector.broadcast %51 : vector<1x1xf32> to vector<1x128xf32>
    %53 = arith.mulf %50, %52 : vector<1x128xf32>
    %54 = arith.addf %49, %53 : vector<1x128xf32>
    %c0_11 = arith.constant 0 : index
    %c2 = arith.constant 2 : index
    %c0_12 = arith.constant 0 : index
    %55 = vector.load %arg11[%c0_11, %c2, %c0_12] : memref<1x3x128xf32, #tpu.memory_space<vmem>>, vector<1x1x128xf32>
    %56 = vector.shape_cast %55 : vector<1x1x128xf32> to vector<1x128xf32>
    %57 = vector.shape_cast %54 : vector<1x128xf32> to vector<1x1x128xf32>
    tpu.vector_store %arg11[%c0_11, %c2, %c0_12], %57 {strides = array<i32>} : memref<1x3x128xf32, #tpu.memory_space<vmem>>, vector<1x1x128xf32>,
    %58 = tpu.transpose %4, [1, 0] : vector<8x128xf32> -> vector<128x8xf32>
    %c0_13 = arith.constant 0 : index
    %c0_14 = arith.constant 0 : index
    %c0_15 = arith.constant 0 : index
    %59 = vector.load %arg4[%c0_13, %c0_14, %c0_15] : memref<1x8x64xbf16, #tpu.memory_space<vmem>>, vector<1x8x64xbf16>
    %60 = vector.shape_cast %59 : vector<1x8x64xbf16> to vector<8x64xbf16>
    %c0_16 = arith.constant 0 : index
    %c0_17 = arith.constant 0 : index
    %61 = vector.load %arg5[%c0_16, %c0_17] : memref<1x64xf32, #tpu.memory_space<vmem>>, vector<1x64xf32>
    %62 = arith.truncf %58 : vector<128x8xf32> to vector<128x8xbf16>
    %cst = arith.constant dense<0.000000e+00> : vector<128x64xf32>
    %63 = tpu.matmul %62, %60, %cst {dimension_numbers = #tpu.dot_dimension_numbers<[1], [0], [0], [1], [0, 0, 1, 1], [], []>} : vector<128x8xbf16>, vector<8x64xbf16>, vector<128x64xf32> -> vector<128x64xf32>
    %64 = vector.broadcast %61 : vector<1x64xf32> to vector<128x64xf32>
    %65 = arith.addf %63, %64 : vector<128x64xf32>
    %cst_18 = arith.constant 0.000000e+00 : f32
    %66 = vector.broadcast %cst_18 : f32 to vector<128x64xf32>
    %67 = arith.maximumf %65, %66 : vector<128x64xf32>
    %c0_19 = arith.constant 0 : index
    %c0_20 = arith.constant 0 : index
    %68 = vector.load %arg6[%c0_19, %c0_20] : memref<64x128xbf16, #tpu.memory_space<vmem>>, vector<64x128xbf16>
    %c0_21 = arith.constant 0 : index
    %c0_22 = arith.constant 0 : index
    %69 = vector.load %arg7[%c0_21, %c0_22] : memref<1x128xf32, #tpu.memory_space<vmem>>, vector<1x128xf32>
    %c0_23 = arith.constant 0 : index
    %c0_24 = arith.constant 0 : index
    %70 = vector.load %arg8[%c0_23, %c0_24] : memref<128x1024xbf16, #tpu.memory_space<vmem>>, vector<128x1024xbf16>
    %c0_25 = arith.constant 0 : index
    %c0_26 = arith.constant 0 : index
    %71 = vector.load %arg9[%c0_25, %c0_26] : memref<1x1024xf32, #tpu.memory_space<vmem>>, vector<1x1024xf32>
    %72 = arith.truncf %67 : vector<128x64xf32> to vector<128x64xbf16>
    %cst_27 = arith.constant dense<0.000000e+00> : vector<128x128xf32>
    %73 = tpu.matmul %72, %68, %cst_27 {dimension_numbers = #tpu.dot_dimension_numbers<[1], [0], [0], [1], [0, 0, 1, 1], [], []>} : vector<128x64xbf16>, vector<64x128xbf16>, vector<128x128xf32> -> vector<128x128xf32>
    %74 = vector.broadcast %69 : vector<1x128xf32> to vector<128x128xf32>
    %75 = arith.addf %73, %74 : vector<128x128xf32>
    %cst_28 = arith.constant 0.000000e+00 : f32
    %76 = vector.broadcast %cst_28 : f32 to vector<128x128xf32>
    %77 = arith.maximumf %75, %76 : vector<128x128xf32>
    %78 = arith.truncf %77 : vector<128x128xf32> to vector<128x128xbf16>
    %cst_29 = arith.constant dense<0.000000e+00> : vector<128x1024xf32>
    %79 = tpu.matmul %78, %70, %cst_29 {dimension_numbers = #tpu.dot_dimension_numbers<[1], [0], [0], [1], [0, 0, 1, 1], [], []>} : vector<128x128xbf16>, vector<128x1024xbf16>, vector<128x1024xf32> -> vector<128x1024xf32>
    %80 = vector.broadcast %71 : vector<1x1024xf32> to vector<128x1024xf32>
    %81 = arith.addf %79, %80 : vector<128x1024xf32>
    %82 = tpu.iota {dimensions = array<i32: 0>} : vector<128x1xi32>
    %c128_i32 = arith.constant 128 : i32
    %83 = arith.muli %arg1, %c128_i32 : i32
    %84 = vector.broadcast %83 : i32 to vector<128x1xi32>
    %85 = arith.addi %82, %84 : vector<128x1xi32>
    %c500_i32 = arith.constant 500 : i32
    %86 = vector.broadcast %c500_i32 : i32 to vector<128x1xi32>
    %87 = arith.cmpi slt, %85, %86 : vector<128x1xi32>
    %cst_30 = arith.constant 0xFF800000 : f32
    %88 = vector.shape_cast %87 : vector<128x1xi1> to vector<128x1xi1>
    %89 = vector.broadcast %88 : vector<128x1xi1> to vector<128x1024xi1>
    %90 = vector.broadcast %cst_30 : f32 to vector<128x1024xf32>
    %91 = arith.select %89, %81, %90 : vector<128x1024xi1>, vector<128x1024xf32>
    %92 = vector.shape_cast %91 : vector<128x1024xf32> to vector<16x8x1024xf32>
    %cst_31 = arith.constant dense<0xFF800000> : vector<8x1024xf32>
    %93 = vector.multi_reduction <maximumf>, %92, %cst_31 [0] : vector<16x8x1024xf32> to vector<8x1024xf32>
    %c0_32 = arith.constant 0 : index
    %c0_33 = arith.constant 0 : index
    %94 = vector.load %arg12[%c0_32, %c0_33] : memref<8x1024xf32, #tpu.memory_space<vmem>>, vector<8x1024xf32>
    %95 = arith.maximumf %94, %93 : vector<8x1024xf32>
    %c0_34 = arith.constant 0 : index
    %c0_35 = arith.constant 0 : index
    %96 = vector.load %arg12[%c0_34, %c0_35] : memref<8x1024xf32, #tpu.memory_space<vmem>>, vector<8x1024xf32>
    tpu.vector_store %arg12[%c0_34, %c0_35], %95 {strides = array<i32>} : memref<8x1024xf32, #tpu.memory_space<vmem>>, vector<8x1024xf32>,
    %c3_i32 = arith.constant 3 : i32
    %97 = arith.cmpi eq, %arg1, %c3_i32 : i32
    %98 = arith.extui %97 : i1 to i32
    %c0_i32_36 = arith.constant 0 : i32
    %99 = arith.cmpi ne, %98, %c0_i32_36 : i32
    scf.if %99 {
      %c0_37 = arith.constant 0 : index
      %c0_38 = arith.constant 0 : index
      %100 = vector.load %arg12[%c0_37, %c0_38] : memref<8x1024xf32, #tpu.memory_space<vmem>>, vector<8x1024xf32>
      %cst_39 = arith.constant dense<0xFF800000> : vector<1024xf32>
      %101 = vector.multi_reduction <maximumf>, %100, %cst_39 [0] : vector<8x1024xf32> to vector<1024xf32>
      %102 = vector.shape_cast %101 : vector<1024xf32> to vector<1x1024xf32>
      %c0_40 = arith.constant 0 : index
      %c0_41 = arith.constant 0 : index
      %c0_42 = arith.constant 0 : index
      %103 = vector.load %arg10[%c0_40, %c0_41, %c0_42] : memref<1x1x1024xf32, #tpu.memory_space<vmem>>, vector<1x1x1024xf32>
      %104 = vector.shape_cast %103 : vector<1x1x1024xf32> to vector<1x1024xf32>
      %105 = vector.shape_cast %102 : vector<1x1024xf32> to vector<1x1x1024xf32>
      tpu.vector_store %arg10[%c0_40, %c0_41, %c0_42], %105 {strides = array<i32>} : memref<1x1x1024xf32, #tpu.memory_space<vmem>>, vector<1x1x1024xf32>,
    } else {
    }
    return
  }
  func.func @transform_0(%arg0: i32, %arg1: i32) -> (i32, i32, i32) {
    %c0_i32 = arith.constant 0 : i32
    %c0_i32_0 = arith.constant 0 : i32
    return %arg0, %c0_i32, %arg1 : i32, i32, i32
  }
  func.func @transform_1(%arg0: i32, %arg1: i32) -> (i32, i32, i32) {
    %c0_i32 = arith.constant 0 : i32
    %c0_i32_0 = arith.constant 0 : i32
    %c0_i32_1 = arith.constant 0 : i32
    return %arg0, %c0_i32, %c0_i32_0 : i32, i32, i32
  }
  func.func @transform_2(%arg0: i32, %arg1: i32) -> (i32, i32, i32) {
    %c0_i32 = arith.constant 0 : i32
    %c0_i32_0 = arith.constant 0 : i32
    %c0_i32_1 = arith.constant 0 : i32
    return %arg0, %c0_i32, %c0_i32_0 : i32, i32, i32
  }
  func.func @transform_3(%arg0: i32, %arg1: i32) -> (i32, i32) {
    %c0_i32 = arith.constant 0 : i32
    %c0_i32_0 = arith.constant 0 : i32
    %c0_i32_1 = arith.constant 0 : i32
    return %c0_i32, %c0_i32_0 : i32, i32
  }
  func.func @transform_4(%arg0: i32, %arg1: i32) -> (i32, i32) {
    %c0_i32 = arith.constant 0 : i32
    %c0_i32_0 = arith.constant 0 : i32
    %c0_i32_1 = arith.constant 0 : i32
    return %c0_i32, %c0_i32_0 : i32, i32
  }
  func.func @transform_5(%arg0: i32, %arg1: i32) -> (i32, i32) {
    %c0_i32 = arith.constant 0 : i32
    %c0_i32_0 = arith.constant 0 : i32
    %c0_i32_1 = arith.constant 0 : i32
    return %c0_i32, %c0_i32_0 : i32, i32
  }
  func.func @transform_6(%arg0: i32, %arg1: i32) -> (i32, i32) {
    %c0_i32 = arith.constant 0 : i32
    %c0_i32_0 = arith.constant 0 : i32
    %c0_i32_1 = arith.constant 0 : i32
    return %c0_i32, %c0_i32_0 : i32, i32
  }
  func.func @transform_7(%arg0: i32, %arg1: i32) -> (i32, i32) {
    %c0_i32 = arith.constant 0 : i32
    %c0_i32_0 = arith.constant 0 : i32
    %c0_i32_1 = arith.constant 0 : i32
    return %c0_i32, %c0_i32_0 : i32, i32
  }
  func.func @transform_8(%arg0: i32, %arg1: i32) -> (i32, i32, i32) {
    %c0_i32 = arith.constant 0 : i32
    %c0_i32_0 = arith.constant 0 : i32
    %c0_i32_1 = arith.constant 0 : i32
    return %arg0, %c0_i32, %c0_i32_0 : i32, i32, i32
  }
  func.func @transform_9(%arg0: i32, %arg1: i32) -> (i32, i32, i32) {
    %c0_i32 = arith.constant 0 : i32
    %c0_i32_0 = arith.constant 0 : i32
    return %arg0, %c0_i32, %arg1 : i32, i32, i32
  }
}

</mosaic_0001>

<bundles_post_ra>
// kernel: pointnet_cls_forward.3
= control target key start
LH: loop header
LB: loop body
LE: loop exit
PB: predicated region body
PF: predicated region fallthrough
CT: control target
= control target key end

     0   :  { %s3664_s0 = inlined_call_operand.vmem [shape: f32[2,8,512], index: 0, kind: input, shape index: {}]   ;;  %s3665_s1 = inlined_call_operand.vmem [shape: f32[2,3,3], index: 1, kind: input, shape index: {}]   ;;  %s3666_s2 = inlined_call_operand.vmem [shape: bf16[2,8,64], index: 2, kind: input, shape index: {}]   ;;  %s3667_s3 = inlined_call_operand.vmem [shape: f32[1,64], index: 3, kind: input, shape index: {}]   ;;  %s3668_s4 = inlined_call_operand.vmem [shape: bf16[64,128], index: 4, kind: input, shape index: {}]   ;;  %s3669_s5 = inlined_call_operand.vmem [shape: f32[1,128], index: 5, kind: input, shape index: {}]   ;;  %s3670_s6 = inlined_call_operand.hbm [shape: bf16[128,1024], index: 6, kind: input, shape index: {}]   ;;  %s3671_s7 = inlined_call_operand.vmem [shape: f32[1,1024], index: 7, kind: input, shape index: {}]   ;;  %s3672_s8 = inlined_call_operand.vmem [shape: f32[2,1,1024], index: 8, kind: output, shape index: {0}]   ;;  %s3673_s9 = inlined_call_operand.vmem [shape: f32[2,3,512], index: 9, kind: output, shape index: {1}]  }
   0x1   :  { %3676 = sst [smem:[#allocation9_spill]] %s3670_s6 }
   0x2   :  { %15 = vsyncpa [#allocation4], 0  ;;  %s2739_s30 = smov 0   ;;  %s2741_s10 = smov 0  }
   0x3   :  { %s2743_s11 = smov 0   ;;  %s2745_s12 = smov 0  }
   0x4   :  { %s2747_s13 = smov 0  }
   0x5 LB: > { %3677 = sst [smem:[#allocation6_spill]] %s2676_s12  ;;  %s2155_s14 = sadd.s32 4294967295, %s2680_s13   ;;  %s2680_s13 = sphi %s2747_s13, %s21_s13   ;;  %s2676_s12 = sphi %s2745_s12, %s3686_s12   ;;  %s2672_s11 = sphi %s2743_s11, %s3688_s11   ;;  %s2668_s10 = sphi %s2741_s10, %s3684_s10   ;;  %s2664_s30 = sphi %s2739_s30, %s3687_s30  }
   0x6   : > { %s30_s15 = sadd.s32 1, %s2672_s11  ;;  %s33_s16 = sadd.s32 1, %s2676_s12 }
   0x7   : > { %p31_p0 = scmp.ge.s32.totalorder %s30_s15, 4  ;;  %p2157_p1 = scmp.ge.s32.totalorder %s2680_s13, 1 }
   0x8   : > { %p277_p2 = scmp.lt.s32.totalorder %s2680_s13, 9  ;;  %p2776_p5 = scmp.eq.s32.totalorder %s2155_s14, 0 }
   0x9   : > { %s3690_s15 = smov (%p31_p0, %s30_s15), 0  ;;  %s3692_s16 = smov (!%p31_p0, %s33_s16), %s2676_s12 }
   0xa   : > { %3678 = sst [smem:[#allocation7_spill]] %s3690_s15  ;;  %p2772_p3 = pnand %p2157_p1, %p277_p2 }
   0xb   : > { %p35_p4 = scmp.ge.s32.totalorder %s3692_s16, 2  ;;  %s3681_s6 = sld [smem:[#allocation9_spill]] }
   0xc   : > { %p2547_p6 = pneg %p2772_p3  ;;  %s2682_s22 = smov [#allocation3]  }
   0xd   : > { %s3694_s16 = smov (%p35_p4, %s3692_s16), 0  ;;  %s299_s23 = sshll.u32 %s2682_s22, 4  ;;  %s300_s23 = int_to_ptr.vmem [resolvable:$true] %s299_s23 }
   0xe   : > { %3682 = sst [smem:[#allocation8_spill]] %s3694_s16  ;;  %p2548_p7 = pnand %p2776_p5, %p2547_p6 }
   0xf   : > { %s2683_s24 = smov 512   ;;  %s2684_s25 = smov 32  }
  0x10   : > { %343 = sbr.rel (%p2772_p3) target bundleno = 941 (0x3ad), region = 52 }
  0x11   : > { %s297_s21 = sshll.u32 %s3681_s6, 4  ;;  %s298_s21 = int_to_ptr.hbm [resolvable:$true] %s297_s21 }
  0x12   : > { %2550 = dma.hbm_to_vmem [thread:$0]  (!%p2548_p7), %s298_s21, 8192, %s300_s23, [#allocation4], %s2683_s24, %s2683_s24, %s2684_s25  }
  0x15   : > { %2659 = dma.done.wait (%p2776_p5), [#allocation4], 8192  }
  0x16   : > { %2661 = vsyncadd (%p2776_p5), [#allocation4], 4294959104  ;;  %p398_p8 = scmp.lt.s32.totalorder %s2668_s10, 1  ;;  %p400_p9 = scmp.lt.s32.totalorder %s2664_s30, 3 }
  0x17   : > { %p2169_p10 = scmp.ne.s32.totalorder %s2664_s30, 0 }
  0x18   : > { %s3696_s10 = smov (!%p398_p8, %s2668_s10), 1 }
  0x19   : > { %s401_s26 = scalar_select %p400_p9, %s2664_s30, 3 }
  0x1a   : > { %s2799_s27 = sshll.u32 %s3696_s10, 2  ;;  %s2166_s28 = sshll.u32 %s3696_s10, 3 }
  0x1b   : > { %s403_s29 = sadd.s32 %s2799_s27, %s401_s26  ;;  %s409_s18 = scalar_lea.vmem %s3665_s1, %s2799_s27 }
  0x1c   : > { %s2163_s19 = sshll.u32 %s403_s29, 3  ;;  %s413_s22 = scalar_lea.vmem %s3666_s2, %s2799_s27 }
  0x1d   : > { %s2813_s25 = scalar_lea.vmem %s3664_s0, %s2163_s19  ;;  %s2818_s15 = scalar_lea.vmem %s3672_s8, %s2166_s28 }
  0x1e   : > { %s2168_s10 = sshll.u32 %s403_s29, 2  ;;  %430 = sbr.rel (%p2169_p10) target bundleno = 44 (0x2c), region = 60 }
  0x1f   : > { %s2823_s14 = scalar_lea.vmem %s3673_s9, %s2168_s10 }
  0x23   : > { %v2685_v0 = vmov -inf  }
  0x24   : > { %431 = vst [vmem:[#allocation2 + $0x30] sm:$0xff] %v2685_v0 }
  0x25   : > { %432 = vst [vmem:[#allocation2] sm:$0xff] %v2685_v0 }
  0x26   : > { %433 = vst [vmem:[#allocation2 + $0x18] sm:$0xff] %v2685_v0 }
  0x27   : > { %434 = vst [vmem:[#allocation2 + $0x10] sm:$0xff] %v2685_v0 }
  0x28   : > { %435 = vst [vmem:[#allocation2 + $0x8] sm:$0xff] %v2685_v0 }
  0x29   : > { %436 = vst [vmem:[#allocation2 + $0x20] sm:$0xff] %v2685_v0 }
  0x2a   : > { %437 = vst [vmem:[#allocation2 + $0x28] sm:$0xff] %v2685_v0 }
  0x2b   : > { %438 = vst [vmem:[#allocation2 + $0x38] sm:$0xff] %v2685_v0 }
  0x2c PF: > { %v439_v1 = vld [vmem:[%s2813_s25] sm:$0xff]  ;;  %vm3675_vm0 = vcmask 1043456   ;;  %vm526_vm1 = vcmask 64512   ;;  %v2465_v23 = vld [vmem:[%s3668_s4 + $0x18] sm:$0xff]  ;;  %v2464_v26 = vld [vmem:[%s3668_s4 + $0x10] sm:$0xff]  ;;  %vm729_vm2 = vcmask 523264  }
  0x2d   : > { %481 = vxpose.xlu0.b32.start.end [1/1] (short) %v439_v1, 128  ;;  %v513_v2 = vld [vmem:[%s413_s22] sm:$0xf]  ;;  %758 = vmatpush.bf16.msra.mxu1 %v2465_v23  ;;  %v2463_v27 = vld [vmem:[%s3668_s4 + $0x8] sm:$0xff]  ;;  %s2458_s10 = sshll.u32 %s2664_s30, 7  ;;  %p2459_p11 = scmp.ne.s32.totalorder %s2664_s30, 3 }
  0x2e   : > { %v553_v3 = vsel %vm3675_vm0, %v513_v2, 0  ;;  %2531 = vmatpush.bf16.msra.mxu2 %v2465_v23  ;;  %v2462_v29 = vld [vmem:[%s3668_s4] sm:$0xff]  ;;  %v2436_v1 = vld [vmem:[#allocation3 + $0x1c8] sm:$0xf] }
  0x2f   : > { %562 = vmatpush.bf16.msra.mxu0 %v553_v3  ;;  %2530 = vmatpush.bf16.msra.mxu3 %v553_v3  ;;  %v2851_v33 = vld [vmem:[%s3667_s3] ss:$0 sm:$0xff]  ;;  %v2527_v2 = vld [vmem:[#allocation3 + $0x1e4] sm:$0xf0] }
  0x30   : > { %v2437_v3 = vor.u32 %v2527_v2, %v2436_v1  ;;  %v2302_v1 = vld [vmem:[#allocation3 + $0xe0] sm:$0xf0]  ;;  %v2308_v2 = vld [vmem:[#allocation3 + $0xc8] sm:$0xf] }
  0x31   : > { %759 = vmatpush.bf16.msra.mxu1 %v2464_v26 }
  0x32   : > { %2532 = vmatpush.bf16.msra.mxu2 %v2464_v26  ;;  %v2515_v26 = vld [vmem:[#allocation3 + $0x18c] sm:$0xf] }
  0x33   : > { %1262 = vmatpush.bf16.msrb.mxu0 %v2437_v3 }
  0x35   : > { %760 = vmatpush.bf16.msra.mxu1 %v2463_v27 }
  0x36   : > { %2533 = vmatpush.bf16.msra.mxu2 %v2463_v27 }
  0x39   : > { %761 = vmatpush.bf16.msra.mxu1 %v2462_v29 }
  0x3a   : > { %2534 = vmatpush.bf16.msra.mxu2 %v2462_v29  ;;  %v2406_v29 = vld [vmem:[#allocation3 + $0x1a8] sm:$0xf0] }
  0xd1   : > { %v497_v4 = vpop.trf.xlu0 }
  0xd9   : > { %v498_v5 = vpop.trf.xlu0 }
  0xda   : > { %v515_v6 = vpack.c.bf16 %v498_v5, %v497_v4 }
  0xdc   : > { %2170 = vmatmul.msk.bf16.vlgmr.msra.gmra.mxu0 %vm526_vm1, %v515_v6 }
  0xe1   : > { %v499_v7 = vpop.trf.xlu0 }
  0xe9   : > { %v500_v8 = vpop.trf.xlu0 }
  0xea   : > { %v516_v9 = vpack.c.bf16 %v500_v8, %v499_v7  ;;  %v2522_v8 = vld [vmem:[#allocation3 + $0x1c4] sm:$0xf] }
  0xec   : > { %2171 = vmatmul.msk.bf16.gmra.mxu0 %vm526_vm1, %v516_v9  ;;  %v2430_v9 = vld [vmem:[#allocation3 + $0x1e0] sm:$0xf0] }
  0xf1   : > { %v501_v10 = vpop.trf.xlu0 }
  0xf9   : > { %v502_v11 = vpop.trf.xlu0 }
  0xfa   : > { %v517_v12 = vpack.c.bf16 %v502_v11, %v501_v10  ;;  %v2433_v10 = vor.u32 %v2522_v8, %v2430_v9  ;;  %v2404_v11 = vld [vmem:[#allocation3 + $0x188] sm:$0xf] }
  0xfc   : > { %2172 = vmatmul.msk.bf16.gmra.mxu0 %vm526_vm1, %v517_v12  ;;  %v2519_v12 = vld [vmem:[#allocation3 + $0x1a4] sm:$0xf0]  ;;  %1213 = vmatpush.bf16.msrb.mxu3 %v2433_v10  ;;  %v2268_v10 = vld [vmem:[#allocation3 + $0x80] sm:$0xf] }
 0x101   : > { %v503_v13 = vpop.trf.xlu0 }
 0x109   : > { %v504_v14 = vpop.trf.xlu0 }
 0x10a   : > { %v518_v15 = vpack.c.bf16 %v504_v14, %v503_v13  ;;  %v2523_v13 = vld [vmem:[#allocation3 + $0x1cc] sm:$0xf]  ;;  %v2405_v14 = vor.u32 %v2519_v12, %v2404_v11  ;;  %v2486_v11 = vld [vmem:[#allocation3 + $0x9c] sm:$0xf0]  ;;  %v2482_v12 = vld [vmem:[#allocation3 + $0x84] sm:$0xf] }
 0x10c   : > { %2173 = vmatmul.msk.bf16.gmra.mxu0 %vm526_vm1, %v518_v15  ;;  %v2438_v15 = vld [vmem:[#allocation3 + $0x1e8] sm:$0xf0] }
 0x10d   : > { %1263 = vmatpush.bf16.msrb.mxu0 %v2405_v14  ;;  %v2269_v14 = vor.u32 %v2486_v11, %v2268_v10 }
 0x111   : > { %v505_v16 = vpop.trf.xlu0 }
 0x119   : > { %v506_v17 = vpop.trf.xlu0 }
 0x11a   : > { %v519_v18 = vpack.c.bf16 %v506_v17, %v505_v16  ;;  %v2428_v16 = vld [vmem:[#allocation3 + $0x1c0] sm:$0xf] }
 0x11b   : > { %v2526_v17 = vld [vmem:[#allocation3 + $0x1dc] sm:$0xf0] }
 0x11c   : > { %2174 = vmatmul.msk.bf16.gmra.mxu0 %vm526_vm1, %v519_v18  ;;  %v2441_v18 = vor.u32 %v2523_v13, %v2438_v15  ;;  %v2270_v15 = vld [vmem:[#allocation3 + $0xa0] sm:$0xf0] }
 0x11e   : > { %1311 = vmatpush.bf16.msrb.mxu1 %v2441_v18 }
 0x121   : > { %v507_v19 = vpop.trf.xlu0 }
 0x129   : > { %v508_v20 = vpop.trf.xlu0 }
 0x12a   : > { %v520_v21 = vpack.c.bf16 %v508_v20, %v507_v19  ;;  %v2429_v19 = vor.u32 %v2526_v17, %v2428_v16  ;;  %v2514_v20 = vld [vmem:[#allocation3 + $0x184] sm:$0xf]  ;;  %v2276_v16 = vld [vmem:[#allocation3 + $0x88] sm:$0xf] }
 0x12b   : > { %v2487_v17 = vld [vmem:[#allocation3 + $0xa4] sm:$0xf0] }
 0x12c   : > { %2175 = vmatmul.msk.bf16.vlgmr.msra.gmra.mxu3 %vm526_vm1, %v520_v21  ;;  %v2398_v21 = vld [vmem:[#allocation3 + $0x1a0] sm:$0xf0]  ;;  %1164 = vmatpush.bf16.msrb.mxu2 %v2429_v19  ;;  %v2273_v19 = vor.u32 %v2482_v12, %v2270_v15  ;;  %v2452_v12 = vld [vmem:[#allocation3 + $0x1d8] sm:$0xf] }
 0x12d   : > { %v2401_v23 = vor.u32 %v2514_v20, %v2398_v21  ;;  %v2277_v20 = vor.u32 %v2487_v17, %v2276_v16  ;;  %v2483_v21 = vld [vmem:[#allocation3 + $0x8c] sm:$0xf] }
 0x12f   : > { %1214 = vmatpush.bf16.msrb.mxu3 %v2401_v23 }
 0x131   : > { %v509_v22 = vpop.trf.xlu0 }
 0x139   : > { %v510_v24 = vpop.trf.xlu0 }
 0x13a   : > { %v521_v25 = vpack.c.bf16 %v510_v24, %v509_v22  ;;  %v2396_v24 = vld [vmem:[#allocation3 + $0x180] sm:$0xf] }
 0x13c   : > { %2176 = vmatmul.msk.bf16.gmra.mxu3 %vm526_vm1, %v521_v25  ;;  %v2518_v25 = vld [vmem:[#allocation3 + $0x19c] sm:$0xf0] }
 0x141   : > { %v511_v28 = vpop.trf.xlu0 }
 0x149   : > { %v512_v30 = vpop.trf.xlu0 }
 0x14a   : > { %v522_v31 = vpack.c.bf16 %v512_v30, %v511_v28  ;;  %v2397_v28 = vor.u32 %v2518_v25, %v2396_v24 }
 0x14c   : > { %2177 = vmatmul.msk.bf16.gmra.mxu3 %vm526_vm1, %v522_v31  ;;  %v2409_v31 = vor.u32 %v2515_v26, %v2406_v29  ;;  %1165 = vmatpush.bf16.msrb.mxu2 %v2397_v28  ;;  %v2236_v26 = vld [vmem:[#allocation3 + $0x40] sm:$0xf]  ;;  %v2474_v29 = vld [vmem:[#allocation3 + $0x44] sm:$0xf] }
 0x14e   : > { %1312 = vmatpush.bf16.msrb.mxu1 %v2409_v31  ;;  %v2244_v31 = vld [vmem:[#allocation3 + $0x48] sm:$0xf] }
 0x159   : > { %v564_v32 = vpop.f32.mrf.mxu0 }
 0x15a   : > { %v565_v34 = vadd.f32 %v2851_v33, %v564_v32 }
 0x15c   : > { %v604_v37 = vmax.f32 %v565_v34, 0.0 }
 0x161   : > { %v566_v35 = vpop.f32.mrf.mxu0 }
 0x162   : > { %v567_v36 = vadd.f32 %v2851_v33, %v566_v35  ;;  %v2372_v35 = vld [vmem:[#allocation3 + $0x148] sm:$0xf] }
 0x164   : > { %v605_v38 = vmax.f32 %v567_v36, 0.0  ;;  %v2511_v36 = vld [vmem:[#allocation3 + $0x164] sm:$0xf0] }
 0x166   : > { %v694_v39 = vpack.c.bf16 %v605_v38, %v604_v37  ;;  %v2373_v37 = vor.u32 %v2511_v36, %v2372_v35  ;;  %v2506_v38 = vld [vmem:[#allocation3 + $0x144] sm:$0xf]  ;;  %v2479_v35 = vld [vmem:[#allocation3 + $0x64] sm:$0xf0]  ;;  %v2475_v36 = vld [vmem:[#allocation3 + $0x4c] sm:$0xf] }
 0x168   : > { %2194 = vmatmul.msk.bf16.vlgmr.msra.gmra.mxu1 %vm729_vm2, %v694_v39  ;;  %v2366_v39 = vld [vmem:[#allocation3 + $0x160] sm:$0xf0]  ;;  %1264 = vmatpush.bf16.msrb.mxu0 %v2373_v37  ;;  %v2246_v37 = vld [vmem:[#allocation3 + $0x68] sm:$0xf0] }
 0x169   : > { %v569_v40 = vpop.f32.mrf.mxu0 }
 0x16a   : > { %v570_v41 = vadd.f32 %v2851_v33, %v569_v40  ;;  %v2364_v40 = vld [vmem:[#allocation3 + $0x140] sm:$0xf] }
 0x16c   : > { %v606_v44 = vmax.f32 %v570_v41, 0.0 }
 0x171   : > { %v571_v42 = vpop.f32.mrf.mxu0 }
 0x172   : > { %v572_v43 = vadd.f32 %v2851_v33, %v571_v42  ;;  %v2369_v42 = vor.u32 %v2506_v38, %v2366_v39  ;;  %v2245_v38 = vor.u32 %v2479_v35, %v2244_v31  ;;  %v2249_v39 = vor.u32 %v2475_v36, %v2246_v37  ;;  %v2420_v31 = vld [vmem:[#allocation3 + $0x198] sm:$0xf] }
 0x174   : > { %v607_v45 = vmax.f32 %v572_v43, 0.0  ;;  %v2510_v43 = vld [vmem:[#allocation3 + $0x15c] sm:$0xf0]  ;;  %1215 = vmatpush.bf16.msrb.mxu3 %v2369_v42  ;;  %v2466_v42 = vld [vmem:[#allocation3 + $0x4] sm:$0xf] }
 0x176   : > { %v695_v46 = vpack.c.bf16 %v607_v45, %v606_v44  ;;  %v2507_v44 = vld [vmem:[#allocation3 + $0x14c] sm:$0xf] }
 0x177   : > { %v2374_v45 = vld [vmem:[#allocation3 + $0x168] sm:$0xf0] }
 0x178   : > { %2195 = vmatmul.msk.bf16.gmra.mxu1 %vm729_vm2, %v695_v46  ;;  %v2365_v46 = vor.u32 %v2510_v43, %v2364_v40  ;;  %v2204_v40 = vld [vmem:[#allocation3] sm:$0xf] }
 0x179   : > { %v574_v47 = vpop.f32.mrf.mxu0 }
 0x17a   : > { %v575_v48 = vadd.f32 %v2851_v33, %v574_v47  ;;  %v2377_v47 = vor.u32 %v2507_v44, %v2374_v45  ;;  %1166 = vmatpush.bf16.msrb.mxu2 %v2365_v46  ;;  %v2206_v45 = vld [vmem:[#allocation3 + $0x20] sm:$0xf0]  ;;  %v2212_v46 = vld [vmem:[#allocation3 + $0x8] sm:$0xf] }
 0x17c   : > { %v608_v51 = vmax.f32 %v575_v48, 0.0  ;;  %v2332_v48 = vld [vmem:[#allocation3 + $0x100] sm:$0xf]  ;;  %1313 = vmatpush.bf16.msrb.mxu1 %v2377_v47  ;;  %v2471_v47 = vld [vmem:[#allocation3 + $0x24] sm:$0xf0] }
 0x181   : > { %v576_v49 = vpop.f32.mrf.mxu0 }
 0x182   : > { %v577_v50 = vadd.f32 %v2851_v33, %v576_v49  ;;  %v2502_v49 = vld [vmem:[#allocation3 + $0x11c] sm:$0xf0] }
 0x184   : > { %v609_v52 = vmax.f32 %v577_v50, 0.0  ;;  %v2498_v50 = vld [vmem:[#allocation3 + $0x104] sm:$0xf] }
 0x186   : > { %v696_v53 = vpack.c.bf16 %v609_v52, %v608_v51  ;;  %v2333_v52 = vor.u32 %v2502_v49, %v2332_v48  ;;  %v2209_v48 = vor.u32 %v2466_v42, %v2206_v45  ;;  %v2213_v49 = vor.u32 %v2471_v47, %v2212_v46  ;;  %v2512_v42 = vld [vmem:[#allocation3 + $0x16c] sm:$0xf0]  ;;  %v2350_v45 = vld [vmem:[#allocation3 + $0x130] sm:$0xf0]  ;;  %v2517_v46 = vld [vmem:[#allocation3 + $0x19c] sm:$0xf] }
 0x187   : > { %v2422_v47 = vld [vmem:[#allocation3 + $0x1b8] sm:$0xf0] }
 0x188   : > { %2196 = vmatmul.msk.bf16.gmra.mxu1 %vm729_vm2, %v696_v53  ;;  %v2334_v53 = vld [vmem:[#allocation3 + $0x120] sm:$0xf0]  ;;  %1167 = vmatpush.bf16.msrb.mxu2 %v2333_v52 }
 0x189   : > { %v579_v54 = vpop.f32.mrf.mxu0 }
 0x18a   : > { %v580_v55 = vadd.f32 %v2851_v33, %v579_v54  ;;  %v2340_v54 = vld [vmem:[#allocation3 + $0x108] sm:$0xf] }
 0x18c   : > { %v610_v58 = vmax.f32 %v580_v55, 0.0  ;;  %v2503_v55 = vld [vmem:[#allocation3 + $0x124] sm:$0xf0] }
 0x191   : > { %v581_v56 = vpop.f32.mrf.mxu0 }
 0x192   : > { %v582_v57 = vadd.f32 %v2851_v33, %v581_v56  ;;  %v2337_v56 = vor.u32 %v2498_v50, %v2334_v53  ;;  %v2467_v50 = vld [vmem:[#allocation3 + $0xc] sm:$0xf] }
 0x194   : > { %v611_v59 = vmax.f32 %v582_v57, 0.0  ;;  %v2341_v57 = vor.u32 %v2503_v55, %v2340_v54  ;;  %1216 = vmatpush.bf16.msrb.mxu3 %v2337_v56 }
 0x196   : > { %v697_v60 = vpack.c.bf16 %v611_v59, %v610_v58  ;;  %v2499_v58 = vld [vmem:[#allocation3 + $0x10c] sm:$0xf]  ;;  %1265 = vmatpush.bf16.msrb.mxu0 %v2341_v57 }
 0x197   : > { %v2342_v59 = vld [vmem:[#allocation3 + $0x128] sm:$0xf0] }
 0x198   : > { %2197 = vmatmul.msk.bf16.gmra.mxu1 %vm729_vm2, %v697_v60  ;;  %v2345_v60 = vor.u32 %v2499_v58, %v2342_v59  ;;  %v2524_v59 = vld [vmem:[#allocation3 + $0x1d4] sm:$0xf] }
 0x199   : > { %v584_v61 = vpop.f32.mrf.mxu0 }
 0x19a   : > { %v585_v62 = vadd.f32 %v2851_v33, %v584_v61  ;;  %v2300_v61 = vld [vmem:[#allocation3 + $0xc0] sm:$0xf]  ;;  %1314 = vmatpush.bf16.msrb.mxu1 %v2345_v60  ;;  %v2446_v60 = vld [vmem:[#allocation3 + $0x1f0] sm:$0xf0] }
 0x19c   : > { %v612_v4 = vmax.f32 %v585_v62, 0.0  ;;  %v2494_v62 = vld [vmem:[#allocation3 + $0xdc] sm:$0xf0] }
 0x1a1   : > { %v586_v63 = vpop.f32.mrf.mxu0 }
 0x1a2   : > { %v587_v0 = vadd.f32 %v2851_v33, %v586_v63  ;;  %v2301_v63 = vor.u32 %v2494_v62, %v2300_v61  ;;  %v2449_v61 = vor.u32 %v2524_v59, %v2446_v60 }
 0x1a4   : > { %v613_v5 = vmax.f32 %v587_v0, 0.0  ;;  %v2490_v0 = vld [vmem:[#allocation3 + $0xc4] sm:$0xf]  ;;  %1168 = vmatpush.bf16.msrb.mxu2 %v2301_v63  ;;  %v2880_v63 = vld [vmem:[%s3669_s5] ss:$0 sm:$0xff] }
 0x1a5   : > { %v2305_v3 = vor.u32 %v2490_v0, %v2302_v1 }
 0x1a6   : > { %v698_v6 = vpack.c.bf16 %v613_v5, %v612_v4  ;;  %v2495_v4 = vld [vmem:[#allocation3 + $0xe4] sm:$0xf0]  ;;  %v2491_v5 = vld [vmem:[#allocation3 + $0xcc] sm:$0xf] }
 0x1a7   : > { %1217 = vmatpush.bf16.msrb.mxu3 %v2305_v3 }
 0x1a8   : > { %2198 = vmatmul.msk.bf16.gmra.mxu1 %vm729_vm2, %v698_v6  ;;  %v2310_v6 = vld [vmem:[#allocation3 + $0xe8] sm:$0xf0]  ;;  %1169 = vmatpush.bf16.msrb.mxu2 %v2269_v14 }
 0x1a9   : > { %v2313_v8 = vor.u32 %v2491_v5, %v2310_v6  ;;  %v2444_v5 = vld [vmem:[#allocation3 + $0x1d0] sm:$0xf] }
 0x1aa   : > { %v2528_v6 = vld [vmem:[#allocation3 + $0x1ec] sm:$0xf0] }
 0x1ab   : > { %1315 = vmatpush.bf16.msrb.mxu1 %v2313_v8  ;;  %1218 = vmatpush.bf16.msrb.mxu3 %v2273_v19  ;;  %v2445_v8 = vor.u32 %v2528_v6, %v2444_v5  ;;  %v2356_v5 = vld [vmem:[#allocation3 + $0x118] sm:$0xf] }
 0x1af   : > { %v589_v7 = vpop.f32.mrf.mxu3 }
 0x1b0   : > { %v590_v22 = vadd.f32 %v2851_v33, %v589_v7  ;;  %v2309_v7 = vor.u32 %v2495_v4, %v2308_v2 }
 0x1b2   : > { %v614_v32 = vmax.f32 %v590_v22, 0.0  ;;  %1266 = vmatpush.bf16.msrb.mxu0 %v2309_v7  ;;  %v2278_v22 = vld [vmem:[#allocation3 + $0xa8] sm:$0xf0]  ;;  %v2516_v7 = vld [vmem:[#allocation3 + $0x194] sm:$0xf] }
 0x1b3   : > { %v2281_v23 = vor.u32 %v2483_v21, %v2278_v22  ;;  %v2412_v21 = vld [vmem:[#allocation3 + $0x190] sm:$0xf] }
 0x1b4   : > { %v2520_v22 = vld [vmem:[#allocation3 + $0x1ac] sm:$0xf0] }
 0x1b5   : > { %1316 = vmatpush.bf16.msrb.mxu1 %v2281_v23  ;;  %v2508_v23 = vld [vmem:[#allocation3 + $0x154] sm:$0xf] }
 0x1b6   : > { %1267 = vmatpush.bf16.msrb.mxu0 %v2277_v20 }
 0x1b7   : > { %v591_v27 = vpop.f32.mrf.mxu3 }
 0x1b8   : > { %v592_v30 = vadd.f32 %v2851_v33, %v591_v27  ;;  %v2478_v27 = vld [vmem:[#allocation3 + $0x5c] sm:$0xf0] }
 0x1b9   : > { %v2237_v28 = vor.u32 %v2478_v27, %v2236_v26  ;;  %1317 = vmatpush.bf16.msrb.mxu1 %v2249_v39  ;;  %v2525_v26 = vld [vmem:[#allocation3 + $0x1dc] sm:$0xf] }
 0x1ba   : > { %v615_v34 = vmax.f32 %v592_v30, 0.0  ;;  %v2238_v30 = vld [vmem:[#allocation3 + $0x60] sm:$0xf0]  ;;  %1268 = vmatpush.bf16.msrb.mxu0 %v2245_v38  ;;  %v2454_v27 = vld [vmem:[#allocation3 + $0x1f8] sm:$0xf0] }
 0x1bb   : > { %1170 = vmatpush.bf16.msrb.mxu2 %v2237_v28 }
 0x1bc   : > { %v699_v41 = vpack.c.bf16 %v615_v34, %v614_v32  ;;  %v2241_v34 = vor.u32 %v2474_v29, %v2238_v30  ;;  %v2896_v29 = vor.u32 %v2525_v26, %v2454_v27  ;;  %v2497_v27 = vld [vmem:[#allocation3 + $0xf4] sm:$0xf0] }
 0x1be   : > { %2199 = vmatmul.msk.bf16.vlgmr.msra.gmra.mxu2 %vm729_vm2, %v699_v41  ;;  %1219 = vmatpush.bf16.msrb.mxu3 %v2241_v34  ;;  %v2470_v41 = vld [vmem:[#allocation3 + $0x1c] sm:$0xf0] }
 0x1bf   : > { %v594_v51 = vpop.f32.mrf.mxu3  ;;  %v2205_v44 = vor.u32 %v2470_v41, %v2204_v40  ;;  %1269 = vmatpush.bf16.msrb.mxu0 %v2213_v49  ;;  %v2380_v41 = vld [vmem:[#allocation3 + $0x150] sm:$0xf]  ;;  %v2907_v49 = vor.u32 %v2517_v46, %v2422_v47 }
 0x1c0   : > { %v595_v9 = vadd.f32 %v2851_v33, %v594_v51  ;;  %v2214_v51 = vld [vmem:[#allocation3 + $0x28] sm:$0xf0] }
 0x1c1   : > { %v2217_v52 = vor.u32 %v2467_v50, %v2214_v51  ;;  %1171 = vmatpush.bf16.msrb.mxu2 %v2205_v44  ;;  %v2381_v44 = vor.u32 %v2512_v42, %v2380_v41  ;;  %v2388_v51 = vld [vmem:[#allocation3 + $0x158] sm:$0xf] }
 0x1c2   : > { %v616_v24 = vmax.f32 %v595_v9, 0.0  ;;  %1220 = vmatpush.bf16.msrb.mxu3 %v2209_v48  ;;  %v2414_v9 = vld [vmem:[#allocation3 + $0x1b0] sm:$0xf0]  ;;  %v2292_v42 = vld [vmem:[#allocation3 + $0x98] sm:$0xf] }
 0x1c3   : > { %1318 = vmatpush.bf16.msrb.mxu1 %v2217_v52  ;;  %v2417_v10 = vor.u32 %v2516_v7, %v2414_v9  ;;  %v2513_v52 = vld [vmem:[#allocation3 + $0x174] sm:$0xf0] }
 0x1c5   : > { %1360 = vmatpush.bf16.msra.mxu2 %v2445_v8  ;;  %v2505_v8 = vld [vmem:[#allocation3 + $0x134] sm:$0xf0] }
 0x1c6   : > { %1409 = vmatpush.bf16.msra.mxu3 %v2449_v61  ;;  %v2357_v9 = vor.u32 %v2505_v8, %v2356_v5 }
 0x1c7   : > { %v596_v13 = vpop.f32.mrf.mxu3  ;;  %1507 = vmatpush.bf16.msra.mxu1 %v2896_v29 }
 0x1c8   : > { %v597_v18 = vadd.f32 %v2851_v33, %v596_v13  ;;  %v2529_v13 = vld [vmem:[#allocation3 + $0x1f4] sm:$0xf0] }
 0x1c9   : > { %v2453_v14 = vor.u32 %v2529_v13, %v2452_v12 }
 0x1ca   : > { %v617_v25 = vmax.f32 %v597_v18, 0.0  ;;  %1410 = vmatpush.bf16.msra.mxu3 %v2417_v10 }
 0x1cb   : > { %1458 = vmatpush.bf16.msra.mxu0 %v2453_v14  ;;  %1508 = vmatpush.bf16.msra.mxu1 %v2907_v49 }
 0x1cc   : > { %v700_v32 = vpack.c.bf16 %v617_v25, %v616_v24  ;;  %v2413_v24 = vor.u32 %v2520_v22, %v2412_v21  ;;  %v2382_v25 = vld [vmem:[#allocation3 + $0x170] sm:$0xf0] }
 0x1cd   : > { %v2385_v28 = vor.u32 %v2508_v23, %v2382_v25  ;;  %v2286_v21 = vld [vmem:[#allocation3 + $0xb0] sm:$0xf0]  ;;  %v2501_v23 = vld [vmem:[#allocation3 + $0x11c] sm:$0xf]  ;;  %v2324_v25 = vld [vmem:[#allocation3 + $0xd8] sm:$0xf] }
 0x1ce   : > { %2200 = vmatmul.msk.bf16.gmra.mxu2 %vm729_vm2, %v700_v32  ;;  %v2521_v32 = vld [vmem:[#allocation3 + $0x1b4] sm:$0xf0] }
 0x1cf   : > { %v599_v43 = vpop.f32.mrf.mxu3  ;;  %1361 = vmatpush.bf16.msra.mxu2 %v2413_v24  ;;  %1411 = vmatpush.bf16.msra.mxu3 %v2385_v28  ;;  %v2421_v34 = vor.u32 %v2521_v32, %v2420_v31  ;;  %v2358_v24 = vld [vmem:[#allocation3 + $0x138] sm:$0xf0]  ;;  %v2325_v28 = vor.u32 %v2497_v27, %v2324_v25  ;;  %v2284_v31 = vld [vmem:[#allocation3 + $0x90] sm:$0xf] }
 0x1d0   : > { %v600_v53 = vadd.f32 %v2851_v33, %v599_v43  ;;  %v2500_v43 = vld [vmem:[#allocation3 + $0x114] sm:$0xf]  ;;  %v2931_v26 = vor.u32 %v2501_v23, %v2358_v24  ;;  %v2488_v32 = vld [vmem:[#allocation3 + $0xac] sm:$0xf0] }
 0x1d1   : > { %1459 = vmatpush.bf16.msra.mxu0 %v2421_v34  ;;  %v2353_v48 = vor.u32 %v2500_v43, %v2350_v45  ;;  %v2476_v34 = vld [vmem:[#allocation3 + $0x54] sm:$0xf]  ;;  %v2489_v43 = vld [vmem:[#allocation3 + $0xb4] sm:$0xf0] }
 0x1d2   : > { %v618_v56 = vmax.f32 %v600_v53, 0.0  ;;  %v2348_v53 = vld [vmem:[#allocation3 + $0x110] sm:$0xf] }
 0x1d3   : > { %1362 = vmatpush.bf16.msra.mxu2 %v2381_v44  ;;  %1412 = vmatpush.bf16.msra.mxu3 %v2353_v48  ;;  %v2293_v44 = vor.u32 %v2489_v43, %v2292_v42 }
 0x1d7   : > { %v601_v54 = vpop.f32.mrf.mxu3 }
 0x1d8   : > { %v602_v55 = vadd.f32 %v2851_v33, %v601_v54  ;;  %v2389_v54 = vor.u32 %v2513_v52, %v2388_v51 }
 0x1da   : > { %v619_v57 = vmax.f32 %v602_v55, 0.0  ;;  %v2504_v55 = vld [vmem:[#allocation3 + $0x12c] sm:$0xf0]  ;;  %1460 = vmatpush.bf16.msra.mxu0 %v2389_v54 }
 0x1db   : > { %v2480_v54 = vld [vmem:[#allocation3 + $0x6c] sm:$0xf0] }
 0x1dc   : > { %v701_v58 = vpack.c.bf16 %v619_v57, %v618_v56  ;;  %v2492_v56 = vld [vmem:[#allocation3 + $0xd4] sm:$0xf] }
 0x1dd   : > { %v2318_v57 = vld [vmem:[#allocation3 + $0xf0] sm:$0xf0] }
 0x1de   : > { %2201 = vmatmul.msk.bf16.gmra.mxu2 %vm729_vm2, %v701_v58  ;;  %v2349_v58 = vor.u32 %v2504_v55, %v2348_v53  ;;  %v2321_v59 = vor.u32 %v2492_v56, %v2318_v57  ;;  %1461 = vmatpush.bf16.msra.mxu0 %v2357_v9  ;;  %v2252_v53 = vld [vmem:[#allocation3 + $0x50] sm:$0xf]  ;;  %v2468_v55 = vld [vmem:[#allocation3 + $0x14] sm:$0xf] }
 0x1df   : > { %v2253_v56 = vor.u32 %v2480_v54, %v2252_v53  ;;  %v2222_v57 = vld [vmem:[#allocation3 + $0x30] sm:$0xf0] }
 0x1e0   : > { %1363 = vmatpush.bf16.msra.mxu2 %v2349_v58  ;;  %1413 = vmatpush.bf16.msra.mxu3 %v2321_v59  ;;  %v2225_v58 = vor.u32 %v2468_v55, %v2222_v57  ;;  %v2485_v59 = vld [vmem:[#allocation3 + $0x9c] sm:$0xf] }
 0x1e2   : > { %1462 = vmatpush.bf16.msra.mxu0 %v2325_v28 }
 0x1e5   : > { %v763_v62 = vpop.f32.mrf.mxu1 }
 0x1e6   : > { %v764_v0 = vadd.f32 %v2880_v63, %v763_v62  ;;  %1463 = vmatpush.bf16.msra.mxu0 %v2293_v44 }
 0x1e8   : > { %v803_v2 = vmax.f32 %v764_v0, 0.0 }
 0x1ed   : > { %v765_v1 = vpop.f32.mrf.mxu1 }
 0x1ee   : > { %v766_v33 = vadd.f32 %v2880_v63, %v765_v1 }
 0x1f0   : > { %v804_v3 = vmax.f32 %v766_v33, 0.0 }
 0x1f2   : > { %v2884_v4 = vpack.c.bf16 %v804_v3, %v803_v2  ;;  %v2509_v2 = vld [vmem:[#allocation3 + $0x15c] sm:$0xf] }
 0x1f3   : > { %v2390_v3 = vld [vmem:[#allocation3 + $0x178] sm:$0xf0] }
 0x1f4   : > { %1172 = vmatmul.bf16.vlgmr.msrb.gmra.mxu2 %v2884_v4  ;;  %1221 = vmatmul.bf16.vlgmr.msrb.gmra.mxu3 %v2884_v4  ;;  %v2920_v7 = vor.u32 %v2509_v2, %v2390_v3  ;;  %v2477_v2 = vld [vmem:[#allocation3 + $0x5c] sm:$0xf] }
 0x1f5   : > { %1270 = vmatmul.bf16.vlgmr.msrb.gmra.mxu0 %v2884_v4  ;;  %1319 = vmatmul.bf16.vlgmr.msrb.gmra.mxu1 %v2884_v4  ;;  %v768_v11 = vpop.f32.mrf.mxu1  ;;  %v2262_v3 = vld [vmem:[#allocation3 + $0x78] sm:$0xf0] }
 0x1f6   : > { %v769_v15 = vadd.f32 %v2880_v63, %v768_v11  ;;  %1509 = vmatpush.bf16.msra.mxu1 %v2920_v7 }
 0x1f8   : > { %v805_v18 = vmax.f32 %v769_v15, 0.0  ;;  %v2316_v15 = vld [vmem:[#allocation3 + $0xd0] sm:$0xf] }
 0x1fa   : > { %1510 = vmatpush.bf16.msra.mxu1 %v2931_v26 }
 0x1fd   : > { %v770_v16 = vpop.f32.mrf.mxu1 }
 0x1fe   : > { %v771_v17 = vadd.f32 %v2880_v63, %v770_v16  ;;  %v2496_v16 = vld [vmem:[#allocation3 + $0xec] sm:$0xf0] }
 0x200   : > { %v806_v19 = vmax.f32 %v771_v17, 0.0  ;;  %v2484_v17 = vld [vmem:[#allocation3 + $0x94] sm:$0xf] }
 0x201   : > { %v2289_v22 = vor.u32 %v2484_v17, %v2286_v21 }
 0x202   : > { %v2892_v20 = vpack.c.bf16 %v806_v19, %v805_v18  ;;  %v2317_v19 = vor.u32 %v2496_v16, %v2316_v15  ;;  %v2473_v16 = vld [vmem:[#allocation3 + $0x34] sm:$0xf0] }
 0x203   : > { %1414 = vmatpush.bf16.msra.mxu3 %v2289_v22 }
 0x204   : > { %1177 = vmatmul.bf16.gmra.mxu2 %v2892_v20  ;;  %1226 = vmatmul.bf16.gmra.mxu3 %v2892_v20 }
 0x205   : > { %1275 = vmatmul.bf16.gmra.mxu0 %v2892_v20  ;;  %1324 = vmatmul.bf16.gmra.mxu1 %v2892_v20  ;;  %v773_v30 = vpop.f32.mrf.mxu1 }
 0x206   : > { %v774_v35 = vadd.f32 %v2880_v63, %v773_v30  ;;  %1364 = vmatpush.bf16.msra.mxu2 %v2317_v19  ;;  %v2230_v19 = vld [vmem:[#allocation3 + $0x38] sm:$0xf0] }
 0x208   : > { %v807_v38 = vmax.f32 %v774_v35, 0.0  ;;  %v2285_v35 = vor.u32 %v2488_v32, %v2284_v31 }
 0x20a   : > { %1365 = vmatpush.bf16.msra.mxu2 %v2285_v35  ;;  %v2975_v35 = vstv %s2458_s10 }
 0x20d   : > { %v775_v36 = vpop.f32.mrf.mxu1 }
 0x20e   : > { %v776_v37 = vadd.f32 %v2880_v63, %v775_v36  ;;  %v2254_v36 = vld [vmem:[#allocation3 + $0x70] sm:$0xf0]  ;;  %1366 = vmatpush.bf16.msra.mxu2 %v2253_v56 }
 0x210   : > { %v808_v39 = vmax.f32 %v776_v37, 0.0  ;;  %v2257_v37 = vor.u32 %v2476_v34, %v2254_v36 }
 0x212   : > { %v2903_v40 = vpack.c.bf16 %v808_v39, %v807_v38  ;;  %v2493_v38 = vld [vmem:[#allocation3 + $0xdc] sm:$0xf]  ;;  %1415 = vmatpush.bf16.msra.mxu3 %v2257_v37 }
 0x213   : > { %v2326_v39 = vld [vmem:[#allocation3 + $0xf8] sm:$0xf0] }
 0x214   : > { %1182 = vmatmul.bf16.gmra.mxu2 %v2903_v40  ;;  %1231 = vmatmul.bf16.gmra.mxu3 %v2903_v40  ;;  %v2934_v41 = vor.u32 %v2493_v38, %v2326_v39 }
 0x215   : > { %1280 = vmatmul.bf16.gmra.mxu0 %v2903_v40  ;;  %1329 = vmatmul.bf16.gmra.mxu1 %v2903_v40  ;;  %v778_v50 = vpop.f32.mrf.mxu1 }
 0x216   : > { %v779_v60 = vadd.f32 %v2880_v63, %v778_v50  ;;  %1511 = vmatpush.bf16.msra.mxu1 %v2934_v41  ;;  %1416 = vmatpush.bf16.msra.mxu3 %v2225_v58 }
 0x218   : > { %v809_v0 = vmax.f32 %v779_v60, 0.0  ;;  %v2294_v60 = vld [vmem:[#allocation3 + $0xb8] sm:$0xf0] }
 0x21a   : > { %2535 = vmatpush.bf16.msrb.mxu3 %v2896_v29  ;;  %v2469_v29 = vld [vmem:[#allocation3 + $0x1c] sm:$0xf] }
 0x21b   : > { %v2233_v22 = vor.u32 %v2469_v29, %v2230_v19 }
 0x21d   : > { %v780_v61 = vpop.f32.mrf.mxu1 }
 0x21e   : > { %v781_v62 = vadd.f32 %v2880_v63, %v780_v61  ;;  %v2297_v61 = vor.u32 %v2485_v59, %v2294_v60  ;;  %2536 = vmatpush.bf16.msrb.mxu3 %v2907_v49 }
 0x220   : > { %v810_v1 = vmax.f32 %v781_v62, 0.0  ;;  %v2260_v62 = vld [vmem:[#allocation3 + $0x58] sm:$0xf]  ;;  %1512 = vmatpush.bf16.msra.mxu1 %v2297_v61 }
 0x222   : > { %v2914_v33 = vpack.c.bf16 %v810_v1, %v809_v0  ;;  %v2481_v0 = vld [vmem:[#allocation3 + $0x74] sm:$0xf0]  ;;  %2537 = vmatpush.bf16.msrb.mxu3 %v2920_v7 }
 0x223   : > { %v2261_v1 = vor.u32 %v2481_v0, %v2260_v62 }
 0x224   : > { %1187 = vmatmul.bf16.gmra.mxu2 %v2914_v33  ;;  %1236 = vmatmul.bf16.gmra.mxu3 %v2914_v33 }
 0x225   : > { %1285 = vmatmul.bf16.gmra.mxu0 %v2914_v33  ;;  %1334 = vmatmul.bf16.gmra.mxu1 %v2914_v33  ;;  %v783_v6 = vpop.f32.mrf.mxu1 }
 0x226   : > { %v784_v10 = vadd.f32 %v2880_v63, %v783_v6  ;;  %1464 = vmatpush.bf16.msra.mxu0 %v2261_v1  ;;  %v2265_v6 = vor.u32 %v2477_v2, %v2262_v3  ;;  %2538 = vmatpush.bf16.msrb.mxu3 %v2931_v26 }
 0x228   : > { %v811_v13 = vmax.f32 %v784_v10, 0.0  ;;  %1513 = vmatpush.bf16.msra.mxu1 %v2265_v6  ;;  %v2220_v10 = vld [vmem:[#allocation3 + $0x10] sm:$0xf] }
 0x22a   : > { %2539 = vmatpush.bf16.msrb.mxu3 %v2934_v41 }
 0x22c   : > { %1514 = vmatpush.bf16.msra.mxu1 %v2233_v22 }
 0x22d   : > { %v785_v11 = vpop.f32.mrf.mxu1 }
 0x22e   : > { %v786_v12 = vadd.f32 %v2880_v63, %v785_v11  ;;  %v2472_v11 = vld [vmem:[#allocation3 + $0x2c] sm:$0xf0]  ;;  %2540 = vmatpush.bf16.msrb.mxu3 %v2297_v61 }
 0x22f   : > { %v2221_v15 = vor.u32 %v2472_v11, %v2220_v10 }
 0x230   : > { %v812_v14 = vmax.f32 %v786_v12, 0.0  ;;  %v2228_v12 = vld [vmem:[#allocation3 + $0x18] sm:$0xf] }
 0x231   : > { %v2229_v17 = vor.u32 %v2473_v16, %v2228_v12  ;;  %1367 = vmatpush.bf16.msra.mxu2 %v2221_v15 }
 0x232   : > { %v2925_v18 = vpack.c.bf16 %v812_v14, %v811_v13  ;;  %2541 = vmatpush.bf16.msrb.mxu3 %v2265_v6 }
 0x233   : > { %1465 = vmatpush.bf16.msra.mxu0 %v2229_v17 }
 0x234   : > { %1192 = vmatmul.bf16.gmra.mxu2 %v2925_v18  ;;  %1241 = vmatmul.bf16.gmra.mxu3 %v2925_v18 }
 0x235   : > { %1290 = vmatmul.bf16.gmra.mxu0 %v2925_v18  ;;  %1339 = vmatmul.bf16.gmra.mxu1 %v2925_v18 }
 0x236   : > { %2542 = vmatpush.bf16.msrb.mxu3 %v2233_v22 }
 0x241   : > { %v788_v30 = vpop.f32.mrf.mxu2 }
 0x242   : > { %v789_v45 = vadd.f32 %v2880_v63, %v788_v30  ;;  %v1556_v30 = vlaneseq }
 0x244   : > { %v813_v48 = vmax.f32 %v789_v45, 0.0  ;;  %v2966_v32 = vshrl.u32 %v1556_v30, 7 }
 0x246   : > { %v1558_v34 = vadd.s32 8, %v2966_v32  ;;  %v1559_v38 = vadd.s32 16, %v2966_v32  ;;  %v2986_v42 = vadd.s32 %v2975_v35, %v2966_v32  ;;  %v1560_v19 = vadd.s32 24, %v2966_v32 }
 0x248   : > { %vm1591_vm3 = vcmp.lt.s32.totalorder %v2986_v42, 500  ;;  %v3045_v30 = vadd.s32 %v2975_v35, %v1560_v19 }
 0x249   : > { %v790_v46 = vpop.f32.mrf.mxu2 }
 0x24a   : > { %v791_v47 = vadd.f32 %v2880_v63, %v790_v46  ;;  %v2995_v46 = vadd.s32 %v2975_v35, %v1558_v34  ;;  %vm1594_vm6 = vcmp.lt.s32.totalorder %v3045_v30, 500 }
 0x24c   : > { %v814_v50 = vmax.f32 %v791_v47, 0.0  ;;  %vm1592_vm4 = vcmp.lt.s32.totalorder %v2995_v46, 500 }
 0x24e   : > { %v2939_v51 = vpack.c.bf16 %v814_v50, %v813_v48  ;;  %v2998_v48 = vadd.s32 %v2975_v35, %v1559_v38 }
 0x250   : > { %1197 = vmatmul.bf16.gmra.mxu2 %v2939_v51  ;;  %1246 = vmatmul.bf16.gmra.mxu3 %v2939_v51  ;;  %vm1593_vm5 = vcmp.lt.s32.totalorder %v2998_v48, 500 }
 0x251   : > { %1295 = vmatmul.bf16.gmra.mxu0 %v2939_v51  ;;  %1344 = vmatmul.bf16.gmra.mxu1 %v2939_v51  ;;  %v793_v52 = vpop.f32.mrf.mxu2 }
 0x252   : > { %v794_v5 = vadd.f32 %v2880_v63, %v793_v52 }
 0x254   : > { %v815_v13 = vmax.f32 %v794_v5, 0.0 }
 0x259   : > { %v795_v8 = vpop.f32.mrf.mxu2 }
 0x25a   : > { %v796_v9 = vadd.f32 %v2880_v63, %v795_v8 }
 0x25c   : > { %v816_v14 = vmax.f32 %v796_v9, 0.0 }
 0x25e   : > { %v2949_v21 = vpack.c.bf16 %v816_v14, %v815_v13 }
 0x260   : > { %1202 = vmatmul.bf16.gmra.mxu2 %v2949_v21  ;;  %1251 = vmatmul.bf16.gmra.mxu3 %v2949_v21 }
 0x261   : > { %1300 = vmatmul.bf16.gmra.mxu0 %v2949_v21  ;;  %1349 = vmatmul.bf16.gmra.mxu1 %v2949_v21  ;;  %v798_v49 = vpop.f32.mrf.mxu2 }
 0x262   : > { %v799_v23 = vadd.f32 %v2880_v63, %v798_v49 }
 0x264   : > { %v817_v25 = vmax.f32 %v799_v23, 0.0 }
 0x269   : > { %v800_v24 = vpop.f32.mrf.mxu2 }
 0x26a   : > { %v801_v7 = vadd.f32 %v2880_v63, %v800_v24  ;;  %v2972_v63 = vld [vmem:[%s3671_s7] sm:$0xff] }
 0x26b   : > { %v2979_v39 = vperm.slane %v2972_v63, 2  ;;  %v2982_v41 = vperm.slane %v2972_v63, 3  ;;  %v2989_v43 = vperm.slane %v2972_v63, 0  ;;  %v2992_v44 = vperm.slane %v2972_v63, 1 }
 0x26c   : > { %v818_v27 = vmax.f32 %v801_v7, 0.0 }
 0x26e   : > { %v2960_v28 = vpack.c.bf16 %v818_v27, %v817_v25 }
 0x270   : > { %1207 = vmatmul.bf16.gmra.mxu2 %v2960_v28  ;;  %1256 = vmatmul.bf16.gmra.mxu3 %v2960_v28 }
 0x271   : > { %1305 = vmatmul.bf16.gmra.mxu0 %v2960_v28  ;;  %1354 = vmatmul.bf16.gmra.mxu1 %v2960_v28 }
 0x272   : > { %v1271_v26 = vpop.f32.mrf.mxu0  ;;  %v1320_v31 = vpop.f32.mrf.mxu1 }
 0x273   : > { %v1272_v50 = vadd.f32 %v1271_v26, %v2979_v39  ;;  %v1321_v52 = vadd.f32 %v1320_v31, %v2982_v41  ;;  %v1561_v31 = vadd.s32 32, %v2966_v32 }
 0x275   : > { %v1641_v61 = vsel %vm1591_vm3, %v1272_v50, -inf  ;;  %v1642_v62 = vsel %vm1591_vm3, %v1321_v52, -inf }
 0x277   : > { %v1173_v36 = vpop.f32.mrf.mxu2  ;;  %v1222_v37 = vpop.f32.mrf.mxu3 }
 0x278   : > { %v1174_v55 = vadd.f32 %v1173_v36, %v2989_v43  ;;  %v1223_v56 = vadd.f32 %v1222_v37, %v2992_v44 }
 0x27a   : > { %v1273_v45 = vpop.f32.mrf.mxu0  ;;  %v1322_v47 = vpop.f32.mrf.mxu1  ;;  %v1639_v2 = vsel %vm1591_vm3, %v1174_v55, -inf  ;;  %v1640_v3 = vsel %vm1591_vm3, %v1223_v56, -inf }
 0x27b   : > { %v1274_v53 = vadd.f32 %v1273_v45, %v2979_v39  ;;  %v1323_v54 = vadd.f32 %v1322_v47, %v2982_v41  ;;  %v3052_v45 = vadd.s32 %v2975_v35, %v1561_v31 }
 0x27d   : > { %v1649_v0 = vsel %vm1592_vm4, %v1274_v53, -inf  ;;  %v1650_v1 = vsel %vm1592_vm4, %v1323_v54, -inf  ;;  %vm1595_vm7 = vcmp.lt.s32.totalorder %v3052_v45, 500 }
 0x27e   : > { %v1797_v13 = vmax.f32 %v1641_v61, %v1649_v0  ;;  %v1812_v14 = vmax.f32 %v1642_v62, %v1650_v1 }
 0x27f   : > { %v1175_v57 = vpop.f32.mrf.mxu2  ;;  %v1224_v58 = vpop.f32.mrf.mxu3 }
 0x280   : > { %v1176_v59 = vadd.f32 %v1175_v57, %v2989_v43  ;;  %v1225_v60 = vadd.f32 %v1224_v58, %v2992_v44  ;;  %1368 = vmatmul.bf16.vlgmr.msra.gmra.mxu2 %v2884_v4  ;;  %1417 = vmatmul.bf16.vlgmr.msra.gmra.mxu3 %v2884_v4 }
 0x281   : > { %1466 = vmatmul.bf16.vlgmr.msra.gmra.mxu0 %v2884_v4  ;;  %1515 = vmatmul.bf16.vlgmr.msra.gmra.mxu1 %v2884_v4 }
 0x282   : > { %v1647_v5 = vsel %vm1592_vm4, %v1176_v59, -inf  ;;  %v1648_v6 = vsel %vm1592_vm4, %v1225_v60, -inf  ;;  %v1276_v8 = vpop.f32.mrf.mxu0  ;;  %v1325_v9 = vpop.f32.mrf.mxu1 }
 0x283   : > { %v1767_v10 = vmax.f32 %v1639_v2, %v1647_v5  ;;  %v1782_v11 = vmax.f32 %v1640_v3, %v1648_v6  ;;  %v1277_v12 = vadd.f32 %v1276_v8, %v2979_v39  ;;  %v1326_v4 = vadd.f32 %v1325_v9, %v2982_v41 }
 0x285   : > { %v1657_v15 = vsel %vm1593_vm5, %v1277_v12, -inf  ;;  %v1658_v16 = vsel %vm1593_vm5, %v1326_v4, -inf }
 0x286   : > { %v1798_v29 = vmax.f32 %v1797_v13, %v1657_v15  ;;  %v1813_v17 = vmax.f32 %v1812_v14, %v1658_v16 }
 0x287   : > { %v1178_v22 = vpop.f32.mrf.mxu2  ;;  %v1227_v49 = vpop.f32.mrf.mxu3 }
 0x288   : > { %v1179_v23 = vadd.f32 %v1178_v22, %v2989_v43  ;;  %v1228_v24 = vadd.f32 %v1227_v49, %v2992_v44 }
 0x28a   : > { %v1655_v7 = vsel %vm1593_vm5, %v1179_v23, -inf  ;;  %v1656_v25 = vsel %vm1593_vm5, %v1228_v24, -inf  ;;  %v1278_v27 = vpop.f32.mrf.mxu0  ;;  %v1327_v26 = vpop.f32.mrf.mxu1 }
 0x28b   : > { %v1768_v34 = vmax.f32 %v1767_v10, %v1655_v7  ;;  %v1783_v36 = vmax.f32 %v1782_v11, %v1656_v25  ;;  %v1279_v37 = vadd.f32 %v1278_v27, %v2979_v39  ;;  %v1328_v38 = vadd.f32 %v1327_v26, %v2982_v41 }
 0x28d   : > { %v1665_v54 = vsel %vm1594_vm6, %v1279_v37, -inf  ;;  %v1666_v55 = vsel %vm1594_vm6, %v1328_v38, -inf }
 0x28e   : > { %v1799_v1 = vmax.f32 %v1798_v29, %v1665_v54  ;;  %v1814_v2 = vmax.f32 %v1813_v17, %v1666_v55  ;;  %v1565_v55 = vadd.s32 64, %v2966_v32 }
 0x28f   : > { %v1180_v47 = vpop.f32.mrf.mxu2  ;;  %v1229_v50 = vpop.f32.mrf.mxu3 }
 0x290   : > { %v1181_v52 = vadd.f32 %v1180_v47, %v2989_v43  ;;  %v1230_v53 = vadd.f32 %v1229_v50, %v2992_v44  ;;  %1373 = vmatmul.bf16.gmra.mxu2 %v2892_v20  ;;  %1422 = vmatmul.bf16.gmra.mxu3 %v2892_v20  ;;  %v1562_v47 = vadd.s32 40, %v2966_v32 }
 0x291   : > { %1471 = vmatmul.bf16.gmra.mxu0 %v2892_v20  ;;  %1520 = vmatmul.bf16.gmra.mxu1 %v2892_v20 }
 0x292   : > { %v1663_v56 = vsel %vm1594_vm6, %v1181_v52, -inf  ;;  %v1664_v57 = vsel %vm1594_vm6, %v1230_v53, -inf  ;;  %v1281_v58 = vpop.f32.mrf.mxu0  ;;  %v1330_v59 = vpop.f32.mrf.mxu1  ;;  %v1563_v53 = vadd.s32 48, %v2966_v32  ;;  %v3128_v54 = vadd.s32 %v2975_v35, %v1562_v47 }
 0x293   : > { %v1769_v60 = vmax.f32 %v1768_v34, %v1663_v56  ;;  %v1784_v61 = vmax.f32 %v1783_v36, %v1664_v57  ;;  %v1282_v62 = vadd.f32 %v1281_v58, %v2979_v39  ;;  %v1331_v0 = vadd.f32 %v1330_v59, %v2982_v41 }
 0x294   : > { %v3138_v57 = vadd.s32 %v2975_v35, %v1563_v53  ;;  %v1566_v58 = vadd.s32 72, %v2966_v32  ;;  %vm1596_vm8 = vcmp.lt.s32.totalorder %v3128_v54, 500 }
 0x295   : > { %v1673_v20 = vsel %vm1595_vm7, %v1282_v62, -inf  ;;  %v1674_v3 = vsel %vm1595_vm7, %v1331_v0, -inf }
 0x296   : > { %v3075_v5 = vmax.f32 %v1799_v1, %v1673_v20  ;;  %v3077_v6 = vmax.f32 %v1814_v2, %v1674_v3  ;;  %v3153_v1 = vadd.s32 %v2975_v35, %v1565_v55  ;;  %vm1597_vm9 = vcmp.lt.s32.totalorder %v3138_v57, 500 }
 0x297   : > { %v1183_v8 = vpop.f32.mrf.mxu2  ;;  %v1232_v9 = vpop.f32.mrf.mxu3 }
 0x298   : > { %v1184_v10 = vadd.f32 %v1183_v8, %v2989_v43  ;;  %v1233_v11 = vadd.f32 %v1232_v9, %v2992_v44  ;;  %v3164_v9 = vadd.s32 %v2975_v35, %v1566_v58  ;;  %vm1599_vm11 = vcmp.lt.s32.totalorder %v3153_v1, 500 }
 0x29a   : > { %v1671_v12 = vsel %vm1595_vm7, %v1184_v10, -inf  ;;  %v1672_v4 = vsel %vm1595_vm7, %v1233_v11, -inf  ;;  %v1283_v15 = vpop.f32.mrf.mxu0  ;;  %v1332_v16 = vpop.f32.mrf.mxu1  ;;  %vm1600_vm12 = vcmp.lt.s32.totalorder %v3164_v9, 500 }
 0x29b   : > { %v3085_v13 = vmax.f32 %v1769_v60, %v1671_v12  ;;  %v3087_v14 = vmax.f32 %v1784_v61, %v1672_v4  ;;  %v1284_v56 = vadd.f32 %v1283_v15, %v2979_v39  ;;  %v1333_v61 = vadd.f32 %v1332_v16, %v2982_v41 }
 0x29d   : > { %v1681_v3 = vsel %vm1596_vm8, %v1284_v56, -inf  ;;  %v1682_v10 = vsel %vm1596_vm8, %v1333_v61, -inf }
 0x29e   : > { %v1801_v47 = vmax.f32 %v3075_v5, %v1681_v3 }
 0x29f   : > { %v1185_v29 = vpop.f32.mrf.mxu2  ;;  %v1234_v17 = vpop.f32.mrf.mxu3 }
 0x2a0   : > { %1378 = vmatmul.bf16.gmra.mxu2 %v2903_v40  ;;  %1427 = vmatmul.bf16.gmra.mxu3 %v2903_v40  ;;  %v1235_v62 = vadd.f32 %v1234_v17, %v2992_v44  ;;  %v1567_v17 = vadd.s32 80, %v2966_v32 }
 0x2a1   : > { %1476 = vmatmul.bf16.gmra.mxu0 %v2903_v40  ;;  %1525 = vmatmul.bf16.gmra.mxu1 %v2903_v40 }
 0x2a2   : > { %v1286_v19 = vpop.f32.mrf.mxu0  ;;  %v1335_v22 = vpop.f32.mrf.mxu1  ;;  %v1680_v15 = vsel %vm1596_vm8, %v1235_v62, -inf }
 0x2a3   : > { %v1287_v8 = vadd.f32 %v1286_v19, %v2979_v39  ;;  %v1336_v12 = vadd.f32 %v1335_v22, %v2982_v41  ;;  %v1816_v22 = vmax.f32 %v3077_v6, %v1682_v10 }
 0x2a5   : > { %v1689_v53 = vsel %vm1597_vm9, %v1287_v8, -inf }
 0x2a6   : > { %v1802_v58 = vmax.f32 %v1801_v47, %v1689_v53 }
 0x2a7   : > { %v1188_v49 = vpop.f32.mrf.mxu2  ;;  %v1237_v23 = vpop.f32.mrf.mxu3 }
 0x2a8   : > { %v1189_v4 = vadd.f32 %v1188_v49, %v2989_v43  ;;  %v1238_v16 = vadd.f32 %v1237_v23, %v2992_v44 }
 0x2aa   : > { %v1288_v24 = vpop.f32.mrf.mxu0  ;;  %v1337_v7 = vpop.f32.mrf.mxu1  ;;  %v1687_v5 = vsel %vm1597_vm9, %v1189_v4, -inf }
 0x2ab   : > { %v1338_v19 = vadd.f32 %v1337_v7, %v2982_v41  ;;  %v1690_v7 = vsel %vm1597_vm9, %v1336_v12, -inf }
 0x2ac   : > { %v1817_v8 = vmax.f32 %v1816_v22, %v1690_v7 }
 0x2af   : > { %v3097_v25 = vpop.f32.mrf.mxu2  ;;  %v3099_v27 = vpop.f32.mrf.mxu3 }
 0x2b0   : > { %1383 = vmatmul.bf16.gmra.mxu2 %v2914_v33  ;;  %1432 = vmatmul.bf16.gmra.mxu3 %v2914_v33  ;;  %v1191_v6 = vadd.f32 %v3097_v25, %v2989_v43  ;;  %v1240_v56 = vadd.f32 %v3099_v27, %v2992_v44 }
 0x2b1   : > { %1481 = vmatmul.bf16.gmra.mxu0 %v2914_v33  ;;  %1530 = vmatmul.bf16.gmra.mxu1 %v2914_v33 }
 0x2b2   : > { %v3101_v40 = vpop.f32.mrf.mxu0  ;;  %v3103_v26 = vpop.f32.mrf.mxu1 }
 0x2b3   : > { %v1341_v25 = vadd.f32 %v3103_v26, %v2982_v41 }
 0x2b7   : > { %v3107_v31 = vpop.f32.mrf.mxu2  ;;  %v3109_v34 = vpop.f32.mrf.mxu3 }
 0x2b8   : > { %v1194_v27 = vadd.f32 %v3107_v31, %v2989_v43  ;;  %v1569_v31 = vadd.s32 96, %v2966_v32 }
 0x2ba   : > { %v3113_v33 = vpop.f32.mrf.mxu0  ;;  %v3115_v36 = vpop.f32.mrf.mxu1  ;;  %v1703_v22 = vsel %vm1599_vm11, %v1194_v27, -inf }
 0x2bf   : > { %v3117_v37 = vpop.f32.mrf.mxu2  ;;  %v3119_v38 = vpop.f32.mrf.mxu3 }
 0x2c0   : > { %1388 = vmatmul.bf16.gmra.mxu2 %v2925_v18  ;;  %1437 = vmatmul.bf16.gmra.mxu3 %v2925_v18 }
 0x2c1   : > { %1486 = vmatmul.bf16.gmra.mxu0 %v2925_v18  ;;  %1535 = vmatmul.bf16.gmra.mxu1 %v2925_v18  ;;  %v1564_v18 = vadd.s32 56, %v2966_v32 }
 0x2c3   : > { %v3150_v0 = vadd.s32 %v2975_v35, %v1564_v18  ;;  %v1786_v18 = vmax.f32 %v3087_v14, %v1680_v15  ;;  %v3204_v14 = vadd.s32 %v2975_v35, %v1567_v17  ;;  %v1294_v17 = vadd.f32 %v3113_v33, %v2979_v39 }
 0x2c4   : > { %v1196_v33 = vadd.f32 %v3117_v37, %v2989_v43 }
 0x2c5   : > { %vm1598_vm10 = vcmp.lt.s32.totalorder %v3150_v0, 500  ;;  %vm1601_vm13 = vcmp.lt.s32.totalorder %v3204_v14, 500 }
 0x2c6   : > { %v1698_v61 = vsel %vm1598_vm10, %v1338_v19, -inf  ;;  %v1695_v15 = vsel %vm1598_vm10, %v1191_v6, -inf  ;;  %v1343_v19 = vadd.f32 %v3115_v36, %v2982_v41  ;;  %v1245_v36 = vadd.f32 %v3119_v38, %v2992_v44 }
 0x2c7   : > { %v1818_v26 = vmax.f32 %v1817_v8, %v1698_v61 }
 0x2c8   : > { %v1714_v61 = vsel %vm1600_vm12, %v1343_v19, -inf }
 0x2ce   : > { %v3122_v50 = vpop.f32.mrf.mxu0  ;;  %v3124_v52 = vpop.f32.mrf.mxu1 }
 0x2cf   : > { %v1297_v37 = vadd.f32 %v3122_v50, %v2979_v39  ;;  %v1346_v38 = vadd.f32 %v3124_v52, %v2982_v41 }
 0x2d0   : > { %1393 = vmatmul.bf16.gmra.mxu2 %v2939_v51  ;;  %1442 = vmatmul.bf16.gmra.mxu3 %v2939_v51 }
 0x2d1   : > { %1491 = vmatmul.bf16.gmra.mxu0 %v2939_v51  ;;  %1540 = vmatmul.bf16.gmra.mxu1 %v2939_v51  ;;  %v1186_v51 = vadd.f32 %v1185_v29, %v2989_v43  ;;  %v1289_v29 = vadd.f32 %v1288_v24, %v2979_v39 }
 0x2d3   : > { %v3141_v59 = vpop.f32.mrf.mxu2  ;;  %v3143_v60 = vpop.f32.mrf.mxu3  ;;  %v1679_v11 = vsel %vm1596_vm8, %v1186_v51, -inf  ;;  %v1697_v55 = vsel %vm1598_vm10, %v1289_v29, -inf  ;;  %v1292_v51 = vadd.f32 %v3101_v40, %v2979_v39  ;;  %v1243_v40 = vadd.f32 %v3109_v34, %v2992_v44 }
 0x2d4   : > { %v1771_v49 = vmax.f32 %v3085_v13, %v1679_v11  ;;  %v1688_v13 = vsel %vm1597_vm9, %v1238_v16, -inf  ;;  %v1568_v11 = vadd.s32 88, %v2966_v32  ;;  %v1803_v4 = vmax.f32 %v1802_v58, %v1697_v55 }
 0x2d5   : > { %v1787_v12 = vmax.f32 %v1786_v18, %v1688_v13  ;;  %v1696_v16 = vsel %vm1598_vm10, %v1240_v56, -inf  ;;  %v1705_v29 = vsel %vm1599_vm11, %v1292_v51, -inf  ;;  %v1706_v34 = vsel %vm1599_vm11, %v1341_v25, -inf }
 0x2d6   : > { %v3155_v2 = vpop.f32.mrf.mxu0  ;;  %v3157_v20 = vpop.f32.mrf.mxu1  ;;  %v1772_v10 = vmax.f32 %v1771_v49, %v1687_v5  ;;  %v3242_v49 = vadd.s32 %v2975_v35, %v1568_v11  ;;  %v1570_v18 = vadd.s32 104, %v2966_v32  ;;  %v1704_v7 = vsel %vm1599_vm11, %v1243_v40, -inf }
 0x2d7   : > { %v1571_v5 = vadd.s32 112, %v2966_v32  ;;  %v1788_v6 = vmax.f32 %v1787_v12, %v1696_v16  ;;  %v1804_v13 = vmax.f32 %v1803_v4, %v1705_v29  ;;  %v1819_v55 = vmax.f32 %v1818_v26, %v1706_v34 }
 0x2d8   : > { %v1773_v47 = vmax.f32 %v1772_v10, %v1695_v15  ;;  %v3253_v56 = vadd.s32 %v2975_v35, %v1569_v31  ;;  %v1713_v58 = vsel %vm1600_vm12, %v1294_v17, -inf  ;;  %vm1602_vm14 = vcmp.lt.s32.totalorder %v3242_v49, 500 }
 0x2d9   : > { %v1789_v10 = vmax.f32 %v1788_v6, %v1704_v7  ;;  %v3265_v27 = vadd.s32 %v2975_v35, %v1570_v18  ;;  %v1711_v11 = vsel %vm1600_vm12, %v1196_v33, -inf  ;;  %v1712_v12 = vsel %vm1600_vm12, %v1245_v36, -inf }
 0x2da   : > { %v1774_v8 = vmax.f32 %v1773_v47, %v1703_v22  ;;  %v1199_v50 = vadd.f32 %v3141_v59, %v2989_v43  ;;  %v3274_v52 = vadd.s32 %v2975_v35, %v1571_v5  ;;  %v1805_v4 = vmax.f32 %v1804_v13, %v1713_v58 }
 0x2db   : > { %v3186_v23 = vpop.f32.mrf.mxu2  ;;  %v3188_v24 = vpop.f32.mrf.mxu3  ;;  %v1820_v15 = vmax.f32 %v1819_v55, %v1714_v61  ;;  %vm1603_vm15 = vcmp.lt.s32.totalorder %v3253_v56, 500  ;;  %v1572_v40 = vadd.s32 120, %v2966_v32  ;;  %v1721_v26 = vsel %vm1601_vm13, %v1297_v37, -inf  ;;  %v1894_v56 = vld [vmem:[#allocation2 + $0x38] sm:$0xff] }
 0x2dc   : > { %v1722_v16 = vsel %vm1601_vm13, %v1346_v38, -inf  ;;  %v1299_v31 = vadd.f32 %v3155_v2, %v2979_v39  ;;  %v1348_v59 = vadd.f32 %v3157_v20, %v2982_v41  ;;  %v1775_v29 = vmax.f32 %v1774_v8, %v1711_v11 }
 0x2dd   : > { %v1790_v34 = vmax.f32 %v1789_v10, %v1712_v12  ;;  %v1248_v17 = vadd.f32 %v3143_v60, %v2992_v44  ;;  %vm1604_vm1 = vcmp.lt.s32.totalorder %v3265_v27, 500  ;;  %v1719_v47 = vsel %vm1601_vm13, %v1199_v50, -inf }
 0x2de   : > { %v3212_v62 = vpop.f32.mrf.mxu0  ;;  %v3214_v3 = vpop.f32.mrf.mxu1  ;;  %vm1605_vm2 = vcmp.lt.s32.totalorder %v3274_v52, 500  ;;  %v1806_v20 = vmax.f32 %v1805_v4, %v1721_v26  ;;  %v1821_v18 = vmax.f32 %v1820_v15, %v1722_v16  ;;  %v3297_v60 = vadd.s32 %v2975_v35, %v1572_v40  ;;  %v440_v35 = vld [vmem:[%s409_s18] sm:$0x7] }
 0x2df   : > { %v1302_v22 = vadd.f32 %v3212_v62, %v2979_v39  ;;  %v1351_v2 = vadd.f32 %v3214_v3, %v2982_v41  ;;  %v1729_v7 = vsel %vm1602_vm14, %v1299_v31, -inf  ;;  %v1730_v33 = vsel %vm1602_vm14, %v1348_v59, -inf }
 0x2e0   : > { %1398 = vmatmul.bf16.gmra.mxu2 %v2949_v21  ;;  %1447 = vmatmul.bf16.gmra.mxu3 %v2949_v21  ;;  %v2686_v3 = vmov 1   ;;  %v1776_v13 = vmax.f32 %v1775_v29, %v1719_v47  ;;  %v1720_v55 = vsel %vm1601_vm13, %v1248_v17, -inf  ;;  %v1201_v58 = vadd.f32 %v3186_v23, %v2989_v43 }
 0x2e1   : > { %1496 = vmatmul.bf16.gmra.mxu0 %v2949_v21  ;;  %1545 = vmatmul.bf16.gmra.mxu1 %v2949_v21  ;;  %v1250_v61 = vadd.f32 %v3188_v24, %v2992_v44  ;;  %v1737_v37 = vsel %vm1603_vm15, %v1302_v22, -inf  ;;  %v1738_v38 = vsel %vm1603_vm15, %v1351_v2, -inf  ;;  %v1807_v8 = vmax.f32 %v1806_v20, %v1729_v7 }
 0x2e2   : > { %2602 = vset.pattern.permute.xlu1 %v2686_v3  ;;  %v1822_v23 = vmax.f32 %v1821_v18, %v1730_v33  ;;  %v1791_v11 = vmax.f32 %v1790_v34, %v1720_v55  ;;  %vm1606_vm0 = vcmp.lt.s32.totalorder %v3297_v60, 500 }
 0x2e3   : > { %v1203_v21 = vpop.f32.mrf.mxu2  ;;  %v1252_v53 = vpop.f32.mrf.mxu3  ;;  %456 = vperm.xlu1 %2602, %v440_v35   ;;  %v1728_v50 = vsel %vm1602_vm14, %v1250_v61, -inf  ;;  %v1808_v4 = vmax.f32 %v1807_v8, %v1737_v37  ;;  %v1889_v37 = vld [vmem:[#allocation2 + $0x18] sm:$0xff] }
 0x2e4   : > { %v1823_v15 = vmax.f32 %v1822_v23, %v1738_v38  ;;  %v1890_v38 = vld [vmem:[#allocation2 + $0x10] sm:$0xff] }
 0x2e6   : > { %v1303_v51 = vpop.f32.mrf.mxu0  ;;  %v1352_v25 = vpop.f32.mrf.mxu1 }
 0x2e7   : > { %v1304_v36 = vadd.f32 %v1303_v51, %v2979_v39  ;;  %v1353_v62 = vadd.f32 %v1352_v25, %v2982_v41  ;;  %v1204_v51 = vadd.f32 %v1203_v21, %v2989_v43  ;;  %v1253_v25 = vadd.f32 %v1252_v53, %v2992_v44 }
 0x2e8   : > { %v1727_v53 = vsel %vm1602_vm14, %v1201_v58, -inf  ;;  %v2688_v58 = vmov 0  }
 0x2e9   : > { %v1745_v12 = vsel %vm1604_vm1, %v1304_v36, -inf  ;;  %v1746_v21 = vsel %vm1604_vm1, %v1353_v62, -inf  ;;  %v1735_v16 = vsel %vm1603_vm15, %v1204_v51, -inf  ;;  %v1736_v31 = vsel %vm1603_vm15, %v1253_v25, -inf  ;;  %2601 = vset.pattern.permute.xlu0 %v2688_v58 }
 0x2ea   : > { %v1809_v34 = vmax.f32 %v1808_v4, %v1745_v12  ;;  %v1824_v17 = vmax.f32 %v1823_v15, %v1746_v21  ;;  %v1777_v33 = vmax.f32 %v1776_v13, %v1727_v53  ;;  %v1792_v36 = vmax.f32 %v1791_v11, %v1728_v50  ;;  %443 = vperm.xlu0 %2601, %v440_v35  }
 0x2eb   : > { %v1205_v32 = vpop.f32.mrf.mxu2  ;;  %v1254_v19 = vpop.f32.mrf.mxu3  ;;  %v2687_v62 = vmov 2  }
 0x2ec   : > { %v1206_v59 = vadd.f32 %v1205_v32, %v2989_v43  ;;  %v1255_v29 = vadd.f32 %v1254_v19, %v2992_v44  ;;  %2603 = vset.pattern.permute.xlu1 %v2687_v62  ;;  %v1778_v61 = vmax.f32 %v1777_v33, %v1735_v16  ;;  %v1793_v13 = vmax.f32 %v1792_v36, %v1736_v31  ;;  %v1888_v31 = vld [vmem:[#allocation2] sm:$0xff] }
 0x2ed   : > { %469 = vperm.xlu1 %2603, %v440_v35   ;;  %v3378_v33 = vperm.slane %v2972_v63, 4 }
 0x2ee   : > { %v1306_v5 = vpop.f32.mrf.mxu0  ;;  %v1355_v6 = vpop.f32.mrf.mxu1 }
 0x2ef   : > { %v1307_v10 = vadd.f32 %v1306_v5, %v2979_v39  ;;  %v1356_v24 = vadd.f32 %v1355_v6, %v2982_v41  ;;  %v1743_v5 = vsel %vm1604_vm1, %v1206_v59, -inf  ;;  %v1744_v6 = vsel %vm1604_vm1, %v1255_v29, -inf }
 0x2f0   : > { %1403 = vmatmul.bf16.gmra.mxu2 %v2960_v28  ;;  %1452 = vmatmul.bf16.gmra.mxu3 %v2960_v28 }
 0x2f1   : > { %1501 = vmatmul.bf16.gmra.mxu0 %v2960_v28  ;;  %v1753_v47 = vsel %vm1605_vm2, %v1307_v10, -inf  ;;  %v1754_v22 = vsel %vm1605_vm2, %v1356_v24, -inf  ;;  %v1779_v10 = vmax.f32 %v1778_v61, %v1743_v5  ;;  %v1794_v24 = vmax.f32 %v1793_v13, %v1744_v6 }
 0x2f2   : > { %v1810_v3 = vmax.f32 %v1809_v34, %v1753_v47  ;;  %v1825_v55 = vmax.f32 %v1824_v17, %v1754_v22  ;;  %v3370_v47 = vperm.slane %v2972_v63, 6  ;;  %v3373_v22 = vperm.slane %v2972_v63, 7  ;;  %2604 = vset.pattern.permute.xlu0 %v2687_v62 }
 0x2f3   : > { %v1208_v40 = vpop.f32.mrf.mxu2  ;;  %v1257_v26 = vpop.f32.mrf.mxu3 }
 0x2f4   : > { %v1209_v2 = vadd.f32 %v1208_v40, %v2989_v43  ;;  %v1258_v20 = vadd.f32 %v1257_v26, %v2992_v44  ;;  %v1887_v26 = vld [vmem:[#allocation2 + $0x30] sm:$0xff] }
 0x2f6   : > { %v1308_v18 = vpop.f32.mrf.mxu0  ;;  %v1357_v7 = vpop.f32.mrf.mxu1  ;;  %v1751_v51 = vsel %vm1605_vm2, %v1209_v2, -inf  ;;  %v1752_v25 = vsel %vm1605_vm2, %v1258_v20, -inf }
 0x2f7   : > { %v1309_v32 = vadd.f32 %v1308_v18, %v2979_v39  ;;  %v1358_v19 = vadd.f32 %v1357_v7, %v2982_v41  ;;  %v1780_v15 = vmax.f32 %v1779_v10, %v1751_v51  ;;  %v1795_v35 = vmax.f32 %v1794_v24, %v1752_v25 }
 0x2f9   : > { %v1761_v39 = vsel %vm1606_vm0, %v1309_v32, -inf  ;;  %v1762_v41 = vsel %vm1606_vm0, %v1358_v19, -inf }
 0x2fa   : > { %v1811_v8 = vmax.f32 %v1810_v3, %v1761_v39  ;;  %v1826_v23 = vmax.f32 %v1825_v55, %v1762_v41 }
 0x2fb   : > { %v1210_v11 = vpop.f32.mrf.mxu2  ;;  %v1259_v12 = vpop.f32.mrf.mxu3 }
 0x2fc   : > { %v1897_v21 = vmax.f32 %v1889_v37, %v1811_v8  ;;  %v1898_v53 = vmax.f32 %v1890_v38, %v1826_v23  ;;  %v1211_v50 = vadd.f32 %v1210_v11, %v2989_v43  ;;  %v1260_v4 = vadd.f32 %v1259_v12, %v2992_v44 }
 0x2fe   : > { %1905 = vst [vmem:[#allocation2 + $0x18] sm:$0xff] %v1897_v21  ;;  %v1759_v40 = vsel %vm1606_vm0, %v1211_v50, -inf  ;;  %v1760_v16 = vsel %vm1606_vm0, %v1260_v4, -inf  ;;  %v1467_v59 = vpop.f32.mrf.mxu0  ;;  %v1516_v29 = vpop.f32.mrf.mxu1 }
 0x2ff   : > { %1906 = vst [vmem:[#allocation2 + $0x10] sm:$0xff] %v1898_v53  ;;  %v1781_v34 = vmax.f32 %v1780_v15, %v1759_v40  ;;  %v1796_v17 = vmax.f32 %v1795_v35, %v1760_v16  ;;  %v1468_v18 = vadd.f32 %v1467_v59, %v3370_v47  ;;  %v1517_v7 = vadd.f32 %v1516_v29, %v3373_v22 }
 0x300   : > { %1550 = vmatmul.bf16.vlgmr.msrb.gmra.mxu3 %v2960_v28  ;;  %v3381_v28 = vperm.slane %v2972_v63, 5 }
 0x301   : > { %v1895_v43 = vmax.f32 %v1887_v26, %v1781_v34  ;;  %v1896_v44 = vmax.f32 %v1888_v31, %v1796_v17  ;;  %v1645_v5 = vsel %vm1591_vm3, %v1468_v18, -inf  ;;  %v1646_v6 = vsel %vm1591_vm3, %v1517_v7, -inf }
 0x303   : > { %1903 = vst [vmem:[#allocation2 + $0x30] sm:$0xff] %v1895_v43  ;;  %v1369_v2 = vpop.f32.mrf.mxu2  ;;  %v1418_v20 = vpop.f32.mrf.mxu3 }
 0x304   : > { %1904 = vst [vmem:[#allocation2] sm:$0xff] %v1896_v44  ;;  %v1370_v63 = vadd.f32 %v1369_v2, %v3378_v33  ;;  %v1419_v58 = vadd.f32 %v1418_v20, %v3381_v28 }
 0x306   : > { %v1469_v36 = vpop.f32.mrf.mxu0  ;;  %v1518_v32 = vpop.f32.mrf.mxu1  ;;  %v1643_v51 = vsel %vm1591_vm3, %v1370_v63, -inf  ;;  %v1644_v25 = vsel %vm1591_vm3, %v1419_v58, -inf }
 0x307   : > { %v1470_v19 = vadd.f32 %v1469_v36, %v3370_v47  ;;  %v1519_v62 = vadd.f32 %v1518_v32, %v3373_v22 }
 0x309   : > { %v1653_v3 = vsel %vm1592_vm4, %v1470_v19, -inf  ;;  %v1654_v55 = vsel %vm1592_vm4, %v1519_v62, -inf }
 0x30a   : > { %v1857_v61 = vmax.f32 %v1645_v5, %v1653_v3  ;;  %v1872_v13 = vmax.f32 %v1646_v6, %v1654_v55 }
 0x30b   : > { %v1371_v39 = vpop.f32.mrf.mxu2  ;;  %v1420_v37 = vpop.f32.mrf.mxu3 }
 0x30c   : > { %v1372_v41 = vadd.f32 %v1371_v39, %v3378_v33  ;;  %v1421_v38 = vadd.f32 %v1420_v37, %v3381_v28 }
 0x30e   : > { %v1651_v8 = vsel %vm1592_vm4, %v1372_v41, -inf  ;;  %v1652_v23 = vsel %vm1592_vm4, %v1421_v38, -inf  ;;  %v1472_v10 = vpop.f32.mrf.mxu0  ;;  %v1521_v24 = vpop.f32.mrf.mxu1 }
 0x30f   : > { %v1827_v11 = vmax.f32 %v1643_v51, %v1651_v8  ;;  %v1842_v12 = vmax.f32 %v1644_v25, %v1652_v23  ;;  %v1473_v21 = vadd.f32 %v1472_v10, %v3370_v47  ;;  %v1522_v53 = vadd.f32 %v1521_v24, %v3373_v22 }
 0x311   : > { %v1661_v50 = vsel %vm1593_vm5, %v1473_v21, -inf  ;;  %v1662_v42 = vsel %vm1593_vm5, %v1522_v53, -inf }
 0x312   : > { %v1858_v4 = vmax.f32 %v1857_v61, %v1661_v50  ;;  %v3411_v15 = vmax.f32 %v1872_v13, %v1662_v42 }
 0x313   : > { %v1374_v35 = vpop.f32.mrf.mxu2  ;;  %v1423_v46 = vpop.f32.mrf.mxu3 }
 0x314   : > { %v1375_v40 = vadd.f32 %v1374_v35, %v3378_v33  ;;  %v1424_v26 = vadd.f32 %v1423_v46, %v3381_v28 }
 0x316   : > { %v1659_v16 = vsel %vm1593_vm5, %v1375_v40, -inf  ;;  %v1660_v31 = vsel %vm1593_vm5, %v1424_v26, -inf  ;;  %v1474_v59 = vpop.f32.mrf.mxu0  ;;  %v1523_v18 = vpop.f32.mrf.mxu1 }
 0x317   : > { %v1828_v29 = vmax.f32 %v1827_v11, %v1659_v16  ;;  %v1843_v34 = vmax.f32 %v1842_v12, %v1660_v31  ;;  %v1475_v17 = vadd.f32 %v1474_v59, %v3370_v47 }
 0x319   : > { %v1669_v43 = vsel %vm1594_vm6, %v1475_v17, -inf }
 0x31a   : > { %v1859_v44 = vmax.f32 %v1858_v4, %v1669_v43 }
 0x31b   : > { %v1376_v2 = vpop.f32.mrf.mxu2  ;;  %v1425_v20 = vpop.f32.mrf.mxu3 }
 0x31c   : > { %v1377_v7 = vadd.f32 %v1376_v2, %v3378_v33  ;;  %v1426_v36 = vadd.f32 %v1425_v20, %v3381_v28 }
 0x31e   : > { %v1667_v48 = vsel %vm1594_vm6, %v1377_v7, -inf  ;;  %v1668_v32 = vsel %vm1594_vm6, %v1426_v36, -inf  ;;  %v1477_v19 = vpop.f32.mrf.mxu0  ;;  %v1526_v39 = vpop.f32.mrf.mxu1 }
 0x31f   : > { %v1829_v62 = vmax.f32 %v1828_v29, %v1667_v48  ;;  %v1844_v5 = vmax.f32 %v1843_v34, %v1668_v32  ;;  %v1478_v6 = vadd.f32 %v1477_v19, %v3370_v47  ;;  %v1527_v20 = vadd.f32 %v1526_v39, %v3373_v22 }
 0x321   : > { %v1677_v3 = vsel %vm1595_vm7, %v1478_v6, -inf }
 0x322   : > { %v3431_v55 = vmax.f32 %v1859_v44, %v1677_v3  ;;  %v1524_v44 = vadd.f32 %v1523_v18, %v3373_v22 }
 0x323   : > { %v1379_v63 = vpop.f32.mrf.mxu2  ;;  %v1428_v58 = vpop.f32.mrf.mxu3 }
 0x324   : > { %v1380_v61 = vadd.f32 %v1379_v63, %v3378_v33  ;;  %v1429_v13 = vadd.f32 %v1428_v58, %v3381_v28  ;;  %v1670_v19 = vsel %vm1594_vm6, %v1524_v44, -inf }
 0x325   : > { %v1874_v3 = vmax.f32 %v3411_v15, %v1670_v19 }
 0x326   : > { %v1675_v37 = vsel %vm1595_vm7, %v1380_v61, -inf  ;;  %v1676_v41 = vsel %vm1595_vm7, %v1429_v13, -inf  ;;  %v1479_v38 = vpop.f32.mrf.mxu0  ;;  %v3443_v24 = vpop.f32.mrf.mxu1 }
 0x327   : > { %v3439_v51 = vmax.f32 %v1829_v62, %v1675_v37  ;;  %v3441_v25 = vmax.f32 %v1844_v5, %v1676_v41  ;;  %v1480_v7 = vadd.f32 %v1479_v38, %v3370_v47  ;;  %v1678_v62 = vsel %vm1595_vm7, %v1527_v20, -inf }
 0x328   : > { %v3482_v61 = vmax.f32 %v1874_v3, %v1678_v62 }
 0x329   : > { %v1685_v18 = vsel %vm1596_vm8, %v1480_v7, -inf }
 0x32a   : > { %v1861_v13 = vmax.f32 %v3431_v55, %v1685_v18 }
 0x32b   : > { %v1381_v8 = vpop.f32.mrf.mxu2  ;;  %v1430_v23 = vpop.f32.mrf.mxu3 }
 0x32c   : > { %v1382_v36 = vadd.f32 %v1381_v8, %v3378_v33  ;;  %v1431_v5 = vadd.f32 %v1430_v23, %v3381_v28  ;;  %v2607_v23 = vld [vmem:[%s2813_s25] sm:$0xff] }
 0x32e   : > { %v1482_v10 = vpop.f32.mrf.mxu0  ;;  %v3445_v53 = vpop.f32.mrf.mxu1  ;;  %v1683_v63 = vsel %vm1596_vm8, %v1382_v36, -inf  ;;  %v1684_v15 = vsel %vm1596_vm8, %v1431_v5, -inf }
 0x32f   : > { %v1483_v58 = vadd.f32 %v1482_v10, %v3370_v47  ;;  %v1831_v41 = vmax.f32 %v3439_v51, %v1683_v63  ;;  %v1846_v19 = vmax.f32 %v3441_v25, %v1684_v15 }
 0x333   : > { %v1384_v11 = vpop.f32.mrf.mxu2  ;;  %v1433_v12 = vpop.f32.mrf.mxu3 }
 0x334   : > { %v1385_v30 = vadd.f32 %v1384_v11, %v3378_v33  ;;  %v1434_v45 = vadd.f32 %v1433_v12, %v3381_v28  ;;  %v1693_v11 = vsel %vm1597_vm9, %v1483_v58, -inf }
 0x335   : > { %v1862_v18 = vmax.f32 %v1861_v13, %v1693_v11 }
 0x336   : > { %v1484_v21 = vpop.f32.mrf.mxu0  ;;  %v3447_v40 = vpop.f32.mrf.mxu1  ;;  %v1691_v55 = vsel %vm1597_vm9, %v1385_v30, -inf }
 0x337   : > { %v1485_v39 = vadd.f32 %v1484_v21, %v3370_v47  ;;  %v1832_v5 = vmax.f32 %v1831_v41, %v1691_v55 }
 0x339   : > { %v1701_v62 = vsel %vm1598_vm10, %v1485_v39, -inf }
 0x33b   : > { %v1386_v50 = vpop.f32.mrf.mxu2  ;;  %v1435_v42 = vpop.f32.mrf.mxu3 }
 0x33c   : > { %v1387_v38 = vadd.f32 %v1386_v50, %v3378_v33  ;;  %v1436_v12 = vadd.f32 %v1435_v42, %v3381_v28  ;;  %v1692_v50 = vsel %vm1597_vm9, %v1434_v45, -inf }
 0x33d   : > { %v1847_v30 = vmax.f32 %v1846_v19, %v1692_v50 }
 0x33e   : > { %v1487_v4 = vpop.f32.mrf.mxu0  ;;  %v3451_v59 = vpop.f32.mrf.mxu1  ;;  %v1699_v3 = vsel %vm1598_vm10, %v1387_v38, -inf }
 0x33f   : > { %v1488_v21 = vadd.f32 %v1487_v4, %v3370_v47  ;;  %v1833_v41 = vmax.f32 %v1832_v5, %v1699_v3  ;;  %v1537_v54 = vadd.f32 %v3451_v59, %v3373_v22 }
 0x341   : > { %v1709_v25 = vsel %vm1599_vm11, %v1488_v21, -inf }
 0x343   : > { %v1389_v35 = vpop.f32.mrf.mxu2  ;;  %v1438_v46 = vpop.f32.mrf.mxu3 }
 0x344   : > { %v1390_v20 = vadd.f32 %v1389_v35, %v3378_v33  ;;  %v1439_v42 = vadd.f32 %v1438_v46, %v3381_v28  ;;  %v1700_v35 = vsel %vm1598_vm10, %v1436_v12, -inf  ;;  %v1863_v46 = vmax.f32 %v1862_v18, %v1701_v62 }
 0x346   : > { %v1489_v26 = vpop.f32.mrf.mxu0  ;;  %v3458_v2 = vpop.f32.mrf.mxu1  ;;  %v1708_v15 = vsel %vm1599_vm11, %v1439_v42, -inf }
 0x347   : > { %v1490_v4 = vadd.f32 %v1489_v26, %v3370_v47  ;;  %v1707_v26 = vsel %vm1599_vm11, %v1390_v20, -inf }
 0x348   : > { %v1834_v12 = vmax.f32 %v1833_v41, %v1707_v26 }
 0x349   : > { %v1717_v38 = vsel %vm1600_vm12, %v1490_v4, -inf }
 0x34b   : > { %v1391_v16 = vpop.f32.mrf.mxu2  ;;  %v3449_v31 = vpop.f32.mrf.mxu3 }
 0x34c   : > { %v1392_v45 = vadd.f32 %v1391_v16, %v3378_v33  ;;  %v1864_v16 = vmax.f32 %v1863_v46, %v1709_v25  ;;  %v1441_v11 = vadd.f32 %v3449_v31, %v3381_v28 }
 0x34e   : > { %v1492_v29 = vpop.f32.mrf.mxu0  ;;  %v3490_v8 = vpop.f32.mrf.mxu1  ;;  %v1715_v21 = vsel %vm1600_vm12, %v1392_v45, -inf  ;;  %v1865_v19 = vmax.f32 %v1864_v16, %v1717_v38 }
 0x34f   : > { %v1493_v13 = vadd.f32 %v1492_v29, %v3370_v47  ;;  %v1835_v3 = vmax.f32 %v1834_v12, %v1715_v21  ;;  %v1542_v0 = vadd.f32 %v3490_v8, %v3373_v22 }
 0x351   : > { %v1725_v31 = vsel %vm1601_vm13, %v1493_v13, -inf }
 0x352   : > { %v1866_v46 = vmax.f32 %v1865_v19, %v1725_v31 }
 0x353   : > { %v3453_v34 = vpop.f32.mrf.mxu2  ;;  %v3455_v17 = vpop.f32.mrf.mxu3 }
 0x355   : > { %v457_v37 = vpop.permute.xlu1 %456 }
 0x356   : > { %v1494_v43 = vpop.f32.mrf.mxu0  ;;  %v459_v10 = vmul.f32 %v2607_v23, %v457_v37  ;;  %v3523_v37 = vadd.f32 %v3443_v24, %v3373_v22  ;;  %v3535_v24 = vadd.f32 %v3445_v53, %v3373_v22  ;;  %v3543_v42 = vpop.f32.mrf.mxu1 }
 0x357   : > { %v1495_v55 = vadd.f32 %v1494_v43, %v3370_v47  ;;  %v1395_v43 = vadd.f32 %v3453_v34, %v3378_v33  ;;  %v1544_v1 = vadd.f32 %v3543_v42, %v3373_v22 }
 0x358   : > { %v461_v7 = vrot.slane %v459_v10, 1  ;;  %v464_v36 = vrot.slane %v459_v10, 2 }
 0x359   : > { %v1723_v26 = vsel %vm1601_vm13, %v1395_v43, -inf }
 0x35a   : > { %v463_v58 = vadd.f32 %v461_v7, %v459_v10  ;;  %v1848_v10 = vmax.f32 %v1847_v30, %v1700_v35  ;;  %v1444_v30 = vadd.f32 %v3455_v17, %v3381_v28  ;;  %v1733_v35 = vsel %vm1602_vm14, %v1495_v55, -inf }
 0x35b   : > { %v3463_v48 = vpop.f32.mrf.mxu2  ;;  %v3465_v32 = vpop.f32.mrf.mxu3 }
 0x35c   : > { %v466_v39 = vadd.f32 %v464_v36, %v463_v58  ;;  %v1849_v36 = vmax.f32 %v1848_v10, %v1708_v15  ;;  %v444_v62 = vpop.permute.xlu0 %443  ;;  %v1716_v58 = vsel %vm1600_vm12, %v1441_v11, -inf  ;;  %v1397_v25 = vadd.f32 %v3463_v48, %v3378_v33 }
 0x35d   : > { %v446_v5 = vmul.f32 %v2607_v23, %v444_v62 }
 0x35e   : > { %v3474_v6 = vpop.f32.mrf.mxu0  ;;  %467 = vst [vmem:[%s2823_s14 + $0x1] sm:$0x1] %v466_v39  ;;  %v1850_v16 = vmax.f32 %v1849_v36, %v1716_v58  ;;  %v1731_v11 = vsel %vm1602_vm14, %v1397_v25, -inf  ;;  %v1836_v36 = vmax.f32 %v1835_v3, %v1723_v26  ;;  %v1893_v26 = vld [vmem:[#allocation2 + $0x28] sm:$0xff] }
 0x35f   : > { %v470_v29 = vpop.permute.xlu1 %469  ;;  %v1498_v53 = vadd.f32 %v3474_v6, %v3370_v47  ;;  %v1446_v6 = vadd.f32 %v3465_v32, %v3381_v28  ;;  %v448_v13 = vrot.slane %v446_v5, 1  ;;  %v451_v17 = vrot.slane %v446_v5, 2 }
 0x360   : > { %v472_v7 = vmul.f32 %v2607_v23, %v470_v29  ;;  %v1724_v32 = vsel %vm1601_vm13, %v1444_v30, -inf  ;;  %v1837_v3 = vmax.f32 %v1836_v36, %v1731_v11  ;;  %v1546_v30 = vpop.f32.mrf.mxu1  ;;  %v1726_v36 = vsel %vm1601_vm13, %v1542_v0, -inf }
 0x361   : > { %v1741_v39 = vsel %vm1603_vm15, %v1498_v53, -inf  ;;  %v450_v10 = vadd.f32 %v448_v13, %v446_v5  ;;  %v1732_v55 = vsel %vm1602_vm14, %v1446_v6, -inf  ;;  %v1851_v31 = vmax.f32 %v1850_v16, %v1724_v32 }
 0x362   : > { %v474_v4 = vrot.slane %v472_v7, 1  ;;  %v477_v18 = vrot.slane %v472_v7, 2  ;;  %v1539_v32 = vadd.f32 %v3458_v2, %v3373_v22 }
 0x363   : > { %v3499_v51 = vpop.f32.mrf.mxu2  ;;  %v3501_v44 = vpop.f32.mrf.mxu3  ;;  %v453_v19 = vadd.f32 %v451_v17, %v450_v10  ;;  %v1852_v58 = vmax.f32 %v1851_v31, %v1732_v55  ;;  %v1547_v31 = vadd.f32 %v1546_v30, %v3373_v22 }
 0x364   : > { %v476_v23 = vadd.f32 %v474_v4, %v472_v7  ;;  %v1400_v41 = vadd.f32 %v3499_v51, %v3378_v33  ;;  %v1449_v38 = vadd.f32 %v3501_v44, %v3381_v28 }
 0x365   : > { %454 = vst [vmem:[%s2823_s14] sm:$0x1] %v453_v19  ;;  %v1742_v42 = vsel %vm1603_vm15, %v1547_v31, -inf }
 0x366   : > { %v1499_v63 = vpop.f32.mrf.mxu0  ;;  %v479_v15 = vadd.f32 %v477_v18, %v476_v23  ;;  %v1739_v43 = vsel %vm1603_vm15, %v1400_v41, -inf  ;;  %v1740_v53 = vsel %vm1603_vm15, %v1449_v38, -inf }
 0x367   : > { %v1500_v45 = vadd.f32 %v1499_v63, %v3370_v47  ;;  %v1867_v63 = vmax.f32 %v1866_v46, %v1733_v35  ;;  %v1838_v23 = vmax.f32 %v1837_v3, %v1739_v43  ;;  %v1853_v46 = vmax.f32 %v1852_v58, %v1740_v53 }
 0x368   : > { %480 = vst [vmem:[%s2823_s14 + $0x2] sm:$0x1] %v479_v15  ;;  %v1548_v8 = vpop.f32.mrf.mxu1  ;;  %v1734_v53 = vsel %vm1602_vm14, %v1544_v1, -inf }
 0x369   : > { %v1749_v51 = vsel %vm1604_vm1, %v1500_v45, -inf  ;;  %v1868_v21 = vmax.f32 %v1867_v63, %v1741_v39  ;;  %v1549_v9 = vadd.f32 %v1548_v8, %v3373_v22 }
 0x36b   : > { %v1401_v50 = vpop.f32.mrf.mxu2  ;;  %v1450_v20 = vpop.f32.mrf.mxu3  ;;  %v1869_v4 = vmax.f32 %v1868_v21, %v1749_v51  ;;  %v1891_v51 = vld [vmem:[#allocation2 + $0x8] sm:$0xff]  ;;  %v1718_v21 = vsel %vm1600_vm12, %v1539_v32, -inf  ;;  %v1750_v14 = vsel %vm1604_vm1, %v1549_v9, -inf }
 0x36c   : > { %v1402_v7 = vadd.f32 %v1401_v50, %v3378_v33  ;;  %v1451_v44 = vadd.f32 %v1450_v20, %v3381_v28  ;;  %v1534_v20 = vadd.f32 %v3447_v40, %v3373_v22  ;;  %v1694_v40 = vsel %vm1597_vm9, %v3535_v24, -inf }
 0x36e   : > { %v1502_v34 = vpop.f32.mrf.mxu0  ;;  %v1747_v25 = vsel %vm1604_vm1, %v1402_v7, -inf  ;;  %v1748_v6 = vsel %vm1604_vm1, %v1451_v44, -inf  ;;  %v1702_v57 = vsel %vm1598_vm10, %v1534_v20, -inf }
 0x36f   : > { %v1503_v48 = vadd.f32 %v1502_v34, %v3370_v47  ;;  %v1686_v34 = vsel %vm1596_vm8, %v3523_v37, -inf  ;;  %v1839_v24 = vmax.f32 %v1838_v23, %v1747_v25  ;;  %v1854_v41 = vmax.f32 %v1853_v46, %v1748_v6 }
 0x370   : > { %v1876_v39 = vmax.f32 %v3482_v61, %v1686_v34  ;;  %v1710_v61 = vsel %vm1599_vm11, %v1537_v54, -inf }
 0x371   : > { %v1757_v62 = vsel %vm1605_vm2, %v1503_v48, -inf }
 0x372   : > { %v1870_v45 = vmax.f32 %v1869_v4, %v1757_v62  ;;  %v1877_v10 = vmax.f32 %v1876_v39, %v1694_v40 }
 0x373   : > { %v1404_v29 = vpop.f32.mrf.mxu2  ;;  %v1453_v12 = vpop.f32.mrf.mxu3 }
 0x374   : > { %v1405_v18 = vadd.f32 %v1404_v29, %v3378_v33  ;;  %v1454_v5 = vadd.f32 %v1453_v12, %v3381_v28  ;;  %v1878_v29 = vmax.f32 %v1877_v10, %v1702_v57 }
 0x376   : > { %v1504_v50 = vpop.f32.mrf.mxu0  ;;  %v1755_v37 = vsel %vm1605_vm2, %v1405_v18, -inf  ;;  %v1756_v13 = vsel %vm1605_vm2, %v1454_v5, -inf  ;;  %v1879_v7 = vmax.f32 %v1878_v29, %v1710_v61 }
 0x377   : > { %v1505_v35 = vadd.f32 %v1504_v50, %v3370_v47  ;;  %v1840_v16 = vmax.f32 %v1839_v24, %v1755_v37  ;;  %v1855_v11 = vmax.f32 %v1854_v41, %v1756_v13 }
 0x378   : > { %v1880_v43 = vmax.f32 %v1879_v7, %v1718_v21 }
 0x379   : > { %v1765_v47 = vsel %vm1606_vm0, %v1505_v35, -inf }
 0x37a   : > { %v1871_v17 = vmax.f32 %v1870_v45, %v1765_v47  ;;  %v1881_v4 = vmax.f32 %v1880_v43, %v1726_v36 }
 0x37b   : > { %v1406_v48 = vpop.f32.mrf.mxu2  ;;  %v1455_v15 = vpop.f32.mrf.mxu3 }
 0x37c   : > { %v1901_v59 = vmax.f32 %v1893_v26, %v1871_v17  ;;  %v1407_v63 = vadd.f32 %v1406_v48, %v3378_v33  ;;  %v1456_v38 = vadd.f32 %v1455_v15, %v3381_v28  ;;  %v1892_v33 = vld [vmem:[#allocation2 + $0x20] sm:$0xff]  ;;  %v1882_v5 = vmax.f32 %v1881_v4, %v1734_v53 }
 0x37e   : > { %1909 = vst [vmem:[#allocation2 + $0x28] sm:$0xff] %v1901_v59  ;;  %v1763_v55 = vsel %vm1606_vm0, %v1407_v63, -inf  ;;  %v1764_v2 = vsel %vm1606_vm0, %v1456_v38, -inf  ;;  %v1883_v50 = vmax.f32 %v1882_v5, %v1742_v42 }
 0x37f   : > { %v1841_v28 = vmax.f32 %v1840_v16, %v1763_v55  ;;  %v1856_v12 = vmax.f32 %v1855_v11, %v1764_v2 }
 0x380   : > { %v1884_v3 = vmax.f32 %v1883_v50, %v1750_v14 }
 0x381   : > { %v1899_v44 = vmax.f32 %v1891_v51, %v1841_v28  ;;  %v1900_v19 = vmax.f32 %v1892_v33, %v1856_v12 }
 0x383   : > { %1907 = vst [vmem:[#allocation2 + $0x8] sm:$0xff] %v1899_v44  ;;  %v1551_v62 = vpop.f32.mrf.mxu3 }
 0x384   : > { %1908 = vst [vmem:[#allocation2 + $0x20] sm:$0xff] %v1900_v19  ;;  %v1552_v18 = vadd.f32 %v1551_v62, %v3373_v22 }
 0x386   : > { %v1758_v20 = vsel %vm1605_vm2, %v1552_v18, -inf }
 0x387   : > { %v1885_v30 = vmax.f32 %v1884_v3, %v1758_v20 }
 0x38b   : > { %v1553_v49 = vpop.f32.mrf.mxu3 }
 0x38c   : > { %v1554_v58 = vadd.f32 %v1553_v49, %v3373_v22 }
 0x38e   : > { %v1766_v35 = vsel %vm1606_vm0, %v1554_v58, -inf }
 0x38f   : > { %v1886_v34 = vmax.f32 %v1885_v30, %v1766_v35  ;;  %1914 = sbr.rel (%p2459_p11) target bundleno = 941 (0x3ad), region = 64 }
 0x391   : > { %v1902_v25 = vmax.f32 %v1894_v56, %v1886_v34 }
 0x393   : > { %1910 = vst [vmem:[#allocation2 + $0x38] sm:$0xff] %v1902_v25 }
 0x394   : > { %v1915_v27 = vld [vmem:[#allocation2 + $0x30] sm:$0xff]  ;;  %v1916_v6 = vld [vmem:[#allocation2] sm:$0xff]  ;;  %v1917_v45 = vld [vmem:[#allocation2 + $0x18] sm:$0xff]  ;;  %vm1986_vm0 = vcmask 1040384   ;;  %vm1988_vm3 = vcmask 1042434   ;;  %vm1990_vm4 = vcmask 1041408  }
 0x395   : > { %v1918_v52 = vld [vmem:[#allocation2 + $0x10] sm:$0xff]  ;;  %v1919_v40 = vld [vmem:[#allocation2 + $0x8] sm:$0xff]  ;;  %v1920_v23 = vld [vmem:[#allocation2 + $0x20] sm:$0xff]  ;;  %v1923_v46 = vrot.slane %v1915_v27, 4  ;;  %v1929_v47 = vrot.slane %v1916_v6, 4  ;;  %v1935_v22 = vrot.slane %v1917_v45, 4 }
 0x396   : > { %v1921_v26 = vld [vmem:[#allocation2 + $0x28] sm:$0xff]  ;;  %v1941_v60 = vrot.slane %v1918_v52, 4  ;;  %v1947_v37 = vrot.slane %v1919_v40, 4  ;;  %v1953_v13 = vrot.slane %v1920_v23, 4  ;;  %vm1992_vm5 = vcmask 1044484  }
 0x397   : > { %v1924_v17 = vmax.f32 %v1915_v27, %v1923_v46  ;;  %v1930_v39 = vmax.f32 %v1916_v6, %v1929_v47  ;;  %v1936_v57 = vmax.f32 %v1917_v45, %v1935_v22  ;;  %v1959_v24 = vrot.slane %v1921_v26, 4 }
 0x398   : > { %v1942_v41 = vmax.f32 %v1918_v52, %v1941_v60  ;;  %v1948_v48 = vmax.f32 %v1919_v40, %v1947_v37  ;;  %v1954_v15 = vmax.f32 %v1920_v23, %v1953_v13  ;;  %vm1994_vm6 = vcmask 1046534  }
 0x399   : > { %v1925_v59 = vrot.slane %v1924_v17, 2  ;;  %v1931_v63 = vrot.slane %v1930_v39, 2  ;;  %v1937_v38 = vrot.slane %v1936_v57, 2  ;;  %v1960_v10 = vmax.f32 %v1921_v26, %v1959_v24 }
 0x39a   : > { %v1922_v54 = vld [vmem:[#allocation2 + $0x38] sm:$0xff]  ;;  %v1943_v16 = vrot.slane %v1942_v41, 2  ;;  %v1949_v11 = vrot.slane %v1948_v48, 2  ;;  %v1955_v61 = vrot.slane %v1954_v15, 2  ;;  %vm1996_vm7 = vcmask 1045508  }
 0x39b   : > { %v1965_v32 = vrot.slane %v1922_v54, 4  ;;  %v1926_v55 = vmax.f32 %v1924_v17, %v1925_v59  ;;  %v1932_v51 = vmax.f32 %v1930_v39, %v1931_v63  ;;  %v1938_v2 = vmax.f32 %v1936_v57, %v1937_v38 }
 0x39c   : > { %v1961_v33 = vrot.slane %v1960_v10, 2  ;;  %v1944_v29 = vmax.f32 %v1942_v41, %v1943_v16  ;;  %v1950_v28 = vmax.f32 %v1948_v48, %v1949_v11  ;;  %v1956_v12 = vmax.f32 %v1954_v15, %v1955_v61 }
 0x39d   : > { %v1966_v0 = vmax.f32 %v1922_v54, %v1965_v32  ;;  %v1927_v1 = vrot.slane %v1926_v55, 1  ;;  %v1933_v7 = vrot.slane %v1932_v51, 1  ;;  %v1939_v8 = vrot.slane %v1938_v2, 1 }
 0x39e   : > { %v1962_v44 = vmax.f32 %v1960_v10, %v1961_v33  ;;  %v1945_v19 = vrot.slane %v1944_v29, 1  ;;  %v1951_v36 = vrot.slane %v1950_v28, 1  ;;  %v1957_v31 = vrot.slane %v1956_v12, 1 }
 0x39f   : > { %v1967_v21 = vrot.slane %v1966_v0, 2  ;;  %v1928_v62 = vmax.f32 %v1926_v55, %v1927_v1  ;;  %v1934_v53 = vmax.f32 %v1932_v51, %v1933_v7  ;;  %v1940_v9 = vmax.f32 %v1938_v2, %v1939_v8 }
 0x3a0   : > { %v1963_v4 = vrot.slane %v1962_v44, 1  ;;  %v1946_v42 = vmax.f32 %v1944_v29, %v1945_v19  ;;  %v1952_v18 = vmax.f32 %v1950_v28, %v1951_v36  ;;  %v1958_v5 = vmax.f32 %v1956_v12, %v1957_v31 }
 0x3a1   : > { %v1968_v43 = vmax.f32 %v1966_v0, %v1967_v21  ;;  %v1979_v20 = vrot.slane %v1934_v53, 7  ;;  %v1980_v3 = vrot.slane %v1940_v9, 6  ;;  %vm3683_vm8 = vcmask 1043456  }
 0x3a2   : > { %v1964_v50 = vmax.f32 %v1962_v44, %v1963_v4  ;;  %v1981_v58 = vrot.slane %v1946_v42, 5  ;;  %v1982_v30 = vrot.slane %v1952_v18, 4  ;;  %v1983_v35 = vrot.slane %v1958_v5, 3 }
 0x3a3   : > { %v1969_v14 = vrot.slane %v1968_v43, 1  ;;  %v1987_v34 = vsel %vm1986_vm0, %v1928_v62, %v1979_v20 }
 0x3a4   : > { %v1984_v56 = vrot.slane %v1964_v50, 2  ;;  %v1989_v27 = vsel %vm1988_vm3, %v1980_v3, %v1981_v58  ;;  %v1993_v6 = vsel %vm1992_vm5, %v1982_v30, %v1983_v35 }
 0x3a5   : > { %v1970_v49 = vmax.f32 %v1968_v43, %v1969_v14  ;;  %v1991_v45 = vsel %vm1990_vm4, %v1987_v34, %v1989_v27 }
 0x3a7   : > { %v1985_v25 = vrot.slane %v1970_v49, 1 }
 0x3a9   : > { %v1995_v52 = vsel %vm1994_vm6, %v1984_v56, %v1985_v25 }
 0x3aa   : > { %v1997_v40 = vsel %vm1996_vm7, %v1993_v6, %v1995_v52 }
 0x3ab   : > { %v1998_v23 = vsel %vm3683_vm8, %v1991_v45, %v1997_v40 }
 0x3ac   : > { %2000 = vst [vmem:[%s2818_s15] sm:$0xff] %v1998_v23 }
 0x3ad PF: > { %s21_s13 = sadd.s32 1, %s2680_s13   ;;  %s3684_s10 = sld [smem:[#allocation6_spill]] }
 0x3ae   : > { %p18_p12 = scmp.ge.s32.totalorder %s21_s13, 10   ;;  %s3685_s27 = sld [smem:[#allocation7_spill]] }
 0x3af   : > { %s3686_s12 = sld [smem:[#allocation8_spill]]  ;;  %s3687_s30 = smov %s2672_s11 }
 0x3b0   :  { %20 = sbr.rel (!%p18_p12) target bundleno = 5 (0x5), region = 113 }
 0x3b4   : > { %s3688_s11 = smov %s3685_s27 }
 0x3b5   :  { %2042 = vsyncpa [#allocation4], 1 }
 0x3b6   :  { %2044 = vsyncpa [#allocation4 + $0x1], 1 }

// kernel: pointnet_cls_forward.2
= control target key start
LH: loop header
LB: loop body
LE: loop exit
PB: predicated region body
PF: predicated region fallthrough
CT: control target
= control target key end

     0   :  { %12 = vsyncpa [#allocation4], 0  ;;  %s2621_s24 = smov 0   ;;  %s2623_s25 = smov 0   ;;  %s3493_s0 = inlined_call_operand.vmem [shape: f32[2,8,512], index: 0, kind: input, shape index: {}]   ;;  %s3494_s1 = inlined_call_operand.vmem [shape: bf16[8,64], index: 1, kind: input, shape index: {}]   ;;  %s3495_s2 = inlined_call_operand.vmem [shape: f32[1,64], index: 2, kind: input, shape index: {}]   ;;  %s3496_s3 = inlined_call_operand.vmem [shape: bf16[64,128], index: 3, kind: input, shape index: {}]   ;;  %s3497_s4 = inlined_call_operand.vmem [shape: f32[1,128], index: 4, kind: input, shape index: {}]   ;;  %s3498_s5 = inlined_call_operand.hbm [shape: bf16[128,1024], index: 5, kind: input, shape index: {}]   ;;  %s3499_s6 = inlined_call_operand.vmem [shape: f32[1,1024], index: 6, kind: input, shape index: {}]   ;;  %s3500_s7 = inlined_call_operand.vmem [shape: f32[2,1,1024], index: 7, kind: output, shape index: {}]  }
   0x1   :  { %s2625_s26 = smov 0   ;;  %s2627_s27 = smov 0  }
   0x2   :  { %s2629_s28 = smov 0  }
   0x3 LB: > { %s2062_s29 = sadd.s32 4294967295, %s2575_s28   ;;  %s27_s30 = sadd.s32 1, %s2567_s26  ;;  %s2575_s28 = sphi %s2629_s28, %s18_s28   ;;  %s2571_s27 = sphi %s2627_s27, %s3508_s27   ;;  %s2567_s26 = sphi %s2625_s26, %s3507_s26   ;;  %s2563_s25 = sphi %s2623_s25, %s3506_s25   ;;  %s2559_s24 = sphi %s2621_s24, %s3505_s24  }
   0x4   : > { %p28_p0 = scmp.ge.s32.totalorder %s27_s30, 4  ;;  %s30_s8 = sadd.s32 1, %s2571_s27 }
   0x5   : > { %p2064_p1 = scmp.ge.s32.totalorder %s2575_s28, 1  ;;  %p215_p2 = scmp.lt.s32.totalorder %s2575_s28, 9 }
   0x6   : > { %s3510_s30 = smov (%p28_p0, %s27_s30), 0  ;;  %s3512_s8 = smov (!%p28_p0, %s30_s8), %s2571_s27 }
   0x7   : > { %p2654_p3 = pnand %p2064_p1, %p215_p2  ;;  %p32_p4 = scmp.ge.s32.totalorder %s3512_s8, 2 }
   0x8   : > { %p2658_p5 = scmp.eq.s32.totalorder %s2062_s29, 0  ;;  %s238_s13 = sshll.u32 %s3498_s5, 4  ;;  %s239_s13 = int_to_ptr.hbm [resolvable:$true] %s238_s13 }
   0x9   : > { %p2450_p6 = pneg %p2654_p3  ;;  %s3514_s8 = smov (%p32_p4, %s3512_s8), 0 }
   0xa   : > { %s2577_s14 = smov [#allocation3]   ;;  %s2578_s16 = smov 512  }
   0xb   : > { %s240_s15 = sshll.u32 %s2577_s14, 4  ;;  %p2451_p7 = pnand %p2658_p5, %p2450_p6  ;;  %s241_s15 = int_to_ptr.vmem [resolvable:$true] %s240_s15 }
   0xc   : > { %s2579_s17 = smov 32   ;;  %270 = sbr.rel (%p2654_p3) target bundleno = 937 (0x3a9), region = 48 }
   0xd   : > { %2453 = dma.hbm_to_vmem [thread:$0]  (!%p2451_p7), %s239_s13, 8192, %s241_s15, [#allocation4], %s2578_s16, %s2578_s16, %s2579_s17  }
  0x11   : > { %2554 = dma.done.wait (%p2658_p5), [#allocation4], 8192  }
  0x12   : > { %2556 = vsyncadd (%p2658_p5), [#allocation4], 4294959104  ;;  %p305_p8 = scmp.lt.s32.totalorder %s2563_s25, 1  ;;  %p307_p9 = scmp.lt.s32.totalorder %s2559_s24, 3 }
  0x13   : > { %p2072_p10 = scmp.ne.s32.totalorder %s2559_s24, 0 }
  0x14   : > { %s3516_s25 = smov (!%p305_p8, %s2563_s25), 1 }
  0x15   : > { %s308_s18 = scalar_select %p307_p9, %s2559_s24, 3 }
  0x16   : > { %s2069_s19 = sshll.u32 %s3516_s25, 2  ;;  %s2071_s20 = sshll.u32 %s3516_s25, 3 }
  0x17   : > { %s310_s21 = sadd.s32 %s2069_s19, %s308_s18  ;;  %s2684_s29 = scalar_lea.vmem %s3500_s7, %s2071_s20 }
  0x18   : > { %s2070_s9 = sshll.u32 %s310_s21, 3  ;;  %321 = sbr.rel (%p2072_p10) target bundleno = 38 (0x26), region = 56 }
  0x19   : > { %s312_s12 = scalar_lea.vmem %s3493_s0, %s2070_s9 }
  0x1d   : > { %v2580_v0 = vmov -inf  }
  0x1e   : > { %322 = vst [vmem:[#allocation2 + $0x30] sm:$0xff] %v2580_v0 }
  0x1f   : > { %323 = vst [vmem:[#allocation2] sm:$0xff] %v2580_v0 }
  0x20   : > { %324 = vst [vmem:[#allocation2 + $0x18] sm:$0xff] %v2580_v0 }
  0x21   : > { %325 = vst [vmem:[#allocation2 + $0x10] sm:$0xff] %v2580_v0 }
  0x22   : > { %326 = vst [vmem:[#allocation2 + $0x8] sm:$0xff] %v2580_v0 }
  0x23   : > { %327 = vst [vmem:[#allocation2 + $0x20] sm:$0xff] %v2580_v0 }
  0x24   : > { %328 = vst [vmem:[#allocation2 + $0x28] sm:$0xff] %v2580_v0 }
  0x25   : > { %329 = vst [vmem:[#allocation2 + $0x38] sm:$0xff] %v2580_v0 }
  0x26 PF: > { %v330_v1 = vld [vmem:[%s312_s12] sm:$0xff]  ;;  %vm3501_vm0 = vcmask 1043456   ;;  %vm376_vm1 = vcmask 64512   ;;  %v2368_v23 = vld [vmem:[%s3496_s3 + $0x18] sm:$0xff]  ;;  %v2367_v26 = vld [vmem:[%s3496_s3 + $0x10] sm:$0xff]  ;;  %vm579_vm2 = vcmask 523264  }
  0x27   : > { %331 = vxpose.xlu0.b32.start.end [1/1] (short) %v330_v1, 128  ;;  %v363_v2 = vld [vmem:[%s3494_s1] sm:$0xf]  ;;  %608 = vmatpush.bf16.msra.mxu1 %v2368_v23  ;;  %v2366_v27 = vld [vmem:[%s3496_s3 + $0x8] sm:$0xff]  ;;  %s2361_s25 = sshll.u32 %s2559_s24, 7  ;;  %p2362_p11 = scmp.ne.s32.totalorder %s2559_s24, 3 }
  0x28   : > { %v403_v3 = vsel %vm3501_vm0, %v363_v2, 0  ;;  %2434 = vmatpush.bf16.msra.mxu2 %v2368_v23  ;;  %v2365_v29 = vld [vmem:[%s3496_s3] sm:$0xff]  ;;  %v2339_v1 = vld [vmem:[#allocation3 + $0x1c8] sm:$0xf] }
  0x29   : > { %412 = vmatpush.bf16.msra.mxu0 %v403_v3  ;;  %2433 = vmatpush.bf16.msra.mxu3 %v403_v3  ;;  %v2717_v33 = vld [vmem:[%s3495_s2] ss:$0 sm:$0xff]  ;;  %v2430_v2 = vld [vmem:[#allocation3 + $0x1e4] sm:$0xf0] }
  0x2a   : > { %v2340_v3 = vor.u32 %v2430_v2, %v2339_v1  ;;  %v2205_v1 = vld [vmem:[#allocation3 + $0xe0] sm:$0xf0]  ;;  %v2211_v2 = vld [vmem:[#allocation3 + $0xc8] sm:$0xf] }
  0x2b   : > { %609 = vmatpush.bf16.msra.mxu1 %v2367_v26 }
  0x2c   : > { %2435 = vmatpush.bf16.msra.mxu2 %v2367_v26  ;;  %v2418_v26 = vld [vmem:[#allocation3 + $0x18c] sm:$0xf] }
  0x2d   : > { %1112 = vmatpush.bf16.msrb.mxu0 %v2340_v3 }
  0x2f   : > { %610 = vmatpush.bf16.msra.mxu1 %v2366_v27 }
  0x30   : > { %2436 = vmatpush.bf16.msra.mxu2 %v2366_v27 }
  0x33   : > { %611 = vmatpush.bf16.msra.mxu1 %v2365_v29 }
  0x34   : > { %2437 = vmatpush.bf16.msra.mxu2 %v2365_v29  ;;  %v2309_v29 = vld [vmem:[#allocation3 + $0x1a8] sm:$0xf0] }
  0xcb   : > { %v347_v4 = vpop.trf.xlu0 }
  0xd3   : > { %v348_v5 = vpop.trf.xlu0 }
  0xd4   : > { %v365_v6 = vpack.c.bf16 %v348_v5, %v347_v4 }
  0xd6   : > { %2073 = vmatmul.msk.bf16.vlgmr.msra.gmra.mxu0 %vm376_vm1, %v365_v6 }
  0xdb   : > { %v349_v7 = vpop.trf.xlu0 }
  0xe3   : > { %v350_v8 = vpop.trf.xlu0 }
  0xe4   : > { %v366_v9 = vpack.c.bf16 %v350_v8, %v349_v7  ;;  %v2425_v8 = vld [vmem:[#allocation3 + $0x1c4] sm:$0xf] }
  0xe6   : > { %2074 = vmatmul.msk.bf16.gmra.mxu0 %vm376_vm1, %v366_v9  ;;  %v2333_v9 = vld [vmem:[#allocation3 + $0x1e0] sm:$0xf0] }
  0xeb   : > { %v351_v10 = vpop.trf.xlu0 }
  0xf3   : > { %v352_v11 = vpop.trf.xlu0 }
  0xf4   : > { %v367_v12 = vpack.c.bf16 %v352_v11, %v351_v10  ;;  %v2336_v10 = vor.u32 %v2425_v8, %v2333_v9  ;;  %v2307_v11 = vld [vmem:[#allocation3 + $0x188] sm:$0xf] }
  0xf6   : > { %2075 = vmatmul.msk.bf16.gmra.mxu0 %vm376_vm1, %v367_v12  ;;  %v2422_v12 = vld [vmem:[#allocation3 + $0x1a4] sm:$0xf0]  ;;  %1063 = vmatpush.bf16.msrb.mxu3 %v2336_v10  ;;  %v2171_v10 = vld [vmem:[#allocation3 + $0x80] sm:$0xf] }
  0xfb   : > { %v353_v13 = vpop.trf.xlu0 }
 0x103   : > { %v354_v14 = vpop.trf.xlu0 }
 0x104   : > { %v368_v15 = vpack.c.bf16 %v354_v14, %v353_v13  ;;  %v2426_v13 = vld [vmem:[#allocation3 + $0x1cc] sm:$0xf]  ;;  %v2308_v14 = vor.u32 %v2422_v12, %v2307_v11  ;;  %v2389_v11 = vld [vmem:[#allocation3 + $0x9c] sm:$0xf0]  ;;  %v2385_v12 = vld [vmem:[#allocation3 + $0x84] sm:$0xf] }
 0x106   : > { %2076 = vmatmul.msk.bf16.gmra.mxu0 %vm376_vm1, %v368_v15  ;;  %v2341_v15 = vld [vmem:[#allocation3 + $0x1e8] sm:$0xf0] }
 0x107   : > { %1113 = vmatpush.bf16.msrb.mxu0 %v2308_v14  ;;  %v2172_v14 = vor.u32 %v2389_v11, %v2171_v10 }
 0x10b   : > { %v355_v16 = vpop.trf.xlu0 }
 0x113   : > { %v356_v17 = vpop.trf.xlu0 }
 0x114   : > { %v369_v18 = vpack.c.bf16 %v356_v17, %v355_v16  ;;  %v2331_v16 = vld [vmem:[#allocation3 + $0x1c0] sm:$0xf] }
 0x115   : > { %v2429_v17 = vld [vmem:[#allocation3 + $0x1dc] sm:$0xf0] }
 0x116   : > { %2077 = vmatmul.msk.bf16.gmra.mxu0 %vm376_vm1, %v369_v18  ;;  %v2344_v18 = vor.u32 %v2426_v13, %v2341_v15  ;;  %v2173_v15 = vld [vmem:[#allocation3 + $0xa0] sm:$0xf0] }
 0x118   : > { %1161 = vmatpush.bf16.msrb.mxu1 %v2344_v18 }
 0x11b   : > { %v357_v19 = vpop.trf.xlu0 }
 0x123   : > { %v358_v20 = vpop.trf.xlu0 }
 0x124   : > { %v370_v21 = vpack.c.bf16 %v358_v20, %v357_v19  ;;  %v2332_v19 = vor.u32 %v2429_v17, %v2331_v16  ;;  %v2417_v20 = vld [vmem:[#allocation3 + $0x184] sm:$0xf]  ;;  %v2179_v16 = vld [vmem:[#allocation3 + $0x88] sm:$0xf] }
 0x125   : > { %v2390_v17 = vld [vmem:[#allocation3 + $0xa4] sm:$0xf0] }
 0x126   : > { %2078 = vmatmul.msk.bf16.vlgmr.msra.gmra.mxu3 %vm376_vm1, %v370_v21  ;;  %v2301_v21 = vld [vmem:[#allocation3 + $0x1a0] sm:$0xf0]  ;;  %1014 = vmatpush.bf16.msrb.mxu2 %v2332_v19  ;;  %v2176_v19 = vor.u32 %v2385_v12, %v2173_v15  ;;  %v2355_v12 = vld [vmem:[#allocation3 + $0x1d8] sm:$0xf] }
 0x127   : > { %v2304_v23 = vor.u32 %v2417_v20, %v2301_v21  ;;  %v2180_v20 = vor.u32 %v2390_v17, %v2179_v16  ;;  %v2386_v21 = vld [vmem:[#allocation3 + $0x8c] sm:$0xf] }
 0x129   : > { %1064 = vmatpush.bf16.msrb.mxu3 %v2304_v23 }
 0x12b   : > { %v359_v22 = vpop.trf.xlu0 }
 0x133   : > { %v360_v24 = vpop.trf.xlu0 }
 0x134   : > { %v371_v25 = vpack.c.bf16 %v360_v24, %v359_v22  ;;  %v2299_v24 = vld [vmem:[#allocation3 + $0x180] sm:$0xf] }
 0x136   : > { %2079 = vmatmul.msk.bf16.gmra.mxu3 %vm376_vm1, %v371_v25  ;;  %v2421_v25 = vld [vmem:[#allocation3 + $0x19c] sm:$0xf0] }
 0x13b   : > { %v361_v28 = vpop.trf.xlu0 }
 0x143   : > { %v362_v30 = vpop.trf.xlu0 }
 0x144   : > { %v372_v31 = vpack.c.bf16 %v362_v30, %v361_v28  ;;  %v2300_v28 = vor.u32 %v2421_v25, %v2299_v24 }
 0x146   : > { %2080 = vmatmul.msk.bf16.gmra.mxu3 %vm376_vm1, %v372_v31  ;;  %v2312_v31 = vor.u32 %v2418_v26, %v2309_v29  ;;  %1015 = vmatpush.bf16.msrb.mxu2 %v2300_v28  ;;  %v2139_v26 = vld [vmem:[#allocation3 + $0x40] sm:$0xf]  ;;  %v2377_v29 = vld [vmem:[#allocation3 + $0x44] sm:$0xf] }
 0x148   : > { %1162 = vmatpush.bf16.msrb.mxu1 %v2312_v31  ;;  %v2147_v31 = vld [vmem:[#allocation3 + $0x48] sm:$0xf] }
 0x153   : > { %v414_v32 = vpop.f32.mrf.mxu0 }
 0x154   : > { %v415_v34 = vadd.f32 %v2717_v33, %v414_v32 }
 0x156   : > { %v454_v37 = vmax.f32 %v415_v34, 0.0 }
 0x15b   : > { %v416_v35 = vpop.f32.mrf.mxu0 }
 0x15c   : > { %v417_v36 = vadd.f32 %v2717_v33, %v416_v35  ;;  %v2275_v35 = vld [vmem:[#allocation3 + $0x148] sm:$0xf] }
 0x15e   : > { %v455_v38 = vmax.f32 %v417_v36, 0.0  ;;  %v2414_v36 = vld [vmem:[#allocation3 + $0x164] sm:$0xf0] }
 0x160   : > { %v544_v39 = vpack.c.bf16 %v455_v38, %v454_v37  ;;  %v2276_v37 = vor.u32 %v2414_v36, %v2275_v35  ;;  %v2409_v38 = vld [vmem:[#allocation3 + $0x144] sm:$0xf]  ;;  %v2382_v35 = vld [vmem:[#allocation3 + $0x64] sm:$0xf0]  ;;  %v2378_v36 = vld [vmem:[#allocation3 + $0x4c] sm:$0xf] }
 0x162   : > { %2097 = vmatmul.msk.bf16.vlgmr.msra.gmra.mxu1 %vm579_vm2, %v544_v39  ;;  %v2269_v39 = vld [vmem:[#allocation3 + $0x160] sm:$0xf0]  ;;  %1114 = vmatpush.bf16.msrb.mxu0 %v2276_v37  ;;  %v2149_v37 = vld [vmem:[#allocation3 + $0x68] sm:$0xf0] }
 0x163   : > { %v419_v40 = vpop.f32.mrf.mxu0 }
 0x164   : > { %v420_v41 = vadd.f32 %v2717_v33, %v419_v40  ;;  %v2267_v40 = vld [vmem:[#allocation3 + $0x140] sm:$0xf] }
 0x166   : > { %v456_v44 = vmax.f32 %v420_v41, 0.0 }
 0x16b   : > { %v421_v42 = vpop.f32.mrf.mxu0 }
 0x16c   : > { %v422_v43 = vadd.f32 %v2717_v33, %v421_v42  ;;  %v2272_v42 = vor.u32 %v2409_v38, %v2269_v39  ;;  %v2148_v38 = vor.u32 %v2382_v35, %v2147_v31  ;;  %v2152_v39 = vor.u32 %v2378_v36, %v2149_v37  ;;  %v2323_v31 = vld [vmem:[#allocation3 + $0x198] sm:$0xf] }
 0x16e   : > { %v457_v45 = vmax.f32 %v422_v43, 0.0  ;;  %v2413_v43 = vld [vmem:[#allocation3 + $0x15c] sm:$0xf0]  ;;  %1065 = vmatpush.bf16.msrb.mxu3 %v2272_v42  ;;  %v2369_v42 = vld [vmem:[#allocation3 + $0x4] sm:$0xf] }
 0x170   : > { %v545_v46 = vpack.c.bf16 %v457_v45, %v456_v44  ;;  %v2410_v44 = vld [vmem:[#allocation3 + $0x14c] sm:$0xf] }
 0x171   : > { %v2277_v45 = vld [vmem:[#allocation3 + $0x168] sm:$0xf0] }
 0x172   : > { %2098 = vmatmul.msk.bf16.gmra.mxu1 %vm579_vm2, %v545_v46  ;;  %v2268_v46 = vor.u32 %v2413_v43, %v2267_v40  ;;  %v2107_v40 = vld [vmem:[#allocation3] sm:$0xf] }
 0x173   : > { %v424_v47 = vpop.f32.mrf.mxu0 }
 0x174   : > { %v425_v48 = vadd.f32 %v2717_v33, %v424_v47  ;;  %v2280_v47 = vor.u32 %v2410_v44, %v2277_v45  ;;  %1016 = vmatpush.bf16.msrb.mxu2 %v2268_v46  ;;  %v2109_v45 = vld [vmem:[#allocation3 + $0x20] sm:$0xf0]  ;;  %v2115_v46 = vld [vmem:[#allocation3 + $0x8] sm:$0xf] }
 0x176   : > { %v458_v51 = vmax.f32 %v425_v48, 0.0  ;;  %v2235_v48 = vld [vmem:[#allocation3 + $0x100] sm:$0xf]  ;;  %1163 = vmatpush.bf16.msrb.mxu1 %v2280_v47  ;;  %v2374_v47 = vld [vmem:[#allocation3 + $0x24] sm:$0xf0] }
 0x17b   : > { %v426_v49 = vpop.f32.mrf.mxu0 }
 0x17c   : > { %v427_v50 = vadd.f32 %v2717_v33, %v426_v49  ;;  %v2405_v49 = vld [vmem:[#allocation3 + $0x11c] sm:$0xf0] }
 0x17e   : > { %v459_v52 = vmax.f32 %v427_v50, 0.0  ;;  %v2401_v50 = vld [vmem:[#allocation3 + $0x104] sm:$0xf] }
 0x180   : > { %v546_v53 = vpack.c.bf16 %v459_v52, %v458_v51  ;;  %v2236_v52 = vor.u32 %v2405_v49, %v2235_v48  ;;  %v2112_v48 = vor.u32 %v2369_v42, %v2109_v45  ;;  %v2116_v49 = vor.u32 %v2374_v47, %v2115_v46  ;;  %v2415_v42 = vld [vmem:[#allocation3 + $0x16c] sm:$0xf0]  ;;  %v2253_v45 = vld [vmem:[#allocation3 + $0x130] sm:$0xf0]  ;;  %v2420_v46 = vld [vmem:[#allocation3 + $0x19c] sm:$0xf] }
 0x181   : > { %v2325_v47 = vld [vmem:[#allocation3 + $0x1b8] sm:$0xf0] }
 0x182   : > { %2099 = vmatmul.msk.bf16.gmra.mxu1 %vm579_vm2, %v546_v53  ;;  %v2237_v53 = vld [vmem:[#allocation3 + $0x120] sm:$0xf0]  ;;  %1017 = vmatpush.bf16.msrb.mxu2 %v2236_v52 }
 0x183   : > { %v429_v54 = vpop.f32.mrf.mxu0 }
 0x184   : > { %v430_v55 = vadd.f32 %v2717_v33, %v429_v54  ;;  %v2243_v54 = vld [vmem:[#allocation3 + $0x108] sm:$0xf] }
 0x186   : > { %v460_v58 = vmax.f32 %v430_v55, 0.0  ;;  %v2406_v55 = vld [vmem:[#allocation3 + $0x124] sm:$0xf0] }
 0x18b   : > { %v431_v56 = vpop.f32.mrf.mxu0 }
 0x18c   : > { %v432_v57 = vadd.f32 %v2717_v33, %v431_v56  ;;  %v2240_v56 = vor.u32 %v2401_v50, %v2237_v53  ;;  %v2370_v50 = vld [vmem:[#allocation3 + $0xc] sm:$0xf] }
 0x18e   : > { %v461_v59 = vmax.f32 %v432_v57, 0.0  ;;  %v2244_v57 = vor.u32 %v2406_v55, %v2243_v54  ;;  %1066 = vmatpush.bf16.msrb.mxu3 %v2240_v56 }
 0x190   : > { %v547_v60 = vpack.c.bf16 %v461_v59, %v460_v58  ;;  %v2402_v58 = vld [vmem:[#allocation3 + $0x10c] sm:$0xf]  ;;  %1115 = vmatpush.bf16.msrb.mxu0 %v2244_v57 }
 0x191   : > { %v2245_v59 = vld [vmem:[#allocation3 + $0x128] sm:$0xf0] }
 0x192   : > { %2100 = vmatmul.msk.bf16.gmra.mxu1 %vm579_vm2, %v547_v60  ;;  %v2248_v60 = vor.u32 %v2402_v58, %v2245_v59  ;;  %v2427_v59 = vld [vmem:[#allocation3 + $0x1d4] sm:$0xf] }
 0x193   : > { %v434_v61 = vpop.f32.mrf.mxu0 }
 0x194   : > { %v435_v62 = vadd.f32 %v2717_v33, %v434_v61  ;;  %v2203_v61 = vld [vmem:[#allocation3 + $0xc0] sm:$0xf]  ;;  %1164 = vmatpush.bf16.msrb.mxu1 %v2248_v60  ;;  %v2349_v60 = vld [vmem:[#allocation3 + $0x1f0] sm:$0xf0] }
 0x196   : > { %v462_v4 = vmax.f32 %v435_v62, 0.0  ;;  %v2397_v62 = vld [vmem:[#allocation3 + $0xdc] sm:$0xf0] }
 0x19b   : > { %v436_v63 = vpop.f32.mrf.mxu0 }
 0x19c   : > { %v437_v0 = vadd.f32 %v2717_v33, %v436_v63  ;;  %v2204_v63 = vor.u32 %v2397_v62, %v2203_v61  ;;  %v2352_v61 = vor.u32 %v2427_v59, %v2349_v60 }
 0x19e   : > { %v463_v5 = vmax.f32 %v437_v0, 0.0  ;;  %v2393_v0 = vld [vmem:[#allocation3 + $0xc4] sm:$0xf]  ;;  %1018 = vmatpush.bf16.msrb.mxu2 %v2204_v63  ;;  %v2746_v63 = vld [vmem:[%s3497_s4] ss:$0 sm:$0xff] }
 0x19f   : > { %v2208_v3 = vor.u32 %v2393_v0, %v2205_v1 }
 0x1a0   : > { %v548_v6 = vpack.c.bf16 %v463_v5, %v462_v4  ;;  %v2398_v4 = vld [vmem:[#allocation3 + $0xe4] sm:$0xf0]  ;;  %v2394_v5 = vld [vmem:[#allocation3 + $0xcc] sm:$0xf] }
 0x1a1   : > { %1067 = vmatpush.bf16.msrb.mxu3 %v2208_v3 }
 0x1a2   : > { %2101 = vmatmul.msk.bf16.gmra.mxu1 %vm579_vm2, %v548_v6  ;;  %v2213_v6 = vld [vmem:[#allocation3 + $0xe8] sm:$0xf0]  ;;  %1019 = vmatpush.bf16.msrb.mxu2 %v2172_v14 }
 0x1a3   : > { %v2216_v8 = vor.u32 %v2394_v5, %v2213_v6  ;;  %v2347_v5 = vld [vmem:[#allocation3 + $0x1d0] sm:$0xf] }
 0x1a4   : > { %v2431_v6 = vld [vmem:[#allocation3 + $0x1ec] sm:$0xf0] }
 0x1a5   : > { %1165 = vmatpush.bf16.msrb.mxu1 %v2216_v8  ;;  %1068 = vmatpush.bf16.msrb.mxu3 %v2176_v19  ;;  %v2348_v8 = vor.u32 %v2431_v6, %v2347_v5  ;;  %v2259_v5 = vld [vmem:[#allocation3 + $0x118] sm:$0xf] }
 0x1a9   : > { %v439_v7 = vpop.f32.mrf.mxu3 }
 0x1aa   : > { %v440_v22 = vadd.f32 %v2717_v33, %v439_v7  ;;  %v2212_v7 = vor.u32 %v2398_v4, %v2211_v2 }
 0x1ac   : > { %v464_v32 = vmax.f32 %v440_v22, 0.0  ;;  %1116 = vmatpush.bf16.msrb.mxu0 %v2212_v7  ;;  %v2181_v22 = vld [vmem:[#allocation3 + $0xa8] sm:$0xf0]  ;;  %v2419_v7 = vld [vmem:[#allocation3 + $0x194] sm:$0xf] }
 0x1ad   : > { %v2184_v23 = vor.u32 %v2386_v21, %v2181_v22  ;;  %v2315_v21 = vld [vmem:[#allocation3 + $0x190] sm:$0xf] }
 0x1ae   : > { %v2423_v22 = vld [vmem:[#allocation3 + $0x1ac] sm:$0xf0] }
 0x1af   : > { %1166 = vmatpush.bf16.msrb.mxu1 %v2184_v23  ;;  %v2411_v23 = vld [vmem:[#allocation3 + $0x154] sm:$0xf] }
 0x1b0   : > { %1117 = vmatpush.bf16.msrb.mxu0 %v2180_v20 }
 0x1b1   : > { %v441_v27 = vpop.f32.mrf.mxu3 }
 0x1b2   : > { %v442_v30 = vadd.f32 %v2717_v33, %v441_v27  ;;  %v2381_v27 = vld [vmem:[#allocation3 + $0x5c] sm:$0xf0] }
 0x1b3   : > { %v2140_v28 = vor.u32 %v2381_v27, %v2139_v26  ;;  %1167 = vmatpush.bf16.msrb.mxu1 %v2152_v39  ;;  %v2428_v26 = vld [vmem:[#allocation3 + $0x1dc] sm:$0xf] }
 0x1b4   : > { %v465_v34 = vmax.f32 %v442_v30, 0.0  ;;  %v2141_v30 = vld [vmem:[#allocation3 + $0x60] sm:$0xf0]  ;;  %1118 = vmatpush.bf16.msrb.mxu0 %v2148_v38  ;;  %v2357_v27 = vld [vmem:[#allocation3 + $0x1f8] sm:$0xf0] }
 0x1b5   : > { %1020 = vmatpush.bf16.msrb.mxu2 %v2140_v28 }
 0x1b6   : > { %v549_v41 = vpack.c.bf16 %v465_v34, %v464_v32  ;;  %v2144_v34 = vor.u32 %v2377_v29, %v2141_v30  ;;  %v2762_v29 = vor.u32 %v2428_v26, %v2357_v27  ;;  %v2400_v27 = vld [vmem:[#allocation3 + $0xf4] sm:$0xf0] }
 0x1b8   : > { %2102 = vmatmul.msk.bf16.vlgmr.msra.gmra.mxu2 %vm579_vm2, %v549_v41  ;;  %1069 = vmatpush.bf16.msrb.mxu3 %v2144_v34  ;;  %v2373_v41 = vld [vmem:[#allocation3 + $0x1c] sm:$0xf0] }
 0x1b9   : > { %v444_v51 = vpop.f32.mrf.mxu3  ;;  %v2108_v44 = vor.u32 %v2373_v41, %v2107_v40  ;;  %1119 = vmatpush.bf16.msrb.mxu0 %v2116_v49  ;;  %v2283_v41 = vld [vmem:[#allocation3 + $0x150] sm:$0xf]  ;;  %v2773_v49 = vor.u32 %v2420_v46, %v2325_v47 }
 0x1ba   : > { %v445_v9 = vadd.f32 %v2717_v33, %v444_v51  ;;  %v2117_v51 = vld [vmem:[#allocation3 + $0x28] sm:$0xf0] }
 0x1bb   : > { %v2120_v52 = vor.u32 %v2370_v50, %v2117_v51  ;;  %1021 = vmatpush.bf16.msrb.mxu2 %v2108_v44  ;;  %v2284_v44 = vor.u32 %v2415_v42, %v2283_v41  ;;  %v2291_v51 = vld [vmem:[#allocation3 + $0x158] sm:$0xf] }
 0x1bc   : > { %v466_v24 = vmax.f32 %v445_v9, 0.0  ;;  %1070 = vmatpush.bf16.msrb.mxu3 %v2112_v48  ;;  %v2317_v9 = vld [vmem:[#allocation3 + $0x1b0] sm:$0xf0]  ;;  %v2195_v42 = vld [vmem:[#allocation3 + $0x98] sm:$0xf] }
 0x1bd   : > { %1168 = vmatpush.bf16.msrb.mxu1 %v2120_v52  ;;  %v2320_v10 = vor.u32 %v2419_v7, %v2317_v9  ;;  %v2416_v52 = vld [vmem:[#allocation3 + $0x174] sm:$0xf0] }
 0x1bf   : > { %1210 = vmatpush.bf16.msra.mxu2 %v2348_v8  ;;  %v2408_v8 = vld [vmem:[#allocation3 + $0x134] sm:$0xf0] }
 0x1c0   : > { %1259 = vmatpush.bf16.msra.mxu3 %v2352_v61  ;;  %v2260_v9 = vor.u32 %v2408_v8, %v2259_v5  ;;  %v2165_v5 = vld [vmem:[#allocation3 + $0x78] sm:$0xf0] }
 0x1c1   : > { %v446_v13 = vpop.f32.mrf.mxu3  ;;  %1357 = vmatpush.bf16.msra.mxu1 %v2762_v29 }
 0x1c2   : > { %v447_v18 = vadd.f32 %v2717_v33, %v446_v13  ;;  %v2432_v13 = vld [vmem:[#allocation3 + $0x1f4] sm:$0xf0] }
 0x1c3   : > { %v2356_v14 = vor.u32 %v2432_v13, %v2355_v12 }
 0x1c4   : > { %v467_v25 = vmax.f32 %v447_v18, 0.0  ;;  %1260 = vmatpush.bf16.msra.mxu3 %v2320_v10 }
 0x1c5   : > { %1308 = vmatpush.bf16.msra.mxu0 %v2356_v14  ;;  %1358 = vmatpush.bf16.msra.mxu1 %v2773_v49 }
 0x1c6   : > { %v550_v32 = vpack.c.bf16 %v467_v25, %v466_v24  ;;  %v2316_v24 = vor.u32 %v2423_v22, %v2315_v21  ;;  %v2285_v25 = vld [vmem:[#allocation3 + $0x170] sm:$0xf0] }
 0x1c7   : > { %v2288_v28 = vor.u32 %v2411_v23, %v2285_v25  ;;  %v2189_v21 = vld [vmem:[#allocation3 + $0xb0] sm:$0xf0]  ;;  %v2404_v23 = vld [vmem:[#allocation3 + $0x11c] sm:$0xf]  ;;  %v2227_v25 = vld [vmem:[#allocation3 + $0xd8] sm:$0xf] }
 0x1c8   : > { %2103 = vmatmul.msk.bf16.gmra.mxu2 %vm579_vm2, %v550_v32  ;;  %v2424_v32 = vld [vmem:[#allocation3 + $0x1b4] sm:$0xf0] }
 0x1c9   : > { %v449_v43 = vpop.f32.mrf.mxu3  ;;  %1211 = vmatpush.bf16.msra.mxu2 %v2316_v24  ;;  %1261 = vmatpush.bf16.msra.mxu3 %v2288_v28  ;;  %v2324_v34 = vor.u32 %v2424_v32, %v2323_v31  ;;  %v2261_v24 = vld [vmem:[#allocation3 + $0x138] sm:$0xf0]  ;;  %v2228_v28 = vor.u32 %v2400_v27, %v2227_v25  ;;  %v2187_v31 = vld [vmem:[#allocation3 + $0x90] sm:$0xf] }
 0x1ca   : > { %v450_v53 = vadd.f32 %v2717_v33, %v449_v43  ;;  %v2403_v43 = vld [vmem:[#allocation3 + $0x114] sm:$0xf]  ;;  %v2797_v26 = vor.u32 %v2404_v23, %v2261_v24  ;;  %v2391_v32 = vld [vmem:[#allocation3 + $0xac] sm:$0xf0] }
 0x1cb   : > { %1309 = vmatpush.bf16.msra.mxu0 %v2324_v34  ;;  %v2256_v48 = vor.u32 %v2403_v43, %v2253_v45  ;;  %v2379_v34 = vld [vmem:[#allocation3 + $0x54] sm:$0xf]  ;;  %v2392_v43 = vld [vmem:[#allocation3 + $0xb4] sm:$0xf0] }
 0x1cc   : > { %v468_v56 = vmax.f32 %v450_v53, 0.0  ;;  %v2251_v53 = vld [vmem:[#allocation3 + $0x110] sm:$0xf] }
 0x1cd   : > { %1212 = vmatpush.bf16.msra.mxu2 %v2284_v44  ;;  %1262 = vmatpush.bf16.msra.mxu3 %v2256_v48  ;;  %v2196_v44 = vor.u32 %v2392_v43, %v2195_v42 }
 0x1d1   : > { %v451_v54 = vpop.f32.mrf.mxu3 }
 0x1d2   : > { %v452_v55 = vadd.f32 %v2717_v33, %v451_v54  ;;  %v2292_v54 = vor.u32 %v2416_v52, %v2291_v51 }
 0x1d4   : > { %v469_v57 = vmax.f32 %v452_v55, 0.0  ;;  %v2407_v55 = vld [vmem:[#allocation3 + $0x12c] sm:$0xf0]  ;;  %1310 = vmatpush.bf16.msra.mxu0 %v2292_v54 }
 0x1d5   : > { %v2383_v54 = vld [vmem:[#allocation3 + $0x6c] sm:$0xf0] }
 0x1d6   : > { %v551_v58 = vpack.c.bf16 %v469_v57, %v468_v56  ;;  %v2395_v56 = vld [vmem:[#allocation3 + $0xd4] sm:$0xf] }
 0x1d7   : > { %v2221_v57 = vld [vmem:[#allocation3 + $0xf0] sm:$0xf0] }
 0x1d8   : > { %2104 = vmatmul.msk.bf16.gmra.mxu2 %vm579_vm2, %v551_v58  ;;  %v2252_v58 = vor.u32 %v2407_v55, %v2251_v53  ;;  %v2224_v59 = vor.u32 %v2395_v56, %v2221_v57  ;;  %1311 = vmatpush.bf16.msra.mxu0 %v2260_v9  ;;  %v2155_v53 = vld [vmem:[#allocation3 + $0x50] sm:$0xf]  ;;  %v2371_v55 = vld [vmem:[#allocation3 + $0x14] sm:$0xf] }
 0x1d9   : > { %v2156_v56 = vor.u32 %v2383_v54, %v2155_v53  ;;  %v2125_v57 = vld [vmem:[#allocation3 + $0x30] sm:$0xf0] }
 0x1da   : > { %1213 = vmatpush.bf16.msra.mxu2 %v2252_v58  ;;  %1263 = vmatpush.bf16.msra.mxu3 %v2224_v59  ;;  %v2128_v58 = vor.u32 %v2371_v55, %v2125_v57  ;;  %v2388_v59 = vld [vmem:[#allocation3 + $0x9c] sm:$0xf] }
 0x1dc   : > { %1312 = vmatpush.bf16.msra.mxu0 %v2228_v28 }
 0x1df   : > { %v613_v62 = vpop.f32.mrf.mxu1 }
 0x1e0   : > { %v614_v0 = vadd.f32 %v2746_v63, %v613_v62  ;;  %1313 = vmatpush.bf16.msra.mxu0 %v2196_v44 }
 0x1e2   : > { %v653_v2 = vmax.f32 %v614_v0, 0.0 }
 0x1e7   : > { %v615_v1 = vpop.f32.mrf.mxu1 }
 0x1e8   : > { %v616_v33 = vadd.f32 %v2746_v63, %v615_v1 }
 0x1ea   : > { %v654_v3 = vmax.f32 %v616_v33, 0.0 }
 0x1ec   : > { %v2750_v4 = vpack.c.bf16 %v654_v3, %v653_v2  ;;  %v2412_v2 = vld [vmem:[#allocation3 + $0x15c] sm:$0xf] }
 0x1ed   : > { %v2293_v3 = vld [vmem:[#allocation3 + $0x178] sm:$0xf0] }
 0x1ee   : > { %1022 = vmatmul.bf16.vlgmr.msrb.gmra.mxu2 %v2750_v4  ;;  %1071 = vmatmul.bf16.vlgmr.msrb.gmra.mxu3 %v2750_v4  ;;  %v2786_v7 = vor.u32 %v2412_v2, %v2293_v3  ;;  %v2380_v3 = vld [vmem:[#allocation3 + $0x5c] sm:$0xf] }
 0x1ef   : > { %1120 = vmatmul.bf16.vlgmr.msrb.gmra.mxu0 %v2750_v4  ;;  %1169 = vmatmul.bf16.vlgmr.msrb.gmra.mxu1 %v2750_v4  ;;  %v618_v11 = vpop.f32.mrf.mxu1  ;;  %v2168_v8 = vor.u32 %v2380_v3, %v2165_v5 }
 0x1f0   : > { %v619_v15 = vadd.f32 %v2746_v63, %v618_v11  ;;  %1359 = vmatpush.bf16.msra.mxu1 %v2786_v7 }
 0x1f2   : > { %v655_v18 = vmax.f32 %v619_v15, 0.0  ;;  %v2219_v15 = vld [vmem:[#allocation3 + $0xd0] sm:$0xf] }
 0x1f4   : > { %1360 = vmatpush.bf16.msra.mxu1 %v2797_v26 }
 0x1f7   : > { %v620_v16 = vpop.f32.mrf.mxu1 }
 0x1f8   : > { %v621_v17 = vadd.f32 %v2746_v63, %v620_v16  ;;  %v2399_v16 = vld [vmem:[#allocation3 + $0xec] sm:$0xf0] }
 0x1fa   : > { %v656_v19 = vmax.f32 %v621_v17, 0.0  ;;  %v2387_v17 = vld [vmem:[#allocation3 + $0x94] sm:$0xf] }
 0x1fb   : > { %v2192_v22 = vor.u32 %v2387_v17, %v2189_v21 }
 0x1fc   : > { %v2758_v20 = vpack.c.bf16 %v656_v19, %v655_v18  ;;  %v2220_v19 = vor.u32 %v2399_v16, %v2219_v15  ;;  %v2376_v15 = vld [vmem:[#allocation3 + $0x34] sm:$0xf0]  ;;  %v2372_v16 = vld [vmem:[#allocation3 + $0x1c] sm:$0xf] }
 0x1fd   : > { %1264 = vmatpush.bf16.msra.mxu3 %v2192_v22 }
 0x1fe   : > { %1027 = vmatmul.bf16.gmra.mxu2 %v2758_v20  ;;  %1076 = vmatmul.bf16.gmra.mxu3 %v2758_v20 }
 0x1ff   : > { %1125 = vmatmul.bf16.gmra.mxu0 %v2758_v20  ;;  %1174 = vmatmul.bf16.gmra.mxu1 %v2758_v20  ;;  %v623_v30 = vpop.f32.mrf.mxu1 }
 0x200   : > { %v624_v35 = vadd.f32 %v2746_v63, %v623_v30  ;;  %1214 = vmatpush.bf16.msra.mxu2 %v2220_v19  ;;  %v2133_v19 = vld [vmem:[#allocation3 + $0x38] sm:$0xf0] }
 0x201   : > { %v2136_v22 = vor.u32 %v2372_v16, %v2133_v19 }
 0x202   : > { %v657_v38 = vmax.f32 %v624_v35, 0.0  ;;  %v2188_v35 = vor.u32 %v2391_v32, %v2187_v31 }
 0x204   : > { %1215 = vmatpush.bf16.msra.mxu2 %v2188_v35 }
 0x207   : > { %v625_v36 = vpop.f32.mrf.mxu1 }
 0x208   : > { %v626_v37 = vadd.f32 %v2746_v63, %v625_v36  ;;  %v2157_v36 = vld [vmem:[#allocation3 + $0x70] sm:$0xf0]  ;;  %1216 = vmatpush.bf16.msra.mxu2 %v2156_v56 }
 0x20a   : > { %v658_v39 = vmax.f32 %v626_v37, 0.0  ;;  %v2160_v37 = vor.u32 %v2379_v34, %v2157_v36 }
 0x20c   : > { %v2769_v40 = vpack.c.bf16 %v658_v39, %v657_v38  ;;  %v2396_v38 = vld [vmem:[#allocation3 + $0xdc] sm:$0xf]  ;;  %1265 = vmatpush.bf16.msra.mxu3 %v2160_v37 }
 0x20d   : > { %v2229_v39 = vld [vmem:[#allocation3 + $0xf8] sm:$0xf0] }
 0x20e   : > { %1032 = vmatmul.bf16.gmra.mxu2 %v2769_v40  ;;  %1081 = vmatmul.bf16.gmra.mxu3 %v2769_v40  ;;  %v2800_v41 = vor.u32 %v2396_v38, %v2229_v39 }
 0x20f   : > { %1130 = vmatmul.bf16.gmra.mxu0 %v2769_v40  ;;  %1179 = vmatmul.bf16.gmra.mxu1 %v2769_v40  ;;  %v628_v50 = vpop.f32.mrf.mxu1 }
 0x210   : > { %v629_v60 = vadd.f32 %v2746_v63, %v628_v50  ;;  %1361 = vmatpush.bf16.msra.mxu1 %v2800_v41  ;;  %1266 = vmatpush.bf16.msra.mxu3 %v2128_v58 }
 0x212   : > { %v659_v0 = vmax.f32 %v629_v60, 0.0  ;;  %v2197_v60 = vld [vmem:[#allocation3 + $0xb8] sm:$0xf0] }
 0x214   : > { %2438 = vmatpush.bf16.msrb.mxu3 %v2762_v29 }
 0x217   : > { %v630_v61 = vpop.f32.mrf.mxu1 }
 0x218   : > { %v631_v62 = vadd.f32 %v2746_v63, %v630_v61  ;;  %v2200_v61 = vor.u32 %v2388_v59, %v2197_v60  ;;  %2439 = vmatpush.bf16.msrb.mxu3 %v2773_v49 }
 0x21a   : > { %v660_v1 = vmax.f32 %v631_v62, 0.0  ;;  %1362 = vmatpush.bf16.msra.mxu1 %v2200_v61  ;;  %v2163_v62 = vld [vmem:[#allocation3 + $0x58] sm:$0xf] }
 0x21c   : > { %v2780_v33 = vpack.c.bf16 %v660_v1, %v659_v0  ;;  %v2384_v0 = vld [vmem:[#allocation3 + $0x74] sm:$0xf0]  ;;  %2440 = vmatpush.bf16.msrb.mxu3 %v2786_v7 }
 0x21d   : > { %v2164_v2 = vor.u32 %v2384_v0, %v2163_v62 }
 0x21e   : > { %1037 = vmatmul.bf16.gmra.mxu2 %v2780_v33  ;;  %1086 = vmatmul.bf16.gmra.mxu3 %v2780_v33 }
 0x21f   : > { %1135 = vmatmul.bf16.gmra.mxu0 %v2780_v33  ;;  %1184 = vmatmul.bf16.gmra.mxu1 %v2780_v33  ;;  %v633_v6 = vpop.f32.mrf.mxu1 }
 0x220   : > { %v634_v10 = vadd.f32 %v2746_v63, %v633_v6  ;;  %1314 = vmatpush.bf16.msra.mxu0 %v2164_v2  ;;  %1363 = vmatpush.bf16.msra.mxu1 %v2168_v8 }
 0x221   : > { %2441 = vmatpush.bf16.msrb.mxu3 %v2797_v26  ;;  %v1534_v26 = vlaneseq }
 0x222   : > { %v661_v13 = vmax.f32 %v634_v10, 0.0  ;;  %v2123_v10 = vld [vmem:[#allocation3 + $0x10] sm:$0xf] }
 0x223   : > { %v2837_v32 = vshrl.u32 %v1534_v26, 7 }
 0x224   : > { %1364 = vmatpush.bf16.msra.mxu1 %v2136_v22 }
 0x225   : > { %2442 = vmatpush.bf16.msrb.mxu3 %v2800_v41  ;;  %v1536_v36 = vadd.s32 8, %v2837_v32  ;;  %v2850_v41 = vstv %s2361_s25  ;;  %v1538_v26 = vadd.s32 24, %v2837_v32 }
 0x227   : > { %v635_v11 = vpop.f32.mrf.mxu1 }
 0x228   : > { %v636_v12 = vadd.f32 %v2746_v63, %v635_v11  ;;  %v2375_v11 = vld [vmem:[#allocation3 + $0x2c] sm:$0xf0] }
 0x229   : > { %2443 = vmatpush.bf16.msrb.mxu3 %v2200_v61 }
 0x22a   : > { %v662_v14 = vmax.f32 %v636_v12, 0.0  ;;  %v2131_v12 = vld [vmem:[#allocation3 + $0x18] sm:$0xf] }
 0x22b   : > { %v2132_v17 = vor.u32 %v2376_v15, %v2131_v12 }
 0x22c   : > { %v2791_v18 = vpack.c.bf16 %v662_v14, %v661_v13  ;;  %v2124_v14 = vor.u32 %v2375_v11, %v2123_v10 }
 0x22d   : > { %1315 = vmatpush.bf16.msra.mxu0 %v2132_v17  ;;  %2444 = vmatpush.bf16.msrb.mxu3 %v2168_v8 }
 0x22e   : > { %1042 = vmatmul.bf16.gmra.mxu2 %v2791_v18  ;;  %1091 = vmatmul.bf16.gmra.mxu3 %v2791_v18 }
 0x22f   : > { %1140 = vmatmul.bf16.gmra.mxu0 %v2791_v18  ;;  %1189 = vmatmul.bf16.gmra.mxu1 %v2791_v18 }
 0x230   : > { %1217 = vmatpush.bf16.msra.mxu2 %v2124_v14 }
 0x231   : > { %2445 = vmatpush.bf16.msrb.mxu3 %v2136_v22 }
 0x23b   : > { %v638_v30 = vpop.f32.mrf.mxu2 }
 0x23c   : > { %v639_v45 = vadd.f32 %v2746_v63, %v638_v30 }
 0x23e   : > { %v663_v48 = vmax.f32 %v639_v45, 0.0  ;;  %v2854_v45 = vadd.s32 %v2850_v41, %v1536_v36 }
 0x240   : > { %vm1570_vm3 = vcmp.lt.s32.totalorder %v2854_v45, 500 }
 0x243   : > { %v640_v46 = vpop.f32.mrf.mxu2 }
 0x244   : > { %v641_v47 = vadd.f32 %v2746_v63, %v640_v46 }
 0x246   : > { %v664_v50 = vmax.f32 %v641_v47, 0.0  ;;  %v1537_v47 = vadd.s32 16, %v2837_v32 }
 0x248   : > { %v2805_v51 = vpack.c.bf16 %v664_v50, %v663_v48  ;;  %v2870_v59 = vadd.s32 %v2850_v41, %v1537_v47 }
 0x24a   : > { %1047 = vmatmul.bf16.gmra.mxu2 %v2805_v51  ;;  %1096 = vmatmul.bf16.gmra.mxu3 %v2805_v51  ;;  %vm1571_vm5 = vcmp.lt.s32.totalorder %v2870_v59, 500 }
 0x24b   : > { %1145 = vmatmul.bf16.gmra.mxu0 %v2805_v51  ;;  %1194 = vmatmul.bf16.gmra.mxu1 %v2805_v51  ;;  %v643_v52 = vpop.f32.mrf.mxu2 }
 0x24c   : > { %v644_v1 = vadd.f32 %v2746_v63, %v643_v52  ;;  %v2862_v52 = vadd.s32 %v2850_v41, %v2837_v32 }
 0x24e   : > { %v665_v13 = vmax.f32 %v644_v1, 0.0  ;;  %vm1569_vm4 = vcmp.lt.s32.totalorder %v2862_v52, 500 }
 0x253   : > { %v645_v6 = vpop.f32.mrf.mxu2 }
 0x254   : > { %v646_v9 = vadd.f32 %v2746_v63, %v645_v6 }
 0x256   : > { %v666_v29 = vmax.f32 %v646_v9, 0.0 }
 0x258   : > { %v2815_v21 = vpack.c.bf16 %v666_v29, %v665_v13 }
 0x25a   : > { %1052 = vmatmul.bf16.gmra.mxu2 %v2815_v21  ;;  %1101 = vmatmul.bf16.gmra.mxu3 %v2815_v21 }
 0x25b   : > { %1150 = vmatmul.bf16.gmra.mxu0 %v2815_v21  ;;  %1199 = vmatmul.bf16.gmra.mxu1 %v2815_v21  ;;  %v648_v49 = vpop.f32.mrf.mxu2 }
 0x25c   : > { %v649_v23 = vadd.f32 %v2746_v63, %v648_v49 }
 0x25e   : > { %v667_v25 = vmax.f32 %v649_v23, 0.0 }
 0x263   : > { %v650_v24 = vpop.f32.mrf.mxu2 }
 0x264   : > { %v651_v7 = vadd.f32 %v2746_v63, %v650_v24  ;;  %v2835_v63 = vld [vmem:[%s3499_s6] sm:$0xff] }
 0x265   : > { %v2842_v37 = vperm.slane %v2835_v63, 2  ;;  %v2845_v38 = vperm.slane %v2835_v63, 0  ;;  %v2848_v39 = vperm.slane %v2835_v63, 3  ;;  %v2866_v54 = vperm.slane %v2835_v63, 1 }
 0x266   : > { %v668_v27 = vmax.f32 %v651_v7, 0.0 }
 0x268   : > { %v2826_v28 = vpack.c.bf16 %v668_v27, %v667_v25 }
 0x26a   : > { %1057 = vmatmul.bf16.gmra.mxu2 %v2826_v28  ;;  %1106 = vmatmul.bf16.gmra.mxu3 %v2826_v28 }
 0x26b   : > { %1155 = vmatmul.bf16.gmra.mxu0 %v2826_v28  ;;  %1204 = vmatmul.bf16.gmra.mxu1 %v2826_v28 }
 0x26c   : > { %v1121_v30 = vpop.f32.mrf.mxu0  ;;  %v1170_v31 = vpop.f32.mrf.mxu1 }
 0x26d   : > { %v1122_v48 = vadd.f32 %v1121_v30, %v2842_v37  ;;  %v1171_v53 = vadd.f32 %v1170_v31, %v2848_v39 }
 0x26f   : > { %v1408_v60 = vmax.f32 %v1122_v48, 0.0  ;;  %v1409_v1 = vmax.f32 %v1171_v53, 0.0 }
 0x271   : > { %v1023_v34 = vpop.f32.mrf.mxu2  ;;  %v1072_v35 = vpop.f32.mrf.mxu3  ;;  %v1619_v13 = vsel %vm1569_vm4, %v1408_v60, -inf }
 0x272   : > { %v1024_v50 = vadd.f32 %v1023_v34, %v2845_v38  ;;  %v1073_v2 = vadd.f32 %v1072_v35, %v2866_v54 }
 0x274   : > { %v1123_v42 = vpop.f32.mrf.mxu0  ;;  %v1172_v43 = vpop.f32.mrf.mxu1  ;;  %v1406_v61 = vmax.f32 %v1024_v50, 0.0  ;;  %v1407_v19 = vmax.f32 %v1073_v2, 0.0  ;;  %v2908_v50 = vadd.s32 %v2850_v41, %v1538_v26 }
 0x275   : > { %v1124_v44 = vadd.f32 %v1123_v42, %v2842_v37  ;;  %v1173_v46 = vadd.f32 %v1172_v43, %v2848_v39 }
 0x276   : > { %v1617_v29 = vsel %vm1569_vm4, %v1406_v61, -inf  ;;  %v1618_v36 = vsel %vm1569_vm4, %v1407_v19, -inf  ;;  %vm1572_vm6 = vcmp.lt.s32.totalorder %v2908_v50, 500 }
 0x277   : > { %v1416_v55 = vmax.f32 %v1124_v44, 0.0  ;;  %v1417_v56 = vmax.f32 %v1173_v46, 0.0 }
 0x279   : > { %v1025_v57 = vpop.f32.mrf.mxu2  ;;  %v1074_v58 = vpop.f32.mrf.mxu3  ;;  %v1627_v3 = vsel %vm1570_vm3, %v1416_v55, -inf  ;;  %v1628_v9 = vsel %vm1570_vm3, %v1417_v56, -inf }
 0x27a   : > { %v1026_v62 = vadd.f32 %v1025_v57, %v2845_v38  ;;  %v1075_v0 = vadd.f32 %v1074_v58, %v2866_v54  ;;  %1218 = vmatmul.bf16.vlgmr.msra.gmra.mxu2 %v2750_v4  ;;  %1267 = vmatmul.bf16.vlgmr.msra.gmra.mxu3 %v2750_v4  ;;  %v1775_v22 = vmax.f32 %v1619_v13, %v1627_v3  ;;  %v1539_v57 = vadd.s32 32, %v2837_v32 }
 0x27b   : > { %1316 = vmatmul.bf16.vlgmr.msra.gmra.mxu0 %v2750_v4  ;;  %1365 = vmatmul.bf16.vlgmr.msra.gmra.mxu1 %v2750_v4  ;;  %v1620_v4 = vsel %vm1569_vm4, %v1409_v1, -inf }
 0x27c   : > { %v1414_v5 = vmax.f32 %v1026_v62, 0.0  ;;  %v1126_v6 = vpop.f32.mrf.mxu0  ;;  %v1175_v8 = vpop.f32.mrf.mxu1  ;;  %v1415_v10 = vmax.f32 %v1075_v0, 0.0  ;;  %v1790_v49 = vmax.f32 %v1620_v4, %v1628_v9 }
 0x27d   : > { %v1127_v11 = vadd.f32 %v1126_v6, %v2842_v37  ;;  %v1176_v12 = vadd.f32 %v1175_v8, %v2848_v39 }
 0x27e   : > { %v1625_v14 = vsel %vm1570_vm3, %v1414_v5, -inf  ;;  %v1626_v23 = vsel %vm1570_vm3, %v1415_v10, -inf  ;;  %v2921_v5 = vadd.s32 %v2850_v41, %v1539_v57 }
 0x27f   : > { %v1745_v15 = vmax.f32 %v1617_v29, %v1625_v14  ;;  %v1424_v16 = vmax.f32 %v1127_v11, 0.0  ;;  %v1425_v17 = vmax.f32 %v1176_v12, 0.0  ;;  %v1760_v47 = vmax.f32 %v1618_v36, %v1626_v23 }
 0x280   : > { %vm1573_vm7 = vcmp.lt.s32.totalorder %v2921_v5, 500 }
 0x281   : > { %v1635_v24 = vsel %vm1571_vm5, %v1424_v16, -inf  ;;  %v1636_v7 = vsel %vm1571_vm5, %v1425_v17, -inf  ;;  %v1028_v25 = vpop.f32.mrf.mxu2  ;;  %v1077_v27 = vpop.f32.mrf.mxu3 }
 0x282   : > { %v1776_v30 = vmax.f32 %v1775_v22, %v1635_v24  ;;  %v1791_v31 = vmax.f32 %v1790_v49, %v1636_v7  ;;  %v1029_v34 = vadd.f32 %v1028_v25, %v2845_v38  ;;  %v1078_v35 = vadd.f32 %v1077_v27, %v2866_v54 }
 0x284   : > { %v1422_v42 = vmax.f32 %v1029_v34, 0.0  ;;  %v1423_v43 = vmax.f32 %v1078_v35, 0.0  ;;  %v1128_v44 = vpop.f32.mrf.mxu0  ;;  %v1177_v46 = vpop.f32.mrf.mxu1 }
 0x285   : > { %v1129_v48 = vadd.f32 %v1128_v44, %v2842_v37  ;;  %v1178_v53 = vadd.f32 %v1177_v46, %v2848_v39 }
 0x286   : > { %v1633_v55 = vsel %vm1571_vm5, %v1422_v42, -inf  ;;  %v1634_v56 = vsel %vm1571_vm5, %v1423_v43, -inf }
 0x287   : > { %v1746_v58 = vmax.f32 %v1745_v15, %v1633_v55  ;;  %v1761_v60 = vmax.f32 %v1760_v47, %v1634_v56  ;;  %v1432_v61 = vmax.f32 %v1129_v48, 0.0  ;;  %v1433_v62 = vmax.f32 %v1178_v53, 0.0 }
 0x289   : > { %v1030_v0 = vpop.f32.mrf.mxu2  ;;  %v1079_v1 = vpop.f32.mrf.mxu3  ;;  %v1643_v6 = vsel %vm1572_vm6, %v1432_v61, -inf  ;;  %v1644_v11 = vsel %vm1572_vm6, %v1433_v62, -inf }
 0x28a   : > { %v1031_v2 = vadd.f32 %v1030_v0, %v2845_v38  ;;  %v1080_v3 = vadd.f32 %v1079_v1, %v2866_v54  ;;  %1223 = vmatmul.bf16.gmra.mxu2 %v2758_v20  ;;  %1272 = vmatmul.bf16.gmra.mxu3 %v2758_v20  ;;  %v1777_v17 = vmax.f32 %v1776_v30, %v1643_v6 }
 0x28b   : > { %1321 = vmatmul.bf16.gmra.mxu0 %v2758_v20  ;;  %1370 = vmatmul.bf16.gmra.mxu1 %v2758_v20  ;;  %v1792_v20 = vmax.f32 %v1791_v31, %v1644_v11 }
 0x28c   : > { %v1430_v8 = vmax.f32 %v1031_v2, 0.0  ;;  %v1131_v9 = vpop.f32.mrf.mxu0  ;;  %v1180_v10 = vpop.f32.mrf.mxu1  ;;  %v1431_v12 = vmax.f32 %v1080_v3, 0.0  ;;  %v1540_v3 = vadd.s32 40, %v2837_v32 }
 0x28d   : > { %v1132_v13 = vadd.f32 %v1131_v9, %v2842_v37  ;;  %v1181_v29 = vadd.f32 %v1180_v10, %v2848_v39 }
 0x28e   : > { %v1641_v14 = vsel %vm1572_vm6, %v1430_v8, -inf  ;;  %v1642_v19 = vsel %vm1572_vm6, %v1431_v12, -inf  ;;  %v1541_v8 = vadd.s32 48, %v2837_v32 }
 0x28f   : > { %v1747_v4 = vmax.f32 %v1746_v58, %v1641_v14  ;;  %v1440_v15 = vmax.f32 %v1132_v13, 0.0  ;;  %v1441_v16 = vmax.f32 %v1181_v29, 0.0  ;;  %v1762_v34 = vmax.f32 %v1761_v60, %v1642_v19 }
 0x290   : > { %v2984_v13 = vadd.s32 %v2850_v41, %v1540_v3 }
 0x291   : > { %v1651_v22 = vsel %vm1573_vm7, %v1440_v15, -inf  ;;  %v1652_v49 = vsel %vm1573_vm7, %v1441_v16, -inf  ;;  %v1033_v23 = vpop.f32.mrf.mxu2  ;;  %v1082_v24 = vpop.f32.mrf.mxu3  ;;  %v1543_v15 = vadd.s32 64, %v2837_v32  ;;  %v1544_v16 = vadd.s32 72, %v2837_v32 }
 0x292   : > { %v2941_v7 = vmax.f32 %v1777_v17, %v1651_v22  ;;  %v2943_v25 = vmax.f32 %v1792_v20, %v1652_v49  ;;  %v1034_v27 = vadd.f32 %v1033_v23, %v2845_v38  ;;  %v1083_v26 = vadd.f32 %v1082_v24, %v2866_v54 }
 0x293   : > { %vm1574_vm8 = vcmp.lt.s32.totalorder %v2984_v13, 500 }
 0x294   : > { %v1438_v30 = vmax.f32 %v1034_v27, 0.0  ;;  %v1439_v31 = vmax.f32 %v1083_v26, 0.0  ;;  %v1133_v44 = vpop.f32.mrf.mxu0  ;;  %v1182_v46 = vpop.f32.mrf.mxu1 }
 0x295   : > { %v1134_v9 = vadd.f32 %v1133_v44, %v2842_v37  ;;  %v1183_v10 = vadd.f32 %v1182_v46, %v2848_v39 }
 0x296   : > { %v1649_v35 = vsel %vm1573_vm7, %v1438_v30, -inf  ;;  %v1650_v36 = vsel %vm1573_vm7, %v1439_v31, -inf }
 0x297   : > { %v2951_v42 = vmax.f32 %v1747_v4, %v1649_v35  ;;  %v2953_v43 = vmax.f32 %v1762_v34, %v1650_v36  ;;  %v2992_v4 = vadd.s32 %v2850_v41, %v1541_v8  ;;  %v1448_v17 = vmax.f32 %v1134_v9, 0.0 }
 0x298   : > { %v1449_v20 = vmax.f32 %v1183_v10, 0.0  ;;  %v3011_v35 = vadd.s32 %v2850_v41, %v1543_v15  ;;  %v3014_v36 = vadd.s32 %v2850_v41, %v1544_v16 }
 0x299   : > { %v1035_v47 = vpop.f32.mrf.mxu2  ;;  %v1084_v48 = vpop.f32.mrf.mxu3  ;;  %vm1575_vm9 = vcmp.lt.s32.totalorder %v2992_v4, 500  ;;  %v1659_v44 = vsel %vm1574_vm8, %v1448_v17, -inf }
 0x29a   : > { %1228 = vmatmul.bf16.gmra.mxu2 %v2769_v40  ;;  %1277 = vmatmul.bf16.gmra.mxu3 %v2769_v40  ;;  %v1036_v11 = vadd.f32 %v1035_v47, %v2845_v38  ;;  %v1085_v12 = vadd.f32 %v1084_v48, %v2866_v54  ;;  %v1660_v46 = vsel %vm1574_vm8, %v1449_v20, -inf  ;;  %vm1577_vm11 = vcmp.lt.s32.totalorder %v3011_v35, 500 }
 0x29b   : > { %1326 = vmatmul.bf16.gmra.mxu0 %v2769_v40  ;;  %1375 = vmatmul.bf16.gmra.mxu1 %v2769_v40  ;;  %vm1578_vm12 = vcmp.lt.s32.totalorder %v3014_v36, 500 }
 0x29c   : > { %v1136_v53 = vpop.f32.mrf.mxu0  ;;  %v1185_v55 = vpop.f32.mrf.mxu1  ;;  %v1446_v19 = vmax.f32 %v1036_v11, 0.0  ;;  %v1447_v22 = vmax.f32 %v1085_v12, 0.0  ;;  %v1779_v11 = vmax.f32 %v2941_v7, %v1659_v44 }
 0x29d   : > { %v1137_v49 = vadd.f32 %v1136_v53, %v2842_v37  ;;  %v1186_v23 = vadd.f32 %v1185_v55, %v2848_v39 }
 0x29e   : > { %v1657_v47 = vsel %vm1574_vm8, %v1446_v19, -inf  ;;  %v1658_v48 = vsel %vm1574_vm8, %v1447_v22, -inf }
 0x29f   : > { %v1456_v53 = vmax.f32 %v1137_v49, 0.0  ;;  %v1457_v55 = vmax.f32 %v1186_v23, 0.0  ;;  %v1764_v15 = vmax.f32 %v2953_v43, %v1658_v48 }
 0x2a1   : > { %v1038_v56 = vpop.f32.mrf.mxu2  ;;  %v1087_v57 = vpop.f32.mrf.mxu3  ;;  %v1668_v7 = vsel %vm1575_vm9, %v1457_v55, -inf }
 0x2a2   : > { %v1039_v24 = vadd.f32 %v1038_v56, %v2845_v38  ;;  %v1088_v30 = vadd.f32 %v1087_v57, %v2866_v54 }
 0x2a4   : > { %v1138_v58 = vpop.f32.mrf.mxu0  ;;  %v1187_v60 = vpop.f32.mrf.mxu1  ;;  %v1454_v56 = vmax.f32 %v1039_v24, 0.0 }
 0x2a5   : > { %v1139_v34 = vadd.f32 %v1138_v58, %v2842_v37  ;;  %v1188_v57 = vadd.f32 %v1187_v60, %v2848_v39  ;;  %v1455_v58 = vmax.f32 %v1088_v30, 0.0  ;;  %v1749_v60 = vmax.f32 %v2951_v42, %v1657_v47 }
 0x2a7   : > { %v1464_v12 = vmax.f32 %v1139_v34, 0.0  ;;  %v1465_v16 = vmax.f32 %v1188_v57, 0.0  ;;  %v1666_v42 = vsel %vm1575_vm9, %v1455_v58, -inf }
 0x2a8   : > { %v1765_v48 = vmax.f32 %v1764_v15, %v1666_v42 }
 0x2a9   : > { %v1040_v61 = vpop.f32.mrf.mxu2  ;;  %v1089_v62 = vpop.f32.mrf.mxu3 }
 0x2aa   : > { %1233 = vmatmul.bf16.gmra.mxu2 %v2780_v33  ;;  %1282 = vmatmul.bf16.gmra.mxu3 %v2780_v33  ;;  %v1041_v3 = vadd.f32 %v1040_v61, %v2845_v38  ;;  %v1090_v8 = vadd.f32 %v1089_v62, %v2866_v54  ;;  %v1667_v62 = vsel %vm1575_vm9, %v1456_v53, -inf }
 0x2ab   : > { %1331 = vmatmul.bf16.gmra.mxu0 %v2780_v33  ;;  %1380 = vmatmul.bf16.gmra.mxu1 %v2780_v33  ;;  %v1780_v24 = vmax.f32 %v1779_v11, %v1667_v62 }
 0x2ac   : > { %v1141_v0 = vpop.f32.mrf.mxu0  ;;  %v2963_v40 = vpop.f32.mrf.mxu1  ;;  %v1462_v43 = vmax.f32 %v1041_v3, 0.0  ;;  %v1463_v20 = vmax.f32 %v1090_v8, 0.0  ;;  %v1546_v8 = vadd.s32 88, %v2837_v32 }
 0x2ad   : > { %v1191_v61 = vadd.f32 %v2963_v40, %v2848_v39  ;;  %v1545_v40 = vadd.s32 80, %v2837_v32 }
 0x2af   : > { %v1473_v30 = vmax.f32 %v1191_v61, 0.0 }
 0x2b1   : > { %v2966_v1 = vpop.f32.mrf.mxu2  ;;  %v2968_v2 = vpop.f32.mrf.mxu3  ;;  %v1684_v11 = vsel %vm1577_vm11, %v1473_v30, -inf  ;;  %v1548_v30 = vadd.s32 104, %v2837_v32 }
 0x2b2   : > { %v1044_v49 = vadd.f32 %v2966_v1, %v2845_v38  ;;  %v1093_v23 = vadd.f32 %v2968_v2, %v2866_v54 }
 0x2b4   : > { %v2974_v33 = vpop.f32.mrf.mxu0  ;;  %v2976_v6 = vpop.f32.mrf.mxu1  ;;  %v1470_v58 = vmax.f32 %v1044_v49, 0.0  ;;  %v1471_v3 = vmax.f32 %v1093_v23, 0.0 }
 0x2b5   : > { %v1144_v34 = vadd.f32 %v2974_v33, %v2842_v37  ;;  %v1193_v44 = vadd.f32 %v2976_v6, %v2848_v39 }
 0x2b9   : > { %v2987_v29 = vpop.f32.mrf.mxu2  ;;  %v2989_v14 = vpop.f32.mrf.mxu3 }
 0x2ba   : > { %1238 = vmatmul.bf16.gmra.mxu2 %v2791_v18  ;;  %1287 = vmatmul.bf16.gmra.mxu3 %v2791_v18  ;;  %v1095_v15 = vadd.f32 %v2989_v14, %v2866_v54  ;;  %v1682_v14 = vsel %vm1577_vm11, %v1471_v3, -inf  ;;  %v3123_v3 = vadd.s32 %v2850_v41, %v1548_v30 }
 0x2bb   : > { %1336 = vmatmul.bf16.gmra.mxu0 %v2791_v18  ;;  %1385 = vmatmul.bf16.gmra.mxu1 %v2791_v18  ;;  %v1542_v18 = vadd.s32 56, %v2837_v32 }
 0x2bc   : > { %v1479_v49 = vmax.f32 %v1095_v15, 0.0  ;;  %vm1582_vm1 = vcmp.lt.s32.totalorder %v3123_v3, 500 }
 0x2bd   : > { %v3006_v31 = vadd.s32 %v2850_v41, %v1542_v18  ;;  %v1142_v18 = vadd.f32 %v1141_v0, %v2842_v37  ;;  %v1665_v0 = vsel %vm1575_vm9, %v1454_v56, -inf  ;;  %v3071_v56 = vadd.s32 %v2850_v41, %v1545_v40 }
 0x2be   : > { %v1750_v47 = vmax.f32 %v1749_v60, %v1665_v0  ;;  %v3092_v40 = vadd.s32 %v2850_v41, %v1546_v8 }
 0x2bf   : > { %vm1576_vm10 = vcmp.lt.s32.totalorder %v3006_v31, 500  ;;  %v1472_v22 = vmax.f32 %v1142_v18, 0.0  ;;  %v1481_v18 = vmax.f32 %v1193_v44, 0.0  ;;  %vm1579_vm13 = vcmp.lt.s32.totalorder %v3071_v56, 500 }
 0x2c0   : > { %v1675_v19 = vsel %vm1576_vm10, %v1464_v12, -inf  ;;  %v1676_v53 = vsel %vm1576_vm10, %v1465_v16, -inf  ;;  %v1673_v1 = vsel %vm1576_vm10, %v1462_v43, -inf  ;;  %v1674_v2 = vsel %vm1576_vm10, %v1463_v20, -inf }
 0x2c1   : > { %v1781_v55 = vmax.f32 %v1780_v24, %v1675_v19  ;;  %v1683_v6 = vsel %vm1577_vm11, %v1472_v22, -inf  ;;  %v1480_v12 = vmax.f32 %v1144_v34, 0.0  ;;  %v1751_v16 = vmax.f32 %v1750_v47, %v1673_v1 }
 0x2c2   : > { %v1766_v42 = vmax.f32 %v1765_v48, %v1674_v2  ;;  %v1547_v22 = vadd.s32 96, %v2837_v32  ;;  %vm1580_vm14 = vcmp.lt.s32.totalorder %v3092_v40, 500 }
 0x2c3   : > { %v1782_v43 = vmax.f32 %v1781_v55, %v1683_v6 }
 0x2c4   : > { %v1767_v1 = vmax.f32 %v1766_v42, %v1682_v14 }
 0x2c8   : > { %v3000_v27 = vpop.f32.mrf.mxu0  ;;  %v3002_v26 = vpop.f32.mrf.mxu1 }
 0x2c9   : > { %v1147_v61 = vadd.f32 %v3000_v27, %v2842_v37  ;;  %v1196_v62 = vadd.f32 %v3002_v26, %v2848_v39  ;;  %v1691_v27 = vsel %vm1578_vm12, %v1480_v12, -inf  ;;  %v1692_v26 = vsel %vm1578_vm12, %v1481_v18, -inf }
 0x2ca   : > { %1243 = vmatmul.bf16.gmra.mxu2 %v2805_v51  ;;  %1292 = vmatmul.bf16.gmra.mxu3 %v2805_v51  ;;  %v1783_v2 = vmax.f32 %v1782_v43, %v1691_v27 }
 0x2cb   : > { %1341 = vmatmul.bf16.gmra.mxu0 %v2805_v51  ;;  %1390 = vmatmul.bf16.gmra.mxu1 %v2805_v51  ;;  %v1794_v51 = vmax.f32 %v2943_v25, %v1660_v46  ;;  %v1488_v23 = vmax.f32 %v1147_v61, 0.0  ;;  %v1489_v24 = vmax.f32 %v1196_v62, 0.0 }
 0x2cd   : > { %v3032_v9 = vpop.f32.mrf.mxu2  ;;  %v3034_v10 = vpop.f32.mrf.mxu3  ;;  %v1795_v46 = vmax.f32 %v1794_v51, %v1668_v7  ;;  %v1046_v51 = vadd.f32 %v2987_v29, %v2845_v38  ;;  %v1681_v29 = vsel %vm1577_vm11, %v1470_v58, -inf }
 0x2ce   : > { %v1049_v34 = vadd.f32 %v3032_v9, %v2845_v38  ;;  %v1098_v44 = vadd.f32 %v3034_v10, %v2866_v54  ;;  %v1752_v55 = vmax.f32 %v1751_v16, %v1681_v29  ;;  %v3114_v9 = vadd.s32 %v2850_v41, %v1547_v22 }
 0x2cf   : > { %v1796_v60 = vmax.f32 %v1795_v46, %v1676_v53  ;;  %v1478_v19 = vmax.f32 %v1046_v51, 0.0  ;;  %v1690_v10 = vsel %vm1578_vm12, %v1479_v49, -inf  ;;  %v1549_v29 = vadd.s32 112, %v2837_v32 }
 0x2d0   : > { %v1148_v25 = vpop.f32.mrf.mxu0  ;;  %v1197_v17 = vpop.f32.mrf.mxu1  ;;  %v1487_v12 = vmax.f32 %v1098_v44, 0.0  ;;  %v1768_v42 = vmax.f32 %v1767_v1, %v1690_v10  ;;  %vm1581_vm15 = vcmp.lt.s32.totalorder %v3114_v9, 500  ;;  %v1872_v9 = vld [vmem:[#allocation2 + $0x38] sm:$0xff] }
 0x2d1   : > { %v1797_v20 = vmax.f32 %v1796_v60, %v1684_v11  ;;  %v1149_v46 = vadd.f32 %v1148_v25, %v2842_v37  ;;  %v1198_v47 = vadd.f32 %v1197_v17, %v2848_v39  ;;  %v1689_v6 = vsel %vm1578_vm12, %v1478_v19, -inf }
 0x2d2   : > { %v1699_v25 = vsel %vm1579_vm13, %v1488_v23, -inf  ;;  %v1700_v17 = vsel %vm1579_vm13, %v1489_v24, -inf  ;;  %v1486_v11 = vmax.f32 %v1049_v34, 0.0  ;;  %v1753_v16 = vmax.f32 %v1752_v55, %v1689_v6 }
 0x2d3   : > { %v1496_v18 = vmax.f32 %v1149_v46, 0.0  ;;  %v1497_v51 = vmax.f32 %v1198_v47, 0.0  ;;  %v1784_v43 = vmax.f32 %v1783_v2, %v1699_v25  ;;  %v3145_v55 = vadd.s32 %v2850_v41, %v1549_v29 }
 0x2d4   : > { %v1697_v14 = vsel %vm1579_vm13, %v1486_v11, -inf  ;;  %v1550_v2 = vadd.s32 120, %v2837_v32 }
 0x2d5   : > { %v1050_v33 = vpop.f32.mrf.mxu2  ;;  %v1099_v57 = vpop.f32.mrf.mxu3  ;;  %v1754_v44 = vmax.f32 %v1753_v16, %v1697_v14  ;;  %vm1583_vm2 = vcmp.lt.s32.totalorder %v3145_v55, 500 }
 0x2d6   : > { %v1051_v60 = vadd.f32 %v1050_v33, %v2845_v38  ;;  %v1100_v15 = vadd.f32 %v1099_v57, %v2866_v54  ;;  %v1698_v33 = vsel %vm1579_vm13, %v1487_v12, -inf  ;;  %v1707_v57 = vsel %vm1580_vm14, %v1496_v18, -inf }
 0x2d7   : > { %v1769_v46 = vmax.f32 %v1768_v42, %v1698_v33 }
 0x2d8   : > { %v1151_v7 = vpop.f32.mrf.mxu0  ;;  %v1200_v0 = vpop.f32.mrf.mxu1  ;;  %v1495_v19 = vmax.f32 %v1100_v15, 0.0 }
 0x2d9   : > { %v1152_v61 = vadd.f32 %v1151_v7, %v2842_v37  ;;  %v1201_v62 = vadd.f32 %v1200_v0, %v2848_v39  ;;  %v1708_v7 = vsel %vm1580_vm14, %v1497_v51, -inf }
 0x2da   : > { %1248 = vmatmul.bf16.gmra.mxu2 %v2815_v21  ;;  %1297 = vmatmul.bf16.gmra.mxu3 %v2815_v21  ;;  %v1706_v25 = vsel %vm1580_vm14, %v1495_v19, -inf }
 0x2db   : > { %1346 = vmatmul.bf16.gmra.mxu0 %v2815_v21  ;;  %1395 = vmatmul.bf16.gmra.mxu1 %v2815_v21  ;;  %v1798_v21 = vmax.f32 %v1797_v20, %v1692_v26  ;;  %v1494_v26 = vmax.f32 %v1051_v60, 0.0  ;;  %v1504_v22 = vmax.f32 %v1152_v61, 0.0  ;;  %v1505_v49 = vmax.f32 %v1201_v62, 0.0 }
 0x2dc   : > { %v1770_v62 = vmax.f32 %v1769_v46, %v1706_v25 }
 0x2dd   : > { %v1053_v48 = vpop.f32.mrf.mxu2  ;;  %v1102_v53 = vpop.f32.mrf.mxu3  ;;  %v1799_v20 = vmax.f32 %v1798_v21, %v1700_v17  ;;  %v1785_v21 = vmax.f32 %v1784_v43, %v1707_v57  ;;  %v1715_v17 = vsel %vm1581_vm15, %v1504_v22, -inf  ;;  %v3165_v43 = vadd.s32 %v2850_v41, %v1550_v2 }
 0x2de   : > { %v1054_v23 = vadd.f32 %v1053_v48, %v2845_v38  ;;  %v1103_v24 = vadd.f32 %v1102_v53, %v2866_v54  ;;  %v1705_v53 = vsel %vm1580_vm14, %v1494_v26, -inf }
 0x2df   : > { %v1800_v6 = vmax.f32 %v1799_v20, %v1708_v7  ;;  %v1755_v61 = vmax.f32 %v1754_v44, %v1705_v53  ;;  %v1786_v20 = vmax.f32 %v1785_v21, %v1715_v17  ;;  %vm1584_vm0 = vcmp.lt.s32.totalorder %v3165_v43, 500 }
 0x2e0   : > { %v1153_v58 = vpop.f32.mrf.mxu0  ;;  %v1202_v8 = vpop.f32.mrf.mxu1  ;;  %v1502_v32 = vmax.f32 %v1054_v23, 0.0 }
 0x2e1   : > { %v1154_v30 = vadd.f32 %v1153_v58, %v2842_v37  ;;  %v1203_v34 = vadd.f32 %v1202_v8, %v2848_v39  ;;  %v1716_v58 = vsel %vm1581_vm15, %v1505_v49, -inf  ;;  %v1503_v8 = vmax.f32 %v1103_v24, 0.0 }
 0x2e2   : > { %v1801_v29 = vmax.f32 %v1800_v6, %v1716_v58  ;;  %v1713_v57 = vsel %vm1581_vm15, %v1502_v32, -inf  ;;  %v1867_v58 = vld [vmem:[#allocation2 + $0x18] sm:$0xff] }
 0x2e3   : > { %v1512_v11 = vmax.f32 %v1154_v30, 0.0  ;;  %v1513_v12 = vmax.f32 %v1203_v34, 0.0  ;;  %v1714_v7 = vsel %vm1581_vm15, %v1503_v8, -inf  ;;  %v1868_v8 = vld [vmem:[#allocation2 + $0x10] sm:$0xff] }
 0x2e4   : > { %v1771_v2 = vmax.f32 %v1770_v62, %v1714_v7  ;;  %v3199_v7 = vperm.slane %v2835_v63, 6 }
 0x2e5   : > { %v1055_v0 = vpop.f32.mrf.mxu2  ;;  %v1104_v27 = vpop.f32.mrf.mxu3 }
 0x2e6   : > { %v1056_v18 = vadd.f32 %v1055_v0, %v2845_v38  ;;  %v1105_v51 = vadd.f32 %v1104_v27, %v2866_v54  ;;  %v1723_v0 = vsel %vm1582_vm1, %v1512_v11, -inf  ;;  %v1724_v27 = vsel %vm1582_vm1, %v1513_v12, -inf }
 0x2e7   : > { %v1787_v46 = vmax.f32 %v1786_v20, %v1723_v0  ;;  %v3202_v0 = vperm.slane %v2835_v63, 7 }
 0x2e8   : > { %v1156_v47 = vpop.f32.mrf.mxu0  ;;  %v1205_v1 = vpop.f32.mrf.mxu1  ;;  %v1510_v41 = vmax.f32 %v1056_v18, 0.0  ;;  %v1511_v26 = vmax.f32 %v1105_v51, 0.0 }
 0x2e9   : > { %v1157_v10 = vadd.f32 %v1156_v47, %v2842_v37  ;;  %v1206_v48 = vadd.f32 %v1205_v1, %v2848_v39  ;;  %v1802_v47 = vmax.f32 %v1801_v29, %v1724_v27  ;;  %v1756_v1 = vmax.f32 %v1755_v61, %v1713_v57 }
 0x2ea   : > { %1253 = vmatmul.bf16.gmra.mxu2 %v2826_v28  ;;  %1302 = vmatmul.bf16.gmra.mxu3 %v2826_v28 }
 0x2eb   : > { %1351 = vmatmul.bf16.gmra.mxu0 %v2826_v28  ;;  %v1520_v60 = vmax.f32 %v1157_v10, 0.0  ;;  %v1521_v15 = vmax.f32 %v1206_v48, 0.0  ;;  %v1721_v10 = vsel %vm1582_vm1, %v1510_v41, -inf  ;;  %v1722_v48 = vsel %vm1582_vm1, %v1511_v26, -inf  ;;  %v1866_v26 = vld [vmem:[#allocation2] sm:$0xff] }
 0x2ec   : > { %v1757_v61 = vmax.f32 %v1756_v1, %v1721_v10  ;;  %v1772_v62 = vmax.f32 %v1771_v2, %v1722_v48 }
 0x2ed   : > { %v1058_v16 = vpop.f32.mrf.mxu2  ;;  %v1107_v42 = vpop.f32.mrf.mxu3  ;;  %v1731_v19 = vsel %vm1583_vm2, %v1520_v60, -inf  ;;  %v1732_v22 = vsel %vm1583_vm2, %v1521_v15, -inf }
 0x2ee   : > { %v1059_v14 = vadd.f32 %v1058_v16, %v2845_v38  ;;  %v1108_v33 = vadd.f32 %v1107_v42, %v2866_v54  ;;  %v1788_v53 = vmax.f32 %v1787_v46, %v1731_v19  ;;  %v1803_v25 = vmax.f32 %v1802_v47, %v1732_v22 }
 0x2ef   : > { %v3215_v47 = vperm.slane %v2835_v63, 5 }
 0x2f0   : > { %v1158_v49 = vpop.f32.mrf.mxu0  ;;  %v1207_v23 = vpop.f32.mrf.mxu1  ;;  %v1518_v24 = vmax.f32 %v1059_v14, 0.0  ;;  %v1519_v30 = vmax.f32 %v1108_v33, 0.0 }
 0x2f1   : > { %v1159_v34 = vadd.f32 %v1158_v49, %v2842_v37  ;;  %v1208_v44 = vadd.f32 %v1207_v23, %v2848_v39 }
 0x2f2   : > { %v1729_v37 = vsel %vm1583_vm2, %v1518_v24, -inf  ;;  %v1730_v39 = vsel %vm1583_vm2, %v1519_v30, -inf }
 0x2f3   : > { %v1528_v21 = vmax.f32 %v1159_v34, 0.0  ;;  %v1529_v6 = vmax.f32 %v1208_v44, 0.0  ;;  %v1758_v33 = vmax.f32 %v1757_v61, %v1729_v37  ;;  %v1773_v57 = vmax.f32 %v1772_v62, %v1730_v39 }
 0x2f4   : > { %v3212_v44 = vperm.slane %v2835_v63, 4 }
 0x2f5   : > { %v1739_v17 = vsel %vm1584_vm0, %v1528_v21, -inf  ;;  %v1740_v32 = vsel %vm1584_vm0, %v1529_v6, -inf  ;;  %v1060_v11 = vpop.f32.mrf.mxu2  ;;  %v1109_v12 = vpop.f32.mrf.mxu3 }
 0x2f6   : > { %v1789_v18 = vmax.f32 %v1788_v53, %v1739_v17  ;;  %v1804_v51 = vmax.f32 %v1803_v25, %v1740_v32  ;;  %v1061_v60 = vadd.f32 %v1060_v11, %v2845_v38  ;;  %v1110_v15 = vadd.f32 %v1109_v12, %v2866_v54  ;;  %v1865_v54 = vld [vmem:[#allocation2 + $0x30] sm:$0xff] }
 0x2f8   : > { %v1875_v16 = vmax.f32 %v1867_v58, %v1789_v18  ;;  %v1876_v42 = vmax.f32 %v1868_v8, %v1804_v51  ;;  %v1526_v20 = vmax.f32 %v1061_v60, 0.0  ;;  %v1527_v29 = vmax.f32 %v1110_v15, 0.0  ;;  %v1317_v14 = vpop.f32.mrf.mxu0  ;;  %v1366_v27 = vpop.f32.mrf.mxu1 }
 0x2f9   : > { %v1318_v24 = vadd.f32 %v1317_v14, %v3199_v7  ;;  %v1367_v30 = vadd.f32 %v1366_v27, %v3202_v0 }
 0x2fa   : > { %1883 = vst [vmem:[#allocation2 + $0x18] sm:$0xff] %v1875_v16  ;;  %v1737_v38 = vsel %vm1584_vm0, %v1526_v20, -inf  ;;  %v1738_v41 = vsel %vm1584_vm0, %v1527_v29, -inf  ;;  %1400 = vmatmul.bf16.vlgmr.msrb.gmra.mxu3 %v2826_v28 }
 0x2fb   : > { %1884 = vst [vmem:[#allocation2 + $0x10] sm:$0xff] %v1876_v42  ;;  %v1759_v19 = vmax.f32 %v1758_v33, %v1737_v38  ;;  %v1774_v22 = vmax.f32 %v1773_v57, %v1738_v41  ;;  %v1412_v2 = vmax.f32 %v1318_v24, 0.0  ;;  %v1413_v21 = vmax.f32 %v1367_v30, 0.0 }
 0x2fd   : > { %v1873_v49 = vmax.f32 %v1865_v54, %v1759_v19  ;;  %v1874_v23 = vmax.f32 %v1866_v26, %v1774_v22  ;;  %v1219_v34 = vpop.f32.mrf.mxu2  ;;  %v1268_v46 = vpop.f32.mrf.mxu3  ;;  %v1623_v39 = vsel %vm1569_vm4, %v1412_v2, -inf  ;;  %v1624_v63 = vsel %vm1569_vm4, %v1413_v21, -inf }
 0x2fe   : > { %v1220_v10 = vadd.f32 %v1219_v34, %v3212_v44  ;;  %v1269_v53 = vadd.f32 %v1268_v46, %v3215_v47 }
 0x2ff   : > { %1881 = vst [vmem:[#allocation2 + $0x30] sm:$0xff] %v1873_v49 }
 0x300   : > { %1882 = vst [vmem:[#allocation2] sm:$0xff] %v1874_v23  ;;  %v1319_v1 = vpop.f32.mrf.mxu0  ;;  %v1368_v6 = vpop.f32.mrf.mxu1  ;;  %v1410_v32 = vmax.f32 %v1220_v10, 0.0  ;;  %v1411_v51 = vmax.f32 %v1269_v53, 0.0 }
 0x301   : > { %v1320_v28 = vadd.f32 %v1319_v1, %v3199_v7  ;;  %v1369_v48 = vadd.f32 %v1368_v6, %v3202_v0 }
 0x302   : > { %v1621_v29 = vsel %vm1569_vm4, %v1410_v32, -inf  ;;  %v1622_v57 = vsel %vm1569_vm4, %v1411_v51, -inf }
 0x303   : > { %v1420_v25 = vmax.f32 %v1320_v28, 0.0  ;;  %v1421_v37 = vmax.f32 %v1369_v48, 0.0 }
 0x305   : > { %v1631_v17 = vsel %vm1570_vm3, %v1420_v25, -inf  ;;  %v1221_v58 = vpop.f32.mrf.mxu2  ;;  %v1632_v11 = vsel %vm1570_vm3, %v1421_v37, -inf  ;;  %v1270_v18 = vpop.f32.mrf.mxu3 }
 0x306   : > { %v1835_v8 = vmax.f32 %v1623_v39, %v1631_v17  ;;  %v1222_v12 = vadd.f32 %v1221_v58, %v3212_v44  ;;  %v1850_v60 = vmax.f32 %v1624_v63, %v1632_v11  ;;  %v1271_v15 = vadd.f32 %v1270_v18, %v3215_v47 }
 0x308   : > { %v1418_v61 = vmax.f32 %v1222_v12, 0.0  ;;  %v1322_v62 = vpop.f32.mrf.mxu0  ;;  %v1419_v16 = vmax.f32 %v1271_v15, 0.0  ;;  %v1371_v20 = vpop.f32.mrf.mxu1 }
 0x309   : > { %v1323_v42 = vadd.f32 %v1322_v62, %v3199_v7  ;;  %v1372_v33 = vadd.f32 %v1371_v20, %v3202_v0 }
 0x30a   : > { %v1629_v14 = vsel %vm1570_vm3, %v1418_v61, -inf  ;;  %v1630_v38 = vsel %vm1570_vm3, %v1419_v16, -inf }
 0x30b   : > { %v1805_v27 = vmax.f32 %v1621_v29, %v1629_v14  ;;  %v1428_v54 = vmax.f32 %v1323_v42, 0.0  ;;  %v1820_v41 = vmax.f32 %v1622_v57, %v1630_v38  ;;  %v1429_v26 = vmax.f32 %v1372_v33, 0.0 }
 0x30d   : > { %v1639_v19 = vsel %vm1571_vm5, %v1428_v54, -inf  ;;  %v1224_v22 = vpop.f32.mrf.mxu2  ;;  %v1640_v23 = vsel %vm1571_vm5, %v1429_v26, -inf  ;;  %v1273_v30 = vpop.f32.mrf.mxu3 }
 0x30e   : > { %v1836_v49 = vmax.f32 %v1835_v8, %v1639_v19  ;;  %v1225_v24 = vadd.f32 %v1224_v22, %v3212_v44  ;;  %v3246_v52 = vmax.f32 %v1850_v60, %v1640_v23  ;;  %v1274_v34 = vadd.f32 %v1273_v30, %v3215_v47 }
 0x310   : > { %v1426_v45 = vmax.f32 %v1225_v24, 0.0  ;;  %v1324_v46 = vpop.f32.mrf.mxu0  ;;  %v1427_v1 = vmax.f32 %v1274_v34, 0.0  ;;  %v1373_v39 = vpop.f32.mrf.mxu1 }
 0x311   : > { %v1325_v2 = vadd.f32 %v1324_v46, %v3199_v7 }
 0x312   : > { %v1637_v21 = vsel %vm1571_vm5, %v1426_v45, -inf  ;;  %v1638_v6 = vsel %vm1571_vm5, %v1427_v1, -inf }
 0x313   : > { %v1806_v28 = vmax.f32 %v1805_v27, %v1637_v21  ;;  %v1436_v10 = vmax.f32 %v1325_v2, 0.0  ;;  %v1821_v48 = vmax.f32 %v1820_v41, %v1638_v6 }
 0x315   : > { %v1647_v53 = vsel %vm1572_vm6, %v1436_v10, -inf  ;;  %v1226_v25 = vpop.f32.mrf.mxu2  ;;  %v1275_v17 = vpop.f32.mrf.mxu3 }
 0x316   : > { %v1837_v37 = vmax.f32 %v1836_v49, %v1647_v53  ;;  %v1227_v63 = vadd.f32 %v1226_v25, %v3212_v44  ;;  %v1276_v58 = vadd.f32 %v1275_v17, %v3215_v47 }
 0x318   : > { %v1434_v32 = vmax.f32 %v1227_v63, 0.0  ;;  %v1327_v8 = vpop.f32.mrf.mxu0  ;;  %v1435_v11 = vmax.f32 %v1276_v58, 0.0  ;;  %v1376_v14 = vpop.f32.mrf.mxu1  ;;  %v1374_v63 = vadd.f32 %v1373_v39, %v3202_v0 }
 0x319   : > { %v1328_v12 = vadd.f32 %v1327_v8, %v3199_v7 }
 0x31a   : > { %v1645_v59 = vsel %vm1572_vm6, %v1434_v32, -inf  ;;  %v1646_v51 = vsel %vm1572_vm6, %v1435_v11, -inf  ;;  %v1377_v32 = vadd.f32 %v1376_v14, %v3202_v0 }
 0x31b   : > { %v1807_v18 = vmax.f32 %v1806_v28, %v1645_v59  ;;  %v1444_v60 = vmax.f32 %v1328_v12, 0.0  ;;  %v1822_v15 = vmax.f32 %v1821_v48, %v1646_v51  ;;  %v1437_v12 = vmax.f32 %v1374_v63, 0.0 }
 0x31d   : > { %v1655_v61 = vsel %vm1573_vm7, %v1444_v60, -inf  ;;  %v1229_v62 = vpop.f32.mrf.mxu2  ;;  %v1278_v20 = vpop.f32.mrf.mxu3  ;;  %v1445_v60 = vmax.f32 %v1377_v32, 0.0 }
 0x31e   : > { %v3265_v16 = vmax.f32 %v1837_v37, %v1655_v61  ;;  %v1230_v42 = vadd.f32 %v1229_v62, %v3212_v44  ;;  %v1279_v29 = vadd.f32 %v1278_v20, %v3215_v47  ;;  %v1648_v62 = vsel %vm1572_vm6, %v1437_v12, -inf }
 0x31f   : > { %v1852_v50 = vmax.f32 %v3246_v52, %v1648_v62 }
 0x320   : > { %v1442_v33 = vmax.f32 %v1230_v42, 0.0  ;;  %v1329_v57 = vpop.f32.mrf.mxu0  ;;  %v1443_v27 = vmax.f32 %v1279_v29, 0.0  ;;  %v1378_v23 = vpop.f32.mrf.mxu1 }
 0x321   : > { %v1330_v8 = vadd.f32 %v1329_v57, %v3199_v7  ;;  %v1379_v59 = vadd.f32 %v1378_v23, %v3202_v0  ;;  %v1656_v57 = vsel %vm1573_vm7, %v1445_v60, -inf }
 0x322   : > { %v1653_v38 = vsel %vm1573_vm7, %v1442_v33, -inf  ;;  %v1654_v41 = vsel %vm1573_vm7, %v1443_v27, -inf  ;;  %v3318_v32 = vmax.f32 %v1852_v50, %v1656_v57 }
 0x323   : > { %v3271_v54 = vmax.f32 %v1807_v18, %v1653_v38  ;;  %v3275_v26 = vmax.f32 %v1822_v15, %v1654_v41  ;;  %v1452_v15 = vmax.f32 %v1330_v8, 0.0  ;;  %v1453_v42 = vmax.f32 %v1379_v59, 0.0 }
 0x325   : > { %v1231_v19 = vpop.f32.mrf.mxu2  ;;  %v1280_v22 = vpop.f32.mrf.mxu3  ;;  %v1663_v27 = vsel %vm1574_vm8, %v1452_v15, -inf }
 0x326   : > { %v1232_v18 = vadd.f32 %v1231_v19, %v3212_v44  ;;  %v1281_v39 = vadd.f32 %v1280_v22, %v3215_v47  ;;  %v1839_v8 = vmax.f32 %v3265_v16, %v1663_v27 }
 0x328   : > { %v1332_v49 = vpop.f32.mrf.mxu0  ;;  %v1381_v45 = vpop.f32.mrf.mxu1  ;;  %v1450_v14 = vmax.f32 %v1232_v18, 0.0  ;;  %v1451_v38 = vmax.f32 %v1281_v39, 0.0 }
 0x329   : > { %v1333_v61 = vadd.f32 %v1332_v49, %v3199_v7  ;;  %v1382_v22 = vadd.f32 %v1381_v45, %v3202_v0 }
 0x32a   : > { %v1661_v52 = vsel %vm1574_vm8, %v1450_v14, -inf }
 0x32b   : > { %v1460_v19 = vmax.f32 %v1333_v61, 0.0  ;;  %v1461_v18 = vmax.f32 %v1382_v22, 0.0 }
 0x32d   : > { %v1234_v24 = vpop.f32.mrf.mxu2  ;;  %v1283_v30 = vpop.f32.mrf.mxu3 }
 0x32e   : > { %v1235_v20 = vadd.f32 %v1234_v24, %v3212_v44  ;;  %v1284_v41 = vadd.f32 %v1283_v30, %v3215_v47  ;;  %v3315_v24 = vsel %vm1574_vm8, %v1453_v42, -inf  ;;  %v1662_v30 = vsel %vm1574_vm8, %v1451_v38, -inf }
 0x32f   : > { %v1854_v59 = vmax.f32 %v3318_v32, %v3315_v24  ;;  %v1824_v62 = vmax.f32 %v3275_v26, %v1662_v30 }
 0x330   : > { %v1334_v34 = vpop.f32.mrf.mxu0  ;;  %v1383_v28 = vpop.f32.mrf.mxu1  ;;  %v1458_v5 = vmax.f32 %v1235_v20, 0.0  ;;  %v1459_v45 = vmax.f32 %v1284_v41, 0.0 }
 0x331   : > { %v1335_v49 = vadd.f32 %v1334_v34, %v3199_v7  ;;  %v3340_v42 = vadd.f32 %v1383_v28, %v3202_v0 }
 0x332   : > { %v1669_v15 = vsel %vm1575_vm9, %v1458_v5, -inf  ;;  %v1670_v57 = vsel %vm1575_vm9, %v1459_v45, -inf }
 0x333   : > { %v1468_v60 = vmax.f32 %v1335_v49, 0.0  ;;  %v1825_v49 = vmax.f32 %v1824_v62, %v1670_v57 }
 0x335   : > { %v1236_v46 = vpop.f32.mrf.mxu2  ;;  %v1285_v1 = vpop.f32.mrf.mxu3  ;;  %v1679_v26 = vsel %vm1576_vm10, %v1468_v60, -inf }
 0x336   : > { %v1237_v63 = vadd.f32 %v1236_v46, %v3212_v44  ;;  %v1286_v34 = vadd.f32 %v1285_v1, %v3215_v47  ;;  %v1671_v46 = vsel %vm1575_vm9, %v1460_v19, -inf }
 0x337   : > { %v1840_v41 = vmax.f32 %v1839_v8, %v1671_v46 }
 0x338   : > { %v1337_v2 = vpop.f32.mrf.mxu0  ;;  %v3279_v25 = vpop.f32.mrf.mxu1  ;;  %v1466_v13 = vmax.f32 %v1237_v63, 0.0  ;;  %v1467_v27 = vmax.f32 %v1286_v34, 0.0 }
 0x339   : > { %v1338_v12 = vadd.f32 %v1337_v2, %v3199_v7  ;;  %v1809_v2 = vmax.f32 %v3271_v54, %v1661_v52  ;;  %v1841_v45 = vmax.f32 %v1840_v41, %v1679_v26 }
 0x33a   : > { %v1678_v63 = vsel %vm1576_vm10, %v1467_v27, -inf }
 0x33b   : > { %v1476_v38 = vmax.f32 %v1338_v12, 0.0  ;;  %v1810_v54 = vmax.f32 %v1809_v2, %v1669_v15 }
 0x33d   : > { %v1239_v21 = vpop.f32.mrf.mxu2  ;;  %v1288_v6 = vpop.f32.mrf.mxu3  ;;  %v1687_v8 = vsel %vm1577_vm11, %v1476_v38, -inf }
 0x33e   : > { %v1240_v39 = vadd.f32 %v1239_v21, %v3212_v44  ;;  %v1289_v1 = vadd.f32 %v1288_v6, %v3215_v47  ;;  %v3348_v6 = vsel %vm1575_vm9, %v1461_v18, -inf }
 0x340   : > { %v1339_v10 = vpop.f32.mrf.mxu0  ;;  %v3294_v51 = vpop.f32.mrf.mxu1  ;;  %v1474_v50 = vmax.f32 %v1240_v39, 0.0  ;;  %v1475_v19 = vmax.f32 %v1289_v1, 0.0 }
 0x341   : > { %v1340_v20 = vadd.f32 %v1339_v10, %v3199_v7  ;;  %v1677_v10 = vsel %vm1576_vm10, %v1466_v13, -inf  ;;  %v1842_v13 = vmax.f32 %v1841_v45, %v1687_v8 }
 0x342   : > { %v1811_v34 = vmax.f32 %v1810_v54, %v1677_v10  ;;  %v1686_v46 = vsel %vm1577_vm11, %v1475_v19, -inf }
 0x343   : > { %v1484_v5 = vmax.f32 %v1340_v20, 0.0 }
 0x345   : > { %v1241_v48 = vpop.f32.mrf.mxu2  ;;  %v3277_v53 = vpop.f32.mrf.mxu3  ;;  %v1695_v39 = vsel %vm1578_vm12, %v1484_v5, -inf }
 0x346   : > { %v1242_v21 = vadd.f32 %v1241_v48, %v3212_v44  ;;  %v1469_v48 = vmax.f32 %v3340_v42, 0.0  ;;  %v1291_v4 = vadd.f32 %v3277_v53, %v3215_v47  ;;  %v1685_v53 = vsel %vm1577_vm11, %v1474_v50, -inf }
 0x348   : > { %v3281_v37 = vpop.f32.mrf.mxu0  ;;  %v3331_v16 = vpop.f32.mrf.mxu1  ;;  %v1482_v52 = vmax.f32 %v1242_v21, 0.0 }
 0x349   : > { %v1343_v22 = vadd.f32 %v3281_v37, %v3199_v7  ;;  %v3367_v37 = vadd.f32 %v3279_v25, %v3202_v0  ;;  %v1483_v25 = vmax.f32 %v1291_v4, 0.0 }
 0x34b   : > { %v1492_v18 = vmax.f32 %v1343_v22, 0.0 }
 0x34d   : > { %v3284_v17 = vpop.f32.mrf.mxu2  ;;  %v3286_v58 = vpop.f32.mrf.mxu3  ;;  %v1703_v54 = vsel %vm1579_vm13, %v1492_v18, -inf }
 0x34e   : > { %v1245_v12 = vadd.f32 %v3284_v17, %v3212_v44  ;;  %v1693_v17 = vsel %vm1578_vm12, %v1482_v52, -inf  ;;  %v1294_v62 = vadd.f32 %v3286_v58, %v3215_v47  ;;  %v1843_v58 = vmax.f32 %v1842_v13, %v1695_v39 }
 0x350   : > { %v3290_v11 = vpop.f32.mrf.mxu0  ;;  %v3378_v1 = vpop.f32.mrf.mxu1  ;;  %v1490_v38 = vmax.f32 %v1245_v12, 0.0 }
 0x351   : > { %v1345_v30 = vadd.f32 %v3290_v11, %v3199_v7  ;;  %v1826_v11 = vmax.f32 %v1825_v49, %v1678_v63  ;;  %v1491_v49 = vmax.f32 %v1294_v62, 0.0  ;;  %v1844_v63 = vmax.f32 %v1843_v58, %v1703_v54 }
 0x353   : > { %v1500_v20 = vmax.f32 %v1345_v30, 0.0  ;;  %v1827_v27 = vmax.f32 %v1826_v11, %v1686_v46  ;;  %v1702_v11 = vsel %vm1579_vm13, %v1491_v49, -inf }
 0x355   : > { %v3301_v29 = vpop.f32.mrf.mxu2  ;;  %v3303_v33 = vpop.f32.mrf.mxu3 }
 0x356   : > { %v1247_v21 = vadd.f32 %v3301_v29, %v3212_v44  ;;  %v1296_v26 = vadd.f32 %v3303_v33, %v3215_v47  ;;  %v1711_v29 = vsel %vm1580_vm14, %v1500_v20, -inf  ;;  %v1701_v33 = vsel %vm1579_vm13, %v1490_v38, -inf }
 0x357   : > { %v1845_v46 = vmax.f32 %v1844_v63, %v1711_v29 }
 0x358   : > { %v1347_v23 = vpop.f32.mrf.mxu0  ;;  %v1498_v8 = vmax.f32 %v1247_v21, 0.0  ;;  %v1499_v30 = vmax.f32 %v1296_v26, 0.0  ;;  %v1396_v62 = vpop.f32.mrf.mxu1 }
 0x359   : > { %v1348_v60 = vadd.f32 %v1347_v23, %v3199_v7  ;;  %v1812_v23 = vmax.f32 %v1811_v34, %v1685_v53 }
 0x35b   : > { %v1508_v10 = vmax.f32 %v1348_v60, 0.0  ;;  %v1813_v19 = vmax.f32 %v1812_v23, %v1693_v17  ;;  %v1710_v23 = vsel %vm1580_vm14, %v1499_v30, -inf }
 0x35d   : > { %v1249_v61 = vpop.f32.mrf.mxu2  ;;  %v1298_v14 = vpop.f32.mrf.mxu3  ;;  %v1719_v45 = vsel %vm1581_vm15, %v1508_v10, -inf }
 0x35e   : > { %v1250_v22 = vadd.f32 %v1249_v61, %v3212_v44  ;;  %v1299_v5 = vadd.f32 %v1298_v14, %v3215_v47  ;;  %v1846_v17 = vmax.f32 %v1845_v46, %v1719_v45 }
 0x360   : > { %v1349_v28 = vpop.f32.mrf.mxu0  ;;  %v1506_v18 = vmax.f32 %v1250_v22, 0.0  ;;  %v1507_v13 = vmax.f32 %v1299_v5, 0.0  ;;  %v1477_v22 = vmax.f32 %v3367_v37, 0.0  ;;  %v1398_v42 = vpop.f32.mrf.mxu1 }
 0x361   : > { %v1350_v57 = vadd.f32 %v1349_v28, %v3199_v7  ;;  %v1694_v28 = vsel %vm1578_vm12, %v1483_v25, -inf  ;;  %v1814_v25 = vmax.f32 %v1813_v19, %v1701_v33 }
 0x362   : > { %v1828_v53 = vmax.f32 %v1827_v27, %v1694_v28  ;;  %v1717_v54 = vsel %vm1581_vm15, %v1506_v18, -inf  ;;  %v1718_v58 = vsel %vm1581_vm15, %v1507_v13, -inf  ;;  %v1680_v18 = vsel %vm1576_vm10, %v1469_v48, -inf }
 0x363   : > { %v1516_v4 = vmax.f32 %v1350_v57, 0.0 }
 0x365   : > { %v1251_v15 = vpop.f32.mrf.mxu2  ;;  %v1300_v2 = vpop.f32.mrf.mxu3 }
 0x366   : > { %v1252_v52 = vadd.f32 %v1251_v15, %v3212_v44  ;;  %v1301_v61 = vadd.f32 %v1300_v2, %v3215_v47  ;;  %v1727_v15 = vsel %vm1582_vm1, %v1516_v4, -inf  ;;  %v1709_v2 = vsel %vm1580_vm14, %v1498_v8, -inf  ;;  %v1871_v8 = vld [vmem:[#allocation2 + $0x28] sm:$0xff] }
 0x367   : > { %v1847_v26 = vmax.f32 %v1846_v17, %v1727_v15 }
 0x368   : > { %v1352_v41 = vpop.f32.mrf.mxu0  ;;  %v1514_v20 = vmax.f32 %v1252_v52, 0.0  ;;  %v1515_v27 = vmax.f32 %v1301_v61, 0.0 }
 0x369   : > { %v1353_v50 = vadd.f32 %v1352_v41, %v3199_v7  ;;  %v1829_v41 = vmax.f32 %v1828_v53, %v1702_v11 }
 0x36a   : > { %v1725_v29 = vsel %vm1582_vm1, %v1514_v20, -inf  ;;  %v1726_v63 = vsel %vm1582_vm1, %v1515_v27, -inf }
 0x36b   : > { %v1524_v34 = vmax.f32 %v1353_v50, 0.0  ;;  %v1815_v50 = vmax.f32 %v1814_v25, %v1709_v2  ;;  %v1830_v49 = vmax.f32 %v1829_v41, %v1710_v23  ;;  %v1869_v25 = vld [vmem:[#allocation2 + $0x8] sm:$0xff] }
 0x36d   : > { %v1254_v12 = vpop.f32.mrf.mxu2  ;;  %v1303_v60 = vpop.f32.mrf.mxu3  ;;  %v1735_v38 = vsel %vm1583_vm2, %v1524_v34, -inf  ;;  %v1816_v4 = vmax.f32 %v1815_v50, %v1717_v54  ;;  %v1831_v30 = vmax.f32 %v1830_v49, %v1718_v58 }
 0x36e   : > { %v1255_v14 = vadd.f32 %v1254_v12, %v3212_v44  ;;  %v1304_v39 = vadd.f32 %v1303_v60, %v3215_v47  ;;  %v1848_v5 = vmax.f32 %v1847_v26, %v1735_v38 }
 0x36f   : > { %v1817_v12 = vmax.f32 %v1816_v4, %v1725_v29 }
 0x370   : > { %v1354_v57 = vpop.f32.mrf.mxu0  ;;  %v1522_v10 = vmax.f32 %v1255_v14, 0.0  ;;  %v1523_v19 = vmax.f32 %v1304_v39, 0.0  ;;  %v1832_v14 = vmax.f32 %v1831_v30, %v1726_v63  ;;  %v1855_v39 = vmax.f32 %v1854_v59, %v3348_v6 }
 0x371   : > { %v1355_v21 = vadd.f32 %v1354_v57, %v3199_v7  ;;  %v1389_v7 = vadd.f32 %v3294_v51, %v3202_v0  ;;  %v1392_v51 = vadd.f32 %v3331_v16, %v3202_v0  ;;  %v1870_v57 = vld [vmem:[#allocation2 + $0x20] sm:$0xff]  ;;  %v1399_v6 = vadd.f32 %v1398_v42, %v3202_v0 }
 0x372   : > { %v1733_v37 = vsel %vm1583_vm2, %v1522_v10, -inf  ;;  %v1734_v53 = vsel %vm1583_vm2, %v1523_v19, -inf  ;;  %v1856_v24 = vmax.f32 %v1855_v39, %v1680_v18 }
 0x373   : > { %v1532_v28 = vmax.f32 %v1355_v21, 0.0  ;;  %v1485_v13 = vmax.f32 %v1389_v7, 0.0  ;;  %v1818_v15 = vmax.f32 %v1817_v12, %v1733_v37  ;;  %v1833_v31 = vmax.f32 %v1832_v14, %v1734_v53 }
 0x374   : > { %v1493_v2 = vmax.f32 %v1392_v51, 0.0  ;;  %v1517_v10 = vmax.f32 %v1399_v6, 0.0 }
 0x375   : > { %v1743_v33 = vsel %vm1584_vm0, %v1532_v28, -inf  ;;  %v1256_v52 = vpop.f32.mrf.mxu2  ;;  %v1305_v34 = vpop.f32.mrf.mxu3  ;;  %v1696_v35 = vsel %vm1578_vm12, %v1485_v13, -inf }
 0x376   : > { %v1849_v45 = vmax.f32 %v1848_v5, %v1743_v33  ;;  %v1257_v61 = vadd.f32 %v1256_v52, %v3212_v44  ;;  %v1306_v46 = vadd.f32 %v1305_v34, %v3215_v47  ;;  %v1394_v44 = vadd.f32 %v3378_v1, %v3202_v0 }
 0x377   : > { %v1688_v47 = vsel %vm1577_vm11, %v1477_v22, -inf  ;;  %v1397_v1 = vadd.f32 %v1396_v62, %v3202_v0  ;;  %v1704_v62 = vsel %vm1579_vm13, %v1493_v2, -inf  ;;  %v1728_v56 = vsel %vm1582_vm1, %v1517_v10, -inf }
 0x378   : > { %v1879_v60 = vmax.f32 %v1871_v8, %v1849_v45  ;;  %v1530_v11 = vmax.f32 %v1257_v61, 0.0  ;;  %v1531_v16 = vmax.f32 %v1306_v46, 0.0  ;;  %v1501_v59 = vmax.f32 %v1394_v44, 0.0 }
 0x379   : > { %v1857_v27 = vmax.f32 %v1856_v24, %v1688_v47  ;;  %v1509_v41 = vmax.f32 %v1397_v1, 0.0 }
 0x37a   : > { %1887 = vst [vmem:[#allocation2 + $0x28] sm:$0xff] %v1879_v60  ;;  %v1741_v48 = vsel %vm1584_vm0, %v1530_v11, -inf  ;;  %v1742_v20 = vsel %vm1584_vm0, %v1531_v16, -inf  ;;  %v1712_v36 = vsel %vm1580_vm14, %v1501_v59, -inf }
 0x37b   : > { %v1819_v17 = vmax.f32 %v1818_v15, %v1741_v48  ;;  %v1834_v32 = vmax.f32 %v1833_v31, %v1742_v20  ;;  %v1858_v26 = vmax.f32 %v1857_v27, %v1696_v35  ;;  %v1720_v58 = vsel %vm1581_vm15, %v1509_v41, -inf }
 0x37d   : > { %v1877_v23 = vmax.f32 %v1869_v25, %v1819_v17  ;;  %v1878_v38 = vmax.f32 %v1870_v57, %v1834_v32  ;;  %v1401_v21 = vpop.f32.mrf.mxu3  ;;  %v1859_v50 = vmax.f32 %v1858_v26, %v1704_v62 }
 0x37e   : > { %v1402_v54 = vadd.f32 %v1401_v21, %v3202_v0 }
 0x37f   : > { %1885 = vst [vmem:[#allocation2 + $0x8] sm:$0xff] %v1877_v23  ;;  %v1860_v28 = vmax.f32 %v1859_v50, %v1712_v36 }
 0x380   : > { %1886 = vst [vmem:[#allocation2 + $0x20] sm:$0xff] %v1878_v38  ;;  %v1525_v19 = vmax.f32 %v1402_v54, 0.0 }
 0x381   : > { %v1861_v22 = vmax.f32 %v1860_v28, %v1720_v58 }
 0x382   : > { %v1736_v29 = vsel %vm1583_vm2, %v1525_v19, -inf }
 0x383   : > { %v1862_v7 = vmax.f32 %v1861_v22, %v1728_v56 }
 0x385   : > { %v1403_v49 = vpop.f32.mrf.mxu3  ;;  %v1863_v4 = vmax.f32 %v1862_v7, %v1736_v29 }
 0x386   : > { %v1404_v5 = vadd.f32 %v1403_v49, %v3202_v0 }
 0x388   : > { %v1533_v40 = vmax.f32 %v1404_v5, 0.0 }
 0x38a   : > { %v1744_v63 = vsel %vm1584_vm0, %v1533_v40, -inf }
 0x38b   : > { %v1864_v33 = vmax.f32 %v1863_v4, %v1744_v63  ;;  %1892 = sbr.rel (%p2362_p11) target bundleno = 937 (0x3a9), region = 60 }
 0x38d   : > { %v1880_v8 = vmax.f32 %v1872_v9, %v1864_v33 }
 0x38f   : > { %1888 = vst [vmem:[#allocation2 + $0x38] sm:$0xff] %v1880_v8 }
 0x390   : > { %v1893_v3 = vld [vmem:[#allocation2 + $0x30] sm:$0xff]  ;;  %v1894_v52 = vld [vmem:[#allocation2] sm:$0xff]  ;;  %v1895_v30 = vld [vmem:[#allocation2 + $0x18] sm:$0xff]  ;;  %vm1964_vm0 = vcmask 1040384   ;;  %vm1966_vm3 = vcmask 1042434   ;;  %vm1968_vm4 = vcmask 1041408  }
 0x391   : > { %v1896_v55 = vld [vmem:[#allocation2 + $0x10] sm:$0xff]  ;;  %v1897_v37 = vld [vmem:[#allocation2 + $0x8] sm:$0xff]  ;;  %v1898_v45 = vld [vmem:[#allocation2 + $0x20] sm:$0xff]  ;;  %v1901_v0 = vrot.slane %v1893_v3, 4  ;;  %v1907_v61 = vrot.slane %v1894_v52, 4  ;;  %v1913_v34 = vrot.slane %v1895_v30, 4 }
 0x392   : > { %v1899_v51 = vld [vmem:[#allocation2 + $0x28] sm:$0xff]  ;;  %v1919_v43 = vrot.slane %v1896_v55, 4  ;;  %v1925_v53 = vrot.slane %v1897_v37, 4  ;;  %v1931_v46 = vrot.slane %v1898_v45, 4  ;;  %vm1970_vm5 = vcmask 1044484  }
 0x393   : > { %v1902_v18 = vmax.f32 %v1893_v3, %v1901_v0  ;;  %v1908_v14 = vmax.f32 %v1894_v52, %v1907_v61  ;;  %v1914_v60 = vmax.f32 %v1895_v30, %v1913_v34  ;;  %v1937_v11 = vrot.slane %v1899_v51, 4 }
 0x394   : > { %v1920_v13 = vmax.f32 %v1896_v55, %v1919_v43  ;;  %v1926_v44 = vmax.f32 %v1897_v37, %v1925_v53  ;;  %v1932_v15 = vmax.f32 %v1898_v45, %v1931_v46  ;;  %vm1972_vm6 = vcmask 1046534  }
 0x395   : > { %v1903_v39 = vrot.slane %v1902_v18, 2  ;;  %v1909_v47 = vrot.slane %v1908_v14, 2  ;;  %v1915_v42 = vrot.slane %v1914_v60, 2  ;;  %v1938_v31 = vmax.f32 %v1899_v51, %v1937_v11 }
 0x396   : > { %v1900_v12 = vld [vmem:[#allocation2 + $0x38] sm:$0xff]  ;;  %v1921_v48 = vrot.slane %v1920_v13, 2  ;;  %v1927_v25 = vrot.slane %v1926_v44, 2  ;;  %v1933_v2 = vrot.slane %v1932_v15, 2  ;;  %vm1974_vm7 = vcmask 1045508  }
 0x397   : > { %v1943_v16 = vrot.slane %v1900_v12, 4  ;;  %v1904_v17 = vmax.f32 %v1902_v18, %v1903_v39  ;;  %v1910_v20 = vmax.f32 %v1908_v14, %v1909_v47  ;;  %v1916_v57 = vmax.f32 %v1914_v60, %v1915_v42 }
 0x398   : > { %v1939_v24 = vrot.slane %v1938_v31, 2  ;;  %v1922_v32 = vmax.f32 %v1920_v13, %v1921_v48  ;;  %v1928_v35 = vmax.f32 %v1926_v44, %v1927_v25  ;;  %v1934_v59 = vmax.f32 %v1932_v15, %v1933_v2 }
 0x399   : > { %v1944_v1 = vmax.f32 %v1900_v12, %v1943_v16  ;;  %v1905_v23 = vrot.slane %v1904_v17, 1  ;;  %v1911_v27 = vrot.slane %v1910_v20, 1  ;;  %v1917_v38 = vrot.slane %v1916_v57, 1 }
 0x39a   : > { %v1940_v21 = vmax.f32 %v1938_v31, %v1939_v24  ;;  %v1923_v62 = vrot.slane %v1922_v32, 1  ;;  %v1929_v41 = vrot.slane %v1928_v35, 1  ;;  %v1935_v54 = vrot.slane %v1934_v59, 1 }
 0x39b   : > { %v1945_v6 = vrot.slane %v1944_v1, 2  ;;  %v1906_v36 = vmax.f32 %v1904_v17, %v1905_v23  ;;  %v1912_v10 = vmax.f32 %v1910_v20, %v1911_v27  ;;  %v1918_v50 = vmax.f32 %v1916_v57, %v1917_v38 }
 0x39c   : > { %v1941_v58 = vrot.slane %v1940_v21, 1  ;;  %v1924_v19 = vmax.f32 %v1922_v32, %v1923_v62  ;;  %v1930_v28 = vmax.f32 %v1928_v35, %v1929_v41  ;;  %v1936_v56 = vmax.f32 %v1934_v59, %v1935_v54 }
 0x39d   : > { %v1946_v26 = vmax.f32 %v1944_v1, %v1945_v6  ;;  %v1957_v29 = vrot.slane %v1912_v10, 7  ;;  %v1958_v5 = vrot.slane %v1918_v50, 6  ;;  %vm3504_vm8 = vcmask 1043456  }
 0x39e   : > { %v1942_v49 = vmax.f32 %v1940_v21, %v1941_v58  ;;  %v1959_v40 = vrot.slane %v1924_v19, 5  ;;  %v1960_v4 = vrot.slane %v1930_v28, 4  ;;  %v1961_v63 = vrot.slane %v1936_v56, 3 }
 0x39f   : > { %v1947_v22 = vrot.slane %v1946_v26, 1  ;;  %v1965_v33 = vsel %vm1964_vm0, %v1906_v36, %v1957_v29 }
 0x3a0   : > { %v1962_v9 = vrot.slane %v1942_v49, 2  ;;  %v1967_v3 = vsel %vm1966_vm3, %v1958_v5, %v1959_v40  ;;  %v1971_v52 = vsel %vm1970_vm5, %v1960_v4, %v1961_v63 }
 0x3a1   : > { %v1948_v7 = vmax.f32 %v1946_v26, %v1947_v22  ;;  %v1969_v30 = vsel %vm1968_vm4, %v1965_v33, %v1967_v3 }
 0x3a3   : > { %v1963_v8 = vrot.slane %v1948_v7, 1 }
 0x3a5   : > { %v1973_v55 = vsel %vm1972_vm6, %v1962_v9, %v1963_v8 }
 0x3a6   : > { %v1975_v37 = vsel %vm1974_vm7, %v1971_v52, %v1973_v55 }
 0x3a7   : > { %v1976_v45 = vsel %vm3504_vm8, %v1969_v30, %v1975_v37 }
 0x3a8   : > { %1978 = vst [vmem:[%s2684_s29] sm:$0xff] %v1976_v45 }
 0x3a9 PF: > { %s18_s28 = sadd.s32 1, %s2575_s28   ;;  %s3505_s24 = smov %s2567_s26 }
 0x3aa   : > { %p15_p12 = scmp.ge.s32.totalorder %s18_s28, 10   ;;  %s3506_s25 = smov %s2571_s27 }
 0x3ab   : > { %s3507_s26 = smov %s3510_s30  ;;  %s3508_s27 = smov %s3514_s8 }
 0x3ac   :  { %17 = sbr.rel (!%p15_p12) target bundleno = 3 (0x3), region = 91 }
 0x3b1   :  { %1998 = vsyncpa [#allocation4], 1 }
 0x3b2   :  { %2000 = vsyncpa [#allocation4 + $0x1], 1 }

</bundles_post_ra>
